<compile_context>
chip_gen: v7x
topology: tpu7x:2x2x1
jax: 0.10.0
libtpu: 0.0.40
codegen_flags: <defaults>
</compile_context>

<pallas_src>
import functools

import jax
import jax.numpy as jnp
from jax import lax
from jax.experimental import pallas as pl
from jax.experimental.pallas import tpu as pltpu


def _rup(x, m):
    return ((x + m - 1) // m) * m


def _vmem_capacity_bytes():
    """Physical VMEM of the local TPU generation (conservative fallback)."""
    try:
        info = pltpu.get_tpu_info()
        cap = int(getattr(info, "vmem_capacity_bytes", 0) or 0)
        if cap > 0:
            return cap
    except Exception:
        pass
    return 64 << 20  # v7x floor; v5e / v6e have 128 MiB.


def _pick_block_rows(batch_size, feat_dim, seq_len, itemsize, requested=None):
    """Row-tile size: multiple of the sublane pack, divides B, fits the VMEM
    budget, and (when possible) leaves >= 2 tiles for the parallel axis."""
    pack = 16 if itemsize < 4 else 8            # bf16 packs 16 sublanes / vreg
    cap = _vmem_capacity_bytes()
    budget = int(0.60 * cap)
    # VMEM that does not scale with bm.
    fixed = (batch_size * feat_dim * itemsize                   # (B, D) feats, 1 buf
             + _rup(seq_len, 8) * _rup(batch_size, 128) * 4     # (T, B) labels
             + 2 * 2 * _rup(seq_len, 8) * 128 * 4)              # output block
    # VMEM per tile row.
    per_row = (batch_size * 4                                   # cached log_prob
               + 4 * batch_size * 4                             # softmax temporaries
               + 2 * feat_dim * itemsize                        # 2x-buffered feat tile
               + seq_len * 128 * 4)                             # (T, bm, 1) labels
    avail = max(budget - fixed, 2 << 20)
    bm_target = max(pack, min(batch_size, avail // per_row, 1024))
    if requested is not None:
        bm_target = min(bm_target, max(8, int(requested)))
    # Prefer >= 2 row tiles so the single "parallel" grid axis can shard across
    # TensorCores (v7x megacore).
    if batch_size >= 2 * pack:
        bm_target = min(bm_target, batch_size // 2)

    def _best_divisor(mult):
        best, d = 0, mult
        while d <= bm_target:
            if batch_size % d == 0:
                best = d
            d += mult
        return best

    bm = _best_divisor(pack)
    if bm == 0:
        bm = batch_size   # single tile; block == full dim is always layout-legal
    return bm


def _supcon_seq_kernel(f_tile_ref, f_all_ref, lab_col_ref, lab_row_ref,
                       out_ref, logp_scr,
                       *, block_rows, batch_size, seq_len, inv_temperature):
    r = pl.program_id(0)

    # ---- once per row tile: cached log-prob tile with the diagonal zeroed ----
    sim = lax.dot_general(
        f_tile_ref[...], f_all_ref[...],
        dimension_numbers=(((1,), (1,)), ((), ())),     # (bm, D) . (B, D)^T
        preferred_element_type=jnp.float32) * inv_temperature
    logits = sim - jnp.max(sim, axis=1, keepdims=True)  # (bm, B) f32
    rows = lax.broadcasted_iota(jnp.int32, (block_rows, batch_size), 0)
    cols = lax.broadcasted_iota(jnp.int32, (block_rows, batch_size), 1)
    is_diag = cols == rows + r * block_rows
    denom = jnp.sum(jnp.where(is_diag, 0.0, jnp.exp(logits)),
                    axis=1, keepdims=True) + 1e-20
    # Zero the diagonal of log_prob once: eq is always true on the diagonal, so
    # the per-step positive sums then need no separate diagonal correction.
    logp_scr[...] = jnp.where(is_diag, 0.0, logits - jnp.log(denom))

    # ---- per-timestep masked mean log-prob of positives (labels resident) ----
    def step(t, carry):
        lab_col = lab_col_ref[t]                         # (bm, 1) int32
        lab_row = lab_row_ref[pl.ds(t, 1), :]            # (1,  B) int32
        eq = lab_col == lab_row                          # (bm, B) bool
        mask_sum = jnp.sum(jnp.where(eq, 1.0, 0.0),
                           axis=1, keepdims=True) - 1.0  # drop diagonal
        pos_sum = jnp.sum(jnp.where(eq, logp_scr[...], 0.0),
                          axis=1, keepdims=True)         # diag already zeroed
        single = jnp.where(mask_sum == 0.0, 1.0, 0.0)    # (bm, 1)
        mlpp = pos_sum * pl.reciprocal(mask_sum + single, approx=False)
        loss_vec = -mlpp * (1.0 - single)
        out_ref[0, 0, pl.ds(t, 1), :] = jnp.full((1, 128), jnp.sum(loss_vec),
                                                 dtype=jnp.float32)
        out_ref[0, 1, pl.ds(t, 1), :] = jnp.full((1, 128), jnp.sum(single),
                                                 dtype=jnp.float32)
        return carry

    lax.fori_loop(0, seq_len, step, None, unroll=bool(seq_len <= 8))


def supcon_loss_seq(features, labels, temperature=0.07, *,
                    matmul_dtype=jnp.bfloat16, block_rows=None):
    """features: (B, D) float; labels: (B, T) class ids.  Returns scalar loss.

    matmul_dtype controls the MXU input precision (bf16 default is the native
    MXU path on v5e/v6e/v7x; float32 reproduces fp32 reference numerics but
    runs a slower multi-pass MXU emulation)."""
    B, D = features.shape
    assert labels.shape[0] == B
    T = labels.shape[1]
    # TODO(synk): pad/mask support for batch sizes that are not a multiple of 8
    # (and pad B to a multiple of 128 for lane-dense compares; perf only).
    assert B % 8 == 0, "batch size must be a multiple of 8 (TPU sublane tile)"

    f = features.astype(matmul_dtype)
    f_item = jnp.dtype(matmul_dtype).itemsize
    bm = _pick_block_rows(B, D, T, f_item, block_rows)
    G = B // bm

    lab_t = jnp.transpose(labels.astype(jnp.int32))      # (T, B), tiny
    lab_col = lab_t[:, :, None]                          # (T, B, 1)

    kernel = functools.partial(
        _supcon_seq_kernel, block_rows=bm, batch_size=B, seq_len=T,
        inv_temperature=float(1.0 / temperature))

    cap = _vmem_capacity_bytes()
    vmem_est = (B * D * f_item                           # (B, D) features (1 buffer)
                + 2 * bm * D * f_item                    # feature tile (2 buffers)
                + _rup(T, 8) * _rup(B, 128) * 4          # (T, B) labels
                + 2 * T * _rup(bm, 8) * 128 * 4          # (T, bm, 1) labels (2 bufs)
                + bm * _rup(B, 128) * 4                  # log_prob scratch
                + 4 * bm * _rup(B, 128) * 4              # softmax temporaries
                + 2 * 2 * _rup(T, 8) * 128 * 4)          # output block (2 buffers)
    vmem_limit = int(min(max(int(vmem_est * 1.25), 16 << 20), int(0.70 * cap)))

    out_shape = jax.ShapeDtypeStruct((G, 2, T, 128), jnp.float32)

    def build_call(single_buffer_consts):
        if single_buffer_consts:
            f_all_spec = pl.BlockSpec((B, D), lambda r: (0, 0),
                                      pipeline_mode=pl.Buffered(1))
            lab_row_spec = pl.BlockSpec((T, B), lambda r: (0, 0),
                                        pipeline_mode=pl.Buffered(1))
        else:
            f_all_spec = pl.BlockSpec((B, D), lambda r: (0, 0))
            lab_row_spec = pl.BlockSpec((T, B), lambda r: (0, 0))
        return pl.pallas_call(
            kernel,
            out_shape=out_shape,
            grid_spec=pltpu.PrefetchScalarGridSpec(
                num_scalar_prefetch=0,
                grid=(G,),
                in_specs=[
                    pl.BlockSpec((bm, D), lambda r: (r, 0)),        # feature row tile
                    f_all_spec,                                     # all features
                    pl.BlockSpec((T, bm, 1), lambda r: (0, r, 0)),  # tile labels (col)
                    lab_row_spec,                                   # all labels (row)
                ],
                out_specs=pl.BlockSpec((1, 2, T, 128), lambda r: (r, 0, 0, 0)),
                scratch_shapes=[pltpu.VMEM((bm, B), jnp.float32)]),
            compiler_params=pltpu.CompilerParams(
                dimension_semantics=("parallel",),
                vmem_limit_bytes=vmem_limit),
        )

    try:
        parts = build_call(True)(f, f, lab_col, lab_t)
    except Exception:  # fallback if single-buffer pipeline hint is unsupported
        parts = build_call(False)(f, f, lab_col, lab_t)

    # Finalize: per-timestep normalization and mean over timesteps (tiny).
    loss_sum_t = jnp.sum(parts[:, 0, :, 0], axis=0)      # (T,)
    single_sum_t = jnp.sum(parts[:, 1, :, 0], axis=0)    # (T,)
    step_loss = loss_sum_t / (jnp.float32(B) - single_sum_t)
    return jnp.mean(step_loss)


def supcon_loss_seq_ref(features, labels, temperature=0.07, matmul_dtype=None):
    """Pure-JAX reference mirroring the PyTorch forward.  If matmul_dtype is
    given, features are rounded through that dtype before the matmul, matching
    the kernel's MXU input precision."""
    B = features.shape[0]
    f = features.astype(jnp.float32)
    if matmul_dtype is not None and jnp.dtype(matmul_dtype) != jnp.dtype(jnp.float32):
        f = f.astype(matmul_dtype).astype(jnp.float32)
    sim = (f @ f.T) / temperature
    logits = sim - jnp.max(sim, axis=1, keepdims=True)
    logits_mask = 1.0 - jnp.eye(B, dtype=jnp.float32)
    exp_logits = jnp.exp(logits) * logits_mask
    log_prob = logits - jnp.log(jnp.sum(exp_logits, axis=1, keepdims=True) + 1e-20)
    losses = []
    for i in range(labels.shape[1]):
        lab = labels[:, i:i + 1]
        mask = (lab == lab.T).astype(jnp.float32) * logits_mask
        mask_sum = mask.sum(1)
        single = (mask_sum == 0).astype(jnp.float32)
        mlpp = (mask * log_prob).sum(1) / (mask_sum + single)
        loss = -mlpp * (1.0 - single)
        losses.append(loss.sum() / (B - single.sum()))
    return jnp.mean(jnp.stack(losses))


if __name__ == "__main__":
    key = jax.random.PRNGKey(0)
    kf1, kl1, kf2, kl2 = jax.random.split(key, 4)

    # Case 1: single row tile (G == 1), bf16 MXU path, tiny shapes.
    B1, D1, T1 = 8, 32, 8
    feats1 = jax.random.normal(kf1, (B1, D1), dtype=jnp.float32)
    labels1 = jax.random.randint(kl1, (B1, T1), 0, 3)
    out1 = jax.block_until_ready(
        supcon_loss_seq(feats1, labels1, temperature=0.07))
    ref1 = jax.block_until_ready(
        supcon_loss_seq_ref(feats1, labels1, temperature=0.07,
                            matmul_dtype=jnp.bfloat16))
    assert jnp.allclose(out1, ref1, rtol=2e-3, atol=2e-3), (out1, ref1)

    # Case 2: >= 2 row tiles on the "parallel" axis + in-kernel timestep loop.
    B2, D2, T2 = 32, 64, 8
    feats2 = jax.random.normal(kf2, (B2, D2), dtype=jnp.float32)
    labels2 = jax.random.randint(kl2, (B2, T2), 0, 4)
    out2 = jax.block_until_ready(
        supcon_loss_seq(feats2, labels2, temperature=0.07))
    ref2 = jax.block_until_ready(
        supcon_loss_seq_ref(feats2, labels2, temperature=0.07,
                            matmul_dtype=jnp.bfloat16))
    assert jnp.allclose(out2, ref2, rtol=2e-3, atol=2e-3), (out2, ref2)

    print("KERNEL_OK")
</pallas_src>

<mosaic_0001>
module attributes {stable_mosaic.version = 11 : i64} {
  func.func @_supcon_seq_kernel(%arg0: i32, %arg1: memref<8x32xbf16, #tpu.memory_space<vmem>>, %arg2: memref<8x32xbf16, #tpu.memory_space<vmem>>, %arg3: memref<8x8x1xi32, #tpu.memory_space<vmem>>, %arg4: memref<8x8xi32, #tpu.memory_space<vmem>>, %arg5: memref<1x2x8x128xf32, #tpu.memory_space<vmem>>, %arg6: memref<8x8xf32, #tpu.memory_space<vmem>>) attributes {dimension_semantics = [#tpu.dimension_semantics<parallel>], iteration_bounds = array<i64: 1>, scalar_prefetch = 0 : i64, scratch_operands = 1 : i64, tpu.core_type = #tpu.core_type<tc>, window_params = [{transform_indices = @transform_0, window_bounds = array<i64: 8, 32>}, {pipeline_mode = #tpu.pipeline_mode<synchronous>, transform_indices = @transform_1, window_bounds = array<i64: 8, 32>}, {transform_indices = @transform_2, window_bounds = array<i64: 8, 8, 1>}, {pipeline_mode = #tpu.pipeline_mode<synchronous>, transform_indices = @transform_3, window_bounds = array<i64: 8, 8>}, {transform_indices = @transform_4, window_bounds = array<i64: 1, 2, 8, 128>}]} {
    %c0 = arith.constant 0 : index
    %c0_0 = arith.constant 0 : index
    %0 = vector.load %arg1[%c0, %c0_0] : memref<8x32xbf16, #tpu.memory_space<vmem>>, vector<8x32xbf16>
    %c0_1 = arith.constant 0 : index
    %c0_2 = arith.constant 0 : index
    %1 = vector.load %arg2[%c0_1, %c0_2] : memref<8x32xbf16, #tpu.memory_space<vmem>>, vector<8x32xbf16>
    %cst = arith.constant dense<0.000000e+00> : vector<8x8xf32>
    %2 = tpu.matmul %0, %1, %cst {dimension_numbers = #tpu.dot_dimension_numbers<[1], [1], [0], [0], [0, 0, 1, 0], [], []>} : vector<8x32xbf16>, vector<8x32xbf16>, vector<8x8xf32> -> vector<8x8xf32>
    %cst_3 = arith.constant 14.2857141 : f32
    %3 = vector.broadcast %cst_3 : f32 to vector<8x8xf32>
    %4 = arith.mulf %2, %3 : vector<8x8xf32>
    %cst_4 = arith.constant dense<0xFF800000> : vector<8xf32>
    %5 = vector.multi_reduction <maximumf>, %4, %cst_4 [1] : vector<8x8xf32> to vector<8xf32>
    %6 = vector.shape_cast %5 : vector<8xf32> to vector<8x1xf32>
    %7 = vector.broadcast %6 : vector<8x1xf32> to vector<8x8xf32>
    %8 = arith.subf %4, %7 : vector<8x8xf32>
    %9 = tpu.iota {dimensions = array<i32: 0>} : vector<8x8xi32>
    %10 = tpu.iota {dimensions = array<i32: 1>} : vector<8x8xi32>
    %c8_i32 = arith.constant 8 : i32
    %11 = arith.muli %arg0, %c8_i32 : i32
    %12 = vector.broadcast %11 : i32 to vector<8x8xi32>
    %13 = arith.addi %9, %12 : vector<8x8xi32>
    %14 = arith.cmpi eq, %10, %13 : vector<8x8xi32>
    %15 = math.exp %8 : vector<8x8xf32>
    %cst_5 = arith.constant 0.000000e+00 : f32
    %16 = vector.broadcast %cst_5 : f32 to vector<8x8xf32>
    %17 = arith.select %14, %16, %15 : vector<8x8xi1>, vector<8x8xf32>
    %cst_6 = arith.constant dense<0.000000e+00> : vector<8xf32>
    %18 = vector.multi_reduction <add>, %17, %cst_6 [1] : vector<8x8xf32> to vector<8xf32>
    %19 = vector.shape_cast %18 : vector<8xf32> to vector<8x1xf32>
    %cst_7 = arith.constant 9.99999968E-21 : f32
    %20 = vector.broadcast %cst_7 : f32 to vector<8x1xf32>
    %21 = arith.addf %19, %20 : vector<8x1xf32>
    %22 = math.log %21 : vector<8x1xf32>
    %23 = vector.broadcast %22 : vector<8x1xf32> to vector<8x8xf32>
    %24 = arith.subf %8, %23 : vector<8x8xf32>
    %cst_8 = arith.constant 0.000000e+00 : f32
    %25 = vector.broadcast %cst_8 : f32 to vector<8x8xf32>
    %26 = arith.select %14, %25, %24 : vector<8x8xi1>, vector<8x8xf32>
    %c0_9 = arith.constant 0 : index
    %c0_10 = arith.constant 0 : index
    %27 = vector.load %arg6[%c0_9, %c0_10] : memref<8x8xf32, #tpu.memory_space<vmem>>, vector<8x8xf32>
    tpu.vector_store %arg6[%c0_9, %c0_10], %26 {strides = array<i32>} : memref<8x8xf32, #tpu.memory_space<vmem>>, vector<8x8xf32>,
    %c0_i32 = arith.constant 0 : i32
    %28 = arith.index_cast %c0_i32 : i32 to index
    %c0_11 = arith.constant 0 : index
    %c0_12 = arith.constant 0 : index
    %29 = vector.load %arg3[%28, %c0_11, %c0_12] : memref<8x8x1xi32, #tpu.memory_space<vmem>>, vector<1x8x1xi32>
    %30 = vector.shape_cast %29 : vector<1x8x1xi32> to vector<8x1xi32>
    %31 = arith.index_cast %c0_i32 : i32 to index
    %c0_13 = arith.constant 0 : index
    %32 = vector.load %arg4[%31, %c0_13] : memref<8x8xi32, #tpu.memory_space<vmem>>, vector<1x8xi32>
    %33 = vector.broadcast %30 : vector<8x1xi32> to vector<8x8xi32>
    %34 = vector.broadcast %32 : vector<1x8xi32> to vector<8x8xi32>
    %35 = arith.cmpi eq, %33, %34 : vector<8x8xi32>
    %cst_14 = arith.constant 1.000000e+00 : f32
    %cst_15 = arith.constant 0.000000e+00 : f32
    %36 = vector.broadcast %cst_14 : f32 to vector<8x8xf32>
    %37 = vector.broadcast %cst_15 : f32 to vector<8x8xf32>
    %38 = arith.select %35, %36, %37 : vector<8x8xi1>, vector<8x8xf32>
    %cst_16 = arith.constant dense<0.000000e+00> : vector<8xf32>
    %39 = vector.multi_reduction <add>, %38, %cst_16 [1] : vector<8x8xf32> to vector<8xf32>
    %40 = vector.shape_cast %39 : vector<8xf32> to vector<8x1xf32>
    %cst_17 = arith.constant 1.000000e+00 : f32
    %41 = vector.broadcast %cst_17 : f32 to vector<8x1xf32>
    %42 = arith.subf %40, %41 : vector<8x1xf32>
    %c0_18 = arith.constant 0 : index
    %c0_19 = arith.constant 0 : index
    %43 = vector.load %arg6[%c0_18, %c0_19] : memref<8x8xf32, #tpu.memory_space<vmem>>, vector<8x8xf32>
    %cst_20 = arith.constant 0.000000e+00 : f32
    %44 = vector.broadcast %cst_20 : f32 to vector<8x8xf32>
    %45 = arith.select %35, %43, %44 : vector<8x8xi1>, vector<8x8xf32>
    %cst_21 = arith.constant dense<0.000000e+00> : vector<8xf32>
    %46 = vector.multi_reduction <add>, %45, %cst_21 [1] : vector<8x8xf32> to vector<8xf32>
    %47 = vector.shape_cast %46 : vector<8xf32> to vector<8x1xf32>
    %cst_22 = arith.constant 0.000000e+00 : f32
    %48 = vector.broadcast %cst_22 : f32 to vector<8x1xf32>
    %49 = arith.cmpf oeq, %42, %48 : vector<8x1xf32>
    %cst_23 = arith.constant 1.000000e+00 : f32
    %cst_24 = arith.constant 0.000000e+00 : f32
    %50 = vector.broadcast %cst_23 : f32 to vector<8x1xf32>
    %51 = vector.broadcast %cst_24 : f32 to vector<8x1xf32>
    %52 = arith.select %49, %50, %51 : vector<8x1xi1>, vector<8x1xf32>
    %53 = arith.addf %42, %52 : vector<8x1xf32>
    %54 = tpu.reciprocal %53 : vector<8x1xf32> -> vector<8x1xf32>
    %55 = arith.mulf %47, %54 : vector<8x1xf32>
    %cst_25 = arith.constant 0.000000e+00 : f32
    %56 = vector.broadcast %cst_25 : f32 to vector<8x1xf32>
    %57 = arith.subf %56, %55 : vector<8x1xf32>
    %cst_26 = arith.constant 1.000000e+00 : f32
    %58 = vector.broadcast %cst_26 : f32 to vector<8x1xf32>
    %59 = arith.subf %58, %52 : vector<8x1xf32>
    %60 = arith.mulf %57, %59 : vector<8x1xf32>
    %61 = vector.shape_cast %60 : vector<8x1xf32> to vector<1x8x1xf32>
    %cst_27 = arith.constant dense<0.000000e+00> : vector<1xf32>
    %62 = vector.multi_reduction <add>, %61, %cst_27 [1, 2] : vector<1x8x1xf32> to vector<1xf32>
    %63 = vector.shape_cast %62 : vector<1xf32> to vector<1x1x1xf32>
    %64 = vector.extract %63[0, 0, 0] : f32 from vector<1x1x1xf32>
    %65 = vector.broadcast %64 : f32 to vector<1x128xf32>
    %c0_28 = arith.constant 0 : index
    %c0_29 = arith.constant 0 : index
    %66 = arith.index_cast %c0_i32 : i32 to index
    %c0_30 = arith.constant 0 : index
    %67 = vector.load %arg5[%c0_28, %c0_29, %66, %c0_30] : memref<1x2x8x128xf32, #tpu.memory_space<vmem>>, vector<1x1x1x128xf32>
    %68 = vector.shape_cast %67 : vector<1x1x1x128xf32> to vector<1x128xf32>
    %69 = vector.shape_cast %65 : vector<1x128xf32> to vector<1x1x1x128xf32>
    tpu.vector_store %arg5[%c0_28, %c0_29, %66, %c0_30], %69 {strides = array<i32>} : memref<1x2x8x128xf32, #tpu.memory_space<vmem>>, vector<1x1x1x128xf32>,
    %70 = vector.shape_cast %52 : vector<8x1xf32> to vector<1x8x1xf32>
    %cst_31 = arith.constant dense<0.000000e+00> : vector<1xf32>
    %71 = vector.multi_reduction <add>, %70, %cst_31 [1, 2] : vector<1x8x1xf32> to vector<1xf32>
    %72 = vector.shape_cast %71 : vector<1xf32> to vector<1x1x1xf32>
    %73 = vector.extract %72[0, 0, 0] : f32 from vector<1x1x1xf32>
    %74 = vector.broadcast %73 : f32 to vector<1x128xf32>
    %c0_32 = arith.constant 0 : index
    %c1 = arith.constant 1 : index
    %75 = arith.index_cast %c0_i32 : i32 to index
    %c0_33 = arith.constant 0 : index
    %76 = vector.load %arg5[%c0_32, %c1, %75, %c0_33] : memref<1x2x8x128xf32, #tpu.memory_space<vmem>>, vector<1x1x1x128xf32>
    %77 = vector.shape_cast %76 : vector<1x1x1x128xf32> to vector<1x128xf32>
    %78 = vector.shape_cast %74 : vector<1x128xf32> to vector<1x1x1x128xf32>
    tpu.vector_store %arg5[%c0_32, %c1, %75, %c0_33], %78 {strides = array<i32>} : memref<1x2x8x128xf32, #tpu.memory_space<vmem>>, vector<1x1x1x128xf32>,
    %c1_i32 = arith.constant 1 : i32
    %79 = arith.index_cast %c1_i32 : i32 to index
    %c0_34 = arith.constant 0 : index
    %c0_35 = arith.constant 0 : index
    %80 = vector.load %arg3[%79, %c0_34, %c0_35] : memref<8x8x1xi32, #tpu.memory_space<vmem>>, vector<1x8x1xi32>
    %81 = vector.shape_cast %80 : vector<1x8x1xi32> to vector<8x1xi32>
    %82 = arith.index_cast %c1_i32 : i32 to index
    %c0_36 = arith.constant 0 : index
    %83 = vector.load %arg4[%82, %c0_36] : memref<8x8xi32, #tpu.memory_space<vmem>>, vector<1x8xi32>
    %84 = vector.broadcast %81 : vector<8x1xi32> to vector<8x8xi32>
    %85 = vector.broadcast %83 : vector<1x8xi32> to vector<8x8xi32>
    %86 = arith.cmpi eq, %84, %85 : vector<8x8xi32>
    %cst_37 = arith.constant 1.000000e+00 : f32
    %cst_38 = arith.constant 0.000000e+00 : f32
    %87 = vector.broadcast %cst_37 : f32 to vector<8x8xf32>
    %88 = vector.broadcast %cst_38 : f32 to vector<8x8xf32>
    %89 = arith.select %86, %87, %88 : vector<8x8xi1>, vector<8x8xf32>
    %cst_39 = arith.constant dense<0.000000e+00> : vector<8xf32>
    %90 = vector.multi_reduction <add>, %89, %cst_39 [1] : vector<8x8xf32> to vector<8xf32>
    %91 = vector.shape_cast %90 : vector<8xf32> to vector<8x1xf32>
    %cst_40 = arith.constant 1.000000e+00 : f32
    %92 = vector.broadcast %cst_40 : f32 to vector<8x1xf32>
    %93 = arith.subf %91, %92 : vector<8x1xf32>
    %c0_41 = arith.constant 0 : index
    %c0_42 = arith.constant 0 : index
    %94 = vector.load %arg6[%c0_41, %c0_42] : memref<8x8xf32, #tpu.memory_space<vmem>>, vector<8x8xf32>
    %cst_43 = arith.constant 0.000000e+00 : f32
    %95 = vector.broadcast %cst_43 : f32 to vector<8x8xf32>
    %96 = arith.select %86, %94, %95 : vector<8x8xi1>, vector<8x8xf32>
    %cst_44 = arith.constant dense<0.000000e+00> : vector<8xf32>
    %97 = vector.multi_reduction <add>, %96, %cst_44 [1] : vector<8x8xf32> to vector<8xf32>
    %98 = vector.shape_cast %97 : vector<8xf32> to vector<8x1xf32>
    %cst_45 = arith.constant 0.000000e+00 : f32
    %99 = vector.broadcast %cst_45 : f32 to vector<8x1xf32>
    %100 = arith.cmpf oeq, %93, %99 : vector<8x1xf32>
    %cst_46 = arith.constant 1.000000e+00 : f32
    %cst_47 = arith.constant 0.000000e+00 : f32
    %101 = vector.broadcast %cst_46 : f32 to vector<8x1xf32>
    %102 = vector.broadcast %cst_47 : f32 to vector<8x1xf32>
    %103 = arith.select %100, %101, %102 : vector<8x1xi1>, vector<8x1xf32>
    %104 = arith.addf %93, %103 : vector<8x1xf32>
    %105 = tpu.reciprocal %104 : vector<8x1xf32> -> vector<8x1xf32>
    %106 = arith.mulf %98, %105 : vector<8x1xf32>
    %cst_48 = arith.constant 0.000000e+00 : f32
    %107 = vector.broadcast %cst_48 : f32 to vector<8x1xf32>
    %108 = arith.subf %107, %106 : vector<8x1xf32>
    %cst_49 = arith.constant 1.000000e+00 : f32
    %109 = vector.broadcast %cst_49 : f32 to vector<8x1xf32>
    %110 = arith.subf %109, %103 : vector<8x1xf32>
    %111 = arith.mulf %108, %110 : vector<8x1xf32>
    %112 = vector.shape_cast %111 : vector<8x1xf32> to vector<1x8x1xf32>
    %cst_50 = arith.constant dense<0.000000e+00> : vector<1xf32>
    %113 = vector.multi_reduction <add>, %112, %cst_50 [1, 2] : vector<1x8x1xf32> to vector<1xf32>
    %114 = vector.shape_cast %113 : vector<1xf32> to vector<1x1x1xf32>
    %115 = vector.extract %114[0, 0, 0] : f32 from vector<1x1x1xf32>
    %116 = vector.broadcast %115 : f32 to vector<1x128xf32>
    %c0_51 = arith.constant 0 : index
    %c0_52 = arith.constant 0 : index
    %117 = arith.index_cast %c1_i32 : i32 to index
    %c0_53 = arith.constant 0 : index
    %118 = vector.load %arg5[%c0_51, %c0_52, %117, %c0_53] : memref<1x2x8x128xf32, #tpu.memory_space<vmem>>, vector<1x1x1x128xf32>
    %119 = vector.shape_cast %118 : vector<1x1x1x128xf32> to vector<1x128xf32>
    %120 = vector.shape_cast %116 : vector<1x128xf32> to vector<1x1x1x128xf32>
    tpu.vector_store %arg5[%c0_51, %c0_52, %117, %c0_53], %120 {strides = array<i32>} : memref<1x2x8x128xf32, #tpu.memory_space<vmem>>, vector<1x1x1x128xf32>,
    %121 = vector.shape_cast %103 : vector<8x1xf32> to vector<1x8x1xf32>
    %cst_54 = arith.constant dense<0.000000e+00> : vector<1xf32>
    %122 = vector.multi_reduction <add>, %121, %cst_54 [1, 2] : vector<1x8x1xf32> to vector<1xf32>
    %123 = vector.shape_cast %122 : vector<1xf32> to vector<1x1x1xf32>
    %124 = vector.extract %123[0, 0, 0] : f32 from vector<1x1x1xf32>
    %125 = vector.broadcast %124 : f32 to vector<1x128xf32>
    %c0_55 = arith.constant 0 : index
    %c1_56 = arith.constant 1 : index
    %126 = arith.index_cast %c1_i32 : i32 to index
    %c0_57 = arith.constant 0 : index
    %127 = vector.load %arg5[%c0_55, %c1_56, %126, %c0_57] : memref<1x2x8x128xf32, #tpu.memory_space<vmem>>, vector<1x1x1x128xf32>
    %128 = vector.shape_cast %127 : vector<1x1x1x128xf32> to vector<1x128xf32>
    %129 = vector.shape_cast %125 : vector<1x128xf32> to vector<1x1x1x128xf32>
    tpu.vector_store %arg5[%c0_55, %c1_56, %126, %c0_57], %129 {strides = array<i32>} : memref<1x2x8x128xf32, #tpu.memory_space<vmem>>, vector<1x1x1x128xf32>,
    %c2_i32 = arith.constant 2 : i32
    %130 = arith.index_cast %c2_i32 : i32 to index
    %c0_58 = arith.constant 0 : index
    %c0_59 = arith.constant 0 : index
    %131 = vector.load %arg3[%130, %c0_58, %c0_59] : memref<8x8x1xi32, #tpu.memory_space<vmem>>, vector<1x8x1xi32>
    %132 = vector.shape_cast %131 : vector<1x8x1xi32> to vector<8x1xi32>
    %133 = arith.index_cast %c2_i32 : i32 to index
    %c0_60 = arith.constant 0 : index
    %134 = vector.load %arg4[%133, %c0_60] : memref<8x8xi32, #tpu.memory_space<vmem>>, vector<1x8xi32>
    %135 = vector.broadcast %132 : vector<8x1xi32> to vector<8x8xi32>
    %136 = vector.broadcast %134 : vector<1x8xi32> to vector<8x8xi32>
    %137 = arith.cmpi eq, %135, %136 : vector<8x8xi32>
    %cst_61 = arith.constant 1.000000e+00 : f32
    %cst_62 = arith.constant 0.000000e+00 : f32
    %138 = vector.broadcast %cst_61 : f32 to vector<8x8xf32>
    %139 = vector.broadcast %cst_62 : f32 to vector<8x8xf32>
    %140 = arith.select %137, %138, %139 : vector<8x8xi1>, vector<8x8xf32>
    %cst_63 = arith.constant dense<0.000000e+00> : vector<8xf32>
    %141 = vector.multi_reduction <add>, %140, %cst_63 [1] : vector<8x8xf32> to vector<8xf32>
    %142 = vector.shape_cast %141 : vector<8xf32> to vector<8x1xf32>
    %cst_64 = arith.constant 1.000000e+00 : f32
    %143 = vector.broadcast %cst_64 : f32 to vector<8x1xf32>
    %144 = arith.subf %142, %143 : vector<8x1xf32>
    %c0_65 = arith.constant 0 : index
    %c0_66 = arith.constant 0 : index
    %145 = vector.load %arg6[%c0_65, %c0_66] : memref<8x8xf32, #tpu.memory_space<vmem>>, vector<8x8xf32>
    %cst_67 = arith.constant 0.000000e+00 : f32
    %146 = vector.broadcast %cst_67 : f32 to vector<8x8xf32>
    %147 = arith.select %137, %145, %146 : vector<8x8xi1>, vector<8x8xf32>
    %cst_68 = arith.constant dense<0.000000e+00> : vector<8xf32>
    %148 = vector.multi_reduction <add>, %147, %cst_68 [1] : vector<8x8xf32> to vector<8xf32>
    %149 = vector.shape_cast %148 : vector<8xf32> to vector<8x1xf32>
    %cst_69 = arith.constant 0.000000e+00 : f32
    %150 = vector.broadcast %cst_69 : f32 to vector<8x1xf32>
    %151 = arith.cmpf oeq, %144, %150 : vector<8x1xf32>
    %cst_70 = arith.constant 1.000000e+00 : f32
    %cst_71 = arith.constant 0.000000e+00 : f32
    %152 = vector.broadcast %cst_70 : f32 to vector<8x1xf32>
    %153 = vector.broadcast %cst_71 : f32 to vector<8x1xf32>
    %154 = arith.select %151, %152, %153 : vector<8x1xi1>, vector<8x1xf32>
    %155 = arith.addf %144, %154 : vector<8x1xf32>
    %156 = tpu.reciprocal %155 : vector<8x1xf32> -> vector<8x1xf32>
    %157 = arith.mulf %149, %156 : vector<8x1xf32>
    %cst_72 = arith.constant 0.000000e+00 : f32
    %158 = vector.broadcast %cst_72 : f32 to vector<8x1xf32>
    %159 = arith.subf %158, %157 : vector<8x1xf32>
    %cst_73 = arith.constant 1.000000e+00 : f32
    %160 = vector.broadcast %cst_73 : f32 to vector<8x1xf32>
    %161 = arith.subf %160, %154 : vector<8x1xf32>
    %162 = arith.mulf %159, %161 : vector<8x1xf32>
    %163 = vector.shape_cast %162 : vector<8x1xf32> to vector<1x8x1xf32>
    %cst_74 = arith.constant dense<0.000000e+00> : vector<1xf32>
    %164 = vector.multi_reduction <add>, %163, %cst_74 [1, 2] : vector<1x8x1xf32> to vector<1xf32>
    %165 = vector.shape_cast %164 : vector<1xf32> to vector<1x1x1xf32>
    %166 = vector.extract %165[0, 0, 0] : f32 from vector<1x1x1xf32>
    %167 = vector.broadcast %166 : f32 to vector<1x128xf32>
    %c0_75 = arith.constant 0 : index
    %c0_76 = arith.constant 0 : index
    %168 = arith.index_cast %c2_i32 : i32 to index
    %c0_77 = arith.constant 0 : index
    %169 = vector.load %arg5[%c0_75, %c0_76, %168, %c0_77] : memref<1x2x8x128xf32, #tpu.memory_space<vmem>>, vector<1x1x1x128xf32>
    %170 = vector.shape_cast %169 : vector<1x1x1x128xf32> to vector<1x128xf32>
    %171 = vector.shape_cast %167 : vector<1x128xf32> to vector<1x1x1x128xf32>
    tpu.vector_store %arg5[%c0_75, %c0_76, %168, %c0_77], %171 {strides = array<i32>} : memref<1x2x8x128xf32, #tpu.memory_space<vmem>>, vector<1x1x1x128xf32>,
    %172 = vector.shape_cast %154 : vector<8x1xf32> to vector<1x8x1xf32>
    %cst_78 = arith.constant dense<0.000000e+00> : vector<1xf32>
    %173 = vector.multi_reduction <add>, %172, %cst_78 [1, 2] : vector<1x8x1xf32> to vector<1xf32>
    %174 = vector.shape_cast %173 : vector<1xf32> to vector<1x1x1xf32>
    %175 = vector.extract %174[0, 0, 0] : f32 from vector<1x1x1xf32>
    %176 = vector.broadcast %175 : f32 to vector<1x128xf32>
    %c0_79 = arith.constant 0 : index
    %c1_80 = arith.constant 1 : index
    %177 = arith.index_cast %c2_i32 : i32 to index
    %c0_81 = arith.constant 0 : index
    %178 = vector.load %arg5[%c0_79, %c1_80, %177, %c0_81] : memref<1x2x8x128xf32, #tpu.memory_space<vmem>>, vector<1x1x1x128xf32>
    %179 = vector.shape_cast %178 : vector<1x1x1x128xf32> to vector<1x128xf32>
    %180 = vector.shape_cast %176 : vector<1x128xf32> to vector<1x1x1x128xf32>
    tpu.vector_store %arg5[%c0_79, %c1_80, %177, %c0_81], %180 {strides = array<i32>} : memref<1x2x8x128xf32, #tpu.memory_space<vmem>>, vector<1x1x1x128xf32>,
    %c3_i32 = arith.constant 3 : i32
    %181 = arith.index_cast %c3_i32 : i32 to index
    %c0_82 = arith.constant 0 : index
    %c0_83 = arith.constant 0 : index
    %182 = vector.load %arg3[%181, %c0_82, %c0_83] : memref<8x8x1xi32, #tpu.memory_space<vmem>>, vector<1x8x1xi32>
    %183 = vector.shape_cast %182 : vector<1x8x1xi32> to vector<8x1xi32>
    %184 = arith.index_cast %c3_i32 : i32 to index
    %c0_84 = arith.constant 0 : index
    %185 = vector.load %arg4[%184, %c0_84] : memref<8x8xi32, #tpu.memory_space<vmem>>, vector<1x8xi32>
    %186 = vector.broadcast %183 : vector<8x1xi32> to vector<8x8xi32>
    %187 = vector.broadcast %185 : vector<1x8xi32> to vector<8x8xi32>
    %188 = arith.cmpi eq, %186, %187 : vector<8x8xi32>
    %cst_85 = arith.constant 1.000000e+00 : f32
    %cst_86 = arith.constant 0.000000e+00 : f32
    %189 = vector.broadcast %cst_85 : f32 to vector<8x8xf32>
    %190 = vector.broadcast %cst_86 : f32 to vector<8x8xf32>
    %191 = arith.select %188, %189, %190 : vector<8x8xi1>, vector<8x8xf32>
    %cst_87 = arith.constant dense<0.000000e+00> : vector<8xf32>
    %192 = vector.multi_reduction <add>, %191, %cst_87 [1] : vector<8x8xf32> to vector<8xf32>
    %193 = vector.shape_cast %192 : vector<8xf32> to vector<8x1xf32>
    %cst_88 = arith.constant 1.000000e+00 : f32
    %194 = vector.broadcast %cst_88 : f32 to vector<8x1xf32>
    %195 = arith.subf %193, %194 : vector<8x1xf32>
    %c0_89 = arith.constant 0 : index
    %c0_90 = arith.constant 0 : index
    %196 = vector.load %arg6[%c0_89, %c0_90] : memref<8x8xf32, #tpu.memory_space<vmem>>, vector<8x8xf32>
    %cst_91 = arith.constant 0.000000e+00 : f32
    %197 = vector.broadcast %cst_91 : f32 to vector<8x8xf32>
    %198 = arith.select %188, %196, %197 : vector<8x8xi1>, vector<8x8xf32>
    %cst_92 = arith.constant dense<0.000000e+00> : vector<8xf32>
    %199 = vector.multi_reduction <add>, %198, %cst_92 [1] : vector<8x8xf32> to vector<8xf32>
    %200 = vector.shape_cast %199 : vector<8xf32> to vector<8x1xf32>
    %cst_93 = arith.constant 0.000000e+00 : f32
    %201 = vector.broadcast %cst_93 : f32 to vector<8x1xf32>
    %202 = arith.cmpf oeq, %195, %201 : vector<8x1xf32>
    %cst_94 = arith.constant 1.000000e+00 : f32
    %cst_95 = arith.constant 0.000000e+00 : f32
    %203 = vector.broadcast %cst_94 : f32 to vector<8x1xf32>
    %204 = vector.broadcast %cst_95 : f32 to vector<8x1xf32>
    %205 = arith.select %202, %203, %204 : vector<8x1xi1>, vector<8x1xf32>
    %206 = arith.addf %195, %205 : vector<8x1xf32>
    %207 = tpu.reciprocal %206 : vector<8x1xf32> -> vector<8x1xf32>
    %208 = arith.mulf %200, %207 : vector<8x1xf32>
    %cst_96 = arith.constant 0.000000e+00 : f32
    %209 = vector.broadcast %cst_96 : f32 to vector<8x1xf32>
    %210 = arith.subf %209, %208 : vector<8x1xf32>
    %cst_97 = arith.constant 1.000000e+00 : f32
    %211 = vector.broadcast %cst_97 : f32 to vector<8x1xf32>
    %212 = arith.subf %211, %205 : vector<8x1xf32>
    %213 = arith.mulf %210, %212 : vector<8x1xf32>
    %214 = vector.shape_cast %213 : vector<8x1xf32> to vector<1x8x1xf32>
    %cst_98 = arith.constant dense<0.000000e+00> : vector<1xf32>
    %215 = vector.multi_reduction <add>, %214, %cst_98 [1, 2] : vector<1x8x1xf32> to vector<1xf32>
    %216 = vector.shape_cast %215 : vector<1xf32> to vector<1x1x1xf32>
    %217 = vector.extract %216[0, 0, 0] : f32 from vector<1x1x1xf32>
    %218 = vector.broadcast %217 : f32 to vector<1x128xf32>
    %c0_99 = arith.constant 0 : index
    %c0_100 = arith.constant 0 : index
    %219 = arith.index_cast %c3_i32 : i32 to index
    %c0_101 = arith.constant 0 : index
    %220 = vector.load %arg5[%c0_99, %c0_100, %219, %c0_101] : memref<1x2x8x128xf32, #tpu.memory_space<vmem>>, vector<1x1x1x128xf32>
    %221 = vector.shape_cast %220 : vector<1x1x1x128xf32> to vector<1x128xf32>
    %222 = vector.shape_cast %218 : vector<1x128xf32> to vector<1x1x1x128xf32>
    tpu.vector_store %arg5[%c0_99, %c0_100, %219, %c0_101], %222 {strides = array<i32>} : memref<1x2x8x128xf32, #tpu.memory_space<vmem>>, vector<1x1x1x128xf32>,
    %223 = vector.shape_cast %205 : vector<8x1xf32> to vector<1x8x1xf32>
    %cst_102 = arith.constant dense<0.000000e+00> : vector<1xf32>
    %224 = vector.multi_reduction <add>, %223, %cst_102 [1, 2] : vector<1x8x1xf32> to vector<1xf32>
    %225 = vector.shape_cast %224 : vector<1xf32> to vector<1x1x1xf32>
    %226 = vector.extract %225[0, 0, 0] : f32 from vector<1x1x1xf32>
    %227 = vector.broadcast %226 : f32 to vector<1x128xf32>
    %c0_103 = arith.constant 0 : index
    %c1_104 = arith.constant 1 : index
    %228 = arith.index_cast %c3_i32 : i32 to index
    %c0_105 = arith.constant 0 : index
    %229 = vector.load %arg5[%c0_103, %c1_104, %228, %c0_105] : memref<1x2x8x128xf32, #tpu.memory_space<vmem>>, vector<1x1x1x128xf32>
    %230 = vector.shape_cast %229 : vector<1x1x1x128xf32> to vector<1x128xf32>
    %231 = vector.shape_cast %227 : vector<1x128xf32> to vector<1x1x1x128xf32>
    tpu.vector_store %arg5[%c0_103, %c1_104, %228, %c0_105], %231 {strides = array<i32>} : memref<1x2x8x128xf32, #tpu.memory_space<vmem>>, vector<1x1x1x128xf32>,
    %c4_i32 = arith.constant 4 : i32
    %232 = arith.index_cast %c4_i32 : i32 to index
    %c0_106 = arith.constant 0 : index
    %c0_107 = arith.constant 0 : index
    %233 = vector.load %arg3[%232, %c0_106, %c0_107] : memref<8x8x1xi32, #tpu.memory_space<vmem>>, vector<1x8x1xi32>
    %234 = vector.shape_cast %233 : vector<1x8x1xi32> to vector<8x1xi32>
    %235 = arith.index_cast %c4_i32 : i32 to index
    %c0_108 = arith.constant 0 : index
    %236 = vector.load %arg4[%235, %c0_108] : memref<8x8xi32, #tpu.memory_space<vmem>>, vector<1x8xi32>
    %237 = vector.broadcast %234 : vector<8x1xi32> to vector<8x8xi32>
    %238 = vector.broadcast %236 : vector<1x8xi32> to vector<8x8xi32>
    %239 = arith.cmpi eq, %237, %238 : vector<8x8xi32>
    %cst_109 = arith.constant 1.000000e+00 : f32
    %cst_110 = arith.constant 0.000000e+00 : f32
    %240 = vector.broadcast %cst_109 : f32 to vector<8x8xf32>
    %241 = vector.broadcast %cst_110 : f32 to vector<8x8xf32>
    %242 = arith.select %239, %240, %241 : vector<8x8xi1>, vector<8x8xf32>
    %cst_111 = arith.constant dense<0.000000e+00> : vector<8xf32>
    %243 = vector.multi_reduction <add>, %242, %cst_111 [1] : vector<8x8xf32> to vector<8xf32>
    %244 = vector.shape_cast %243 : vector<8xf32> to vector<8x1xf32>
    %cst_112 = arith.constant 1.000000e+00 : f32
    %245 = vector.broadcast %cst_112 : f32 to vector<8x1xf32>
    %246 = arith.subf %244, %245 : vector<8x1xf32>
    %c0_113 = arith.constant 0 : index
    %c0_114 = arith.constant 0 : index
    %247 = vector.load %arg6[%c0_113, %c0_114] : memref<8x8xf32, #tpu.memory_space<vmem>>, vector<8x8xf32>
    %cst_115 = arith.constant 0.000000e+00 : f32
    %248 = vector.broadcast %cst_115 : f32 to vector<8x8xf32>
    %249 = arith.select %239, %247, %248 : vector<8x8xi1>, vector<8x8xf32>
    %cst_116 = arith.constant dense<0.000000e+00> : vector<8xf32>
    %250 = vector.multi_reduction <add>, %249, %cst_116 [1] : vector<8x8xf32> to vector<8xf32>
    %251 = vector.shape_cast %250 : vector<8xf32> to vector<8x1xf32>
    %cst_117 = arith.constant 0.000000e+00 : f32
    %252 = vector.broadcast %cst_117 : f32 to vector<8x1xf32>
    %253 = arith.cmpf oeq, %246, %252 : vector<8x1xf32>
    %cst_118 = arith.constant 1.000000e+00 : f32
    %cst_119 = arith.constant 0.000000e+00 : f32
    %254 = vector.broadcast %cst_118 : f32 to vector<8x1xf32>
    %255 = vector.broadcast %cst_119 : f32 to vector<8x1xf32>
    %256 = arith.select %253, %254, %255 : vector<8x1xi1>, vector<8x1xf32>
    %257 = arith.addf %246, %256 : vector<8x1xf32>
    %258 = tpu.reciprocal %257 : vector<8x1xf32> -> vector<8x1xf32>
    %259 = arith.mulf %251, %258 : vector<8x1xf32>
    %cst_120 = arith.constant 0.000000e+00 : f32
    %260 = vector.broadcast %cst_120 : f32 to vector<8x1xf32>
    %261 = arith.subf %260, %259 : vector<8x1xf32>
    %cst_121 = arith.constant 1.000000e+00 : f32
    %262 = vector.broadcast %cst_121 : f32 to vector<8x1xf32>
    %263 = arith.subf %262, %256 : vector<8x1xf32>
    %264 = arith.mulf %261, %263 : vector<8x1xf32>
    %265 = vector.shape_cast %264 : vector<8x1xf32> to vector<1x8x1xf32>
    %cst_122 = arith.constant dense<0.000000e+00> : vector<1xf32>
    %266 = vector.multi_reduction <add>, %265, %cst_122 [1, 2] : vector<1x8x1xf32> to vector<1xf32>
    %267 = vector.shape_cast %266 : vector<1xf32> to vector<1x1x1xf32>
    %268 = vector.extract %267[0, 0, 0] : f32 from vector<1x1x1xf32>
    %269 = vector.broadcast %268 : f32 to vector<1x128xf32>
    %c0_123 = arith.constant 0 : index
    %c0_124 = arith.constant 0 : index
    %270 = arith.index_cast %c4_i32 : i32 to index
    %c0_125 = arith.constant 0 : index
    %271 = vector.load %arg5[%c0_123, %c0_124, %270, %c0_125] : memref<1x2x8x128xf32, #tpu.memory_space<vmem>>, vector<1x1x1x128xf32>
    %272 = vector.shape_cast %271 : vector<1x1x1x128xf32> to vector<1x128xf32>
    %273 = vector.shape_cast %269 : vector<1x128xf32> to vector<1x1x1x128xf32>
    tpu.vector_store %arg5[%c0_123, %c0_124, %270, %c0_125], %273 {strides = array<i32>} : memref<1x2x8x128xf32, #tpu.memory_space<vmem>>, vector<1x1x1x128xf32>,
    %274 = vector.shape_cast %256 : vector<8x1xf32> to vector<1x8x1xf32>
    %cst_126 = arith.constant dense<0.000000e+00> : vector<1xf32>
    %275 = vector.multi_reduction <add>, %274, %cst_126 [1, 2] : vector<1x8x1xf32> to vector<1xf32>
    %276 = vector.shape_cast %275 : vector<1xf32> to vector<1x1x1xf32>
    %277 = vector.extract %276[0, 0, 0] : f32 from vector<1x1x1xf32>
    %278 = vector.broadcast %277 : f32 to vector<1x128xf32>
    %c0_127 = arith.constant 0 : index
    %c1_128 = arith.constant 1 : index
    %279 = arith.index_cast %c4_i32 : i32 to index
    %c0_129 = arith.constant 0 : index
    %280 = vector.load %arg5[%c0_127, %c1_128, %279, %c0_129] : memref<1x2x8x128xf32, #tpu.memory_space<vmem>>, vector<1x1x1x128xf32>
    %281 = vector.shape_cast %280 : vector<1x1x1x128xf32> to vector<1x128xf32>
    %282 = vector.shape_cast %278 : vector<1x128xf32> to vector<1x1x1x128xf32>
    tpu.vector_store %arg5[%c0_127, %c1_128, %279, %c0_129], %282 {strides = array<i32>} : memref<1x2x8x128xf32, #tpu.memory_space<vmem>>, vector<1x1x1x128xf32>,
    %c5_i32 = arith.constant 5 : i32
    %283 = arith.index_cast %c5_i32 : i32 to index
    %c0_130 = arith.constant 0 : index
    %c0_131 = arith.constant 0 : index
    %284 = vector.load %arg3[%283, %c0_130, %c0_131] : memref<8x8x1xi32, #tpu.memory_space<vmem>>, vector<1x8x1xi32>
    %285 = vector.shape_cast %284 : vector<1x8x1xi32> to vector<8x1xi32>
    %286 = arith.index_cast %c5_i32 : i32 to index
    %c0_132 = arith.constant 0 : index
    %287 = vector.load %arg4[%286, %c0_132] : memref<8x8xi32, #tpu.memory_space<vmem>>, vector<1x8xi32>
    %288 = vector.broadcast %285 : vector<8x1xi32> to vector<8x8xi32>
    %289 = vector.broadcast %287 : vector<1x8xi32> to vector<8x8xi32>
    %290 = arith.cmpi eq, %288, %289 : vector<8x8xi32>
    %cst_133 = arith.constant 1.000000e+00 : f32
    %cst_134 = arith.constant 0.000000e+00 : f32
    %291 = vector.broadcast %cst_133 : f32 to vector<8x8xf32>
    %292 = vector.broadcast %cst_134 : f32 to vector<8x8xf32>
    %293 = arith.select %290, %291, %292 : vector<8x8xi1>, vector<8x8xf32>
    %cst_135 = arith.constant dense<0.000000e+00> : vector<8xf32>
    %294 = vector.multi_reduction <add>, %293, %cst_135 [1] : vector<8x8xf32> to vector<8xf32>
    %295 = vector.shape_cast %294 : vector<8xf32> to vector<8x1xf32>
    %cst_136 = arith.constant 1.000000e+00 : f32
    %296 = vector.broadcast %cst_136 : f32 to vector<8x1xf32>
    %297 = arith.subf %295, %296 : vector<8x1xf32>
    %c0_137 = arith.constant 0 : index
    %c0_138 = arith.constant 0 : index
    %298 = vector.load %arg6[%c0_137, %c0_138] : memref<8x8xf32, #tpu.memory_space<vmem>>, vector<8x8xf32>
    %cst_139 = arith.constant 0.000000e+00 : f32
    %299 = vector.broadcast %cst_139 : f32 to vector<8x8xf32>
    %300 = arith.select %290, %298, %299 : vector<8x8xi1>, vector<8x8xf32>
    %cst_140 = arith.constant dense<0.000000e+00> : vector<8xf32>
    %301 = vector.multi_reduction <add>, %300, %cst_140 [1] : vector<8x8xf32> to vector<8xf32>
    %302 = vector.shape_cast %301 : vector<8xf32> to vector<8x1xf32>
    %cst_141 = arith.constant 0.000000e+00 : f32
    %303 = vector.broadcast %cst_141 : f32 to vector<8x1xf32>
    %304 = arith.cmpf oeq, %297, %303 : vector<8x1xf32>
    %cst_142 = arith.constant 1.000000e+00 : f32
    %cst_143 = arith.constant 0.000000e+00 : f32
    %305 = vector.broadcast %cst_142 : f32 to vector<8x1xf32>
    %306 = vector.broadcast %cst_143 : f32 to vector<8x1xf32>
    %307 = arith.select %304, %305, %306 : vector<8x1xi1>, vector<8x1xf32>
    %308 = arith.addf %297, %307 : vector<8x1xf32>
    %309 = tpu.reciprocal %308 : vector<8x1xf32> -> vector<8x1xf32>
    %310 = arith.mulf %302, %309 : vector<8x1xf32>
    %cst_144 = arith.constant 0.000000e+00 : f32
    %311 = vector.broadcast %cst_144 : f32 to vector<8x1xf32>
    %312 = arith.subf %311, %310 : vector<8x1xf32>
    %cst_145 = arith.constant 1.000000e+00 : f32
    %313 = vector.broadcast %cst_145 : f32 to vector<8x1xf32>
    %314 = arith.subf %313, %307 : vector<8x1xf32>
    %315 = arith.mulf %312, %314 : vector<8x1xf32>
    %316 = vector.shape_cast %315 : vector<8x1xf32> to vector<1x8x1xf32>
    %cst_146 = arith.constant dense<0.000000e+00> : vector<1xf32>
    %317 = vector.multi_reduction <add>, %316, %cst_146 [1, 2] : vector<1x8x1xf32> to vector<1xf32>
    %318 = vector.shape_cast %317 : vector<1xf32> to vector<1x1x1xf32>
    %319 = vector.extract %318[0, 0, 0] : f32 from vector<1x1x1xf32>
    %320 = vector.broadcast %319 : f32 to vector<1x128xf32>
    %c0_147 = arith.constant 0 : index
    %c0_148 = arith.constant 0 : index
    %321 = arith.index_cast %c5_i32 : i32 to index
    %c0_149 = arith.constant 0 : index
    %322 = vector.load %arg5[%c0_147, %c0_148, %321, %c0_149] : memref<1x2x8x128xf32, #tpu.memory_space<vmem>>, vector<1x1x1x128xf32>
    %323 = vector.shape_cast %322 : vector<1x1x1x128xf32> to vector<1x128xf32>
    %324 = vector.shape_cast %320 : vector<1x128xf32> to vector<1x1x1x128xf32>
    tpu.vector_store %arg5[%c0_147, %c0_148, %321, %c0_149], %324 {strides = array<i32>} : memref<1x2x8x128xf32, #tpu.memory_space<vmem>>, vector<1x1x1x128xf32>,
    %325 = vector.shape_cast %307 : vector<8x1xf32> to vector<1x8x1xf32>
    %cst_150 = arith.constant dense<0.000000e+00> : vector<1xf32>
    %326 = vector.multi_reduction <add>, %325, %cst_150 [1, 2] : vector<1x8x1xf32> to vector<1xf32>
    %327 = vector.shape_cast %326 : vector<1xf32> to vector<1x1x1xf32>
    %328 = vector.extract %327[0, 0, 0] : f32 from vector<1x1x1xf32>
    %329 = vector.broadcast %328 : f32 to vector<1x128xf32>
    %c0_151 = arith.constant 0 : index
    %c1_152 = arith.constant 1 : index
    %330 = arith.index_cast %c5_i32 : i32 to index
    %c0_153 = arith.constant 0 : index
    %331 = vector.load %arg5[%c0_151, %c1_152, %330, %c0_153] : memref<1x2x8x128xf32, #tpu.memory_space<vmem>>, vector<1x1x1x128xf32>
    %332 = vector.shape_cast %331 : vector<1x1x1x128xf32> to vector<1x128xf32>
    %333 = vector.shape_cast %329 : vector<1x128xf32> to vector<1x1x1x128xf32>
    tpu.vector_store %arg5[%c0_151, %c1_152, %330, %c0_153], %333 {strides = array<i32>} : memref<1x2x8x128xf32, #tpu.memory_space<vmem>>, vector<1x1x1x128xf32>,
    %c6_i32 = arith.constant 6 : i32
    %334 = arith.index_cast %c6_i32 : i32 to index
    %c0_154 = arith.constant 0 : index
    %c0_155 = arith.constant 0 : index
    %335 = vector.load %arg3[%334, %c0_154, %c0_155] : memref<8x8x1xi32, #tpu.memory_space<vmem>>, vector<1x8x1xi32>
    %336 = vector.shape_cast %335 : vector<1x8x1xi32> to vector<8x1xi32>
    %337 = arith.index_cast %c6_i32 : i32 to index
    %c0_156 = arith.constant 0 : index
    %338 = vector.load %arg4[%337, %c0_156] : memref<8x8xi32, #tpu.memory_space<vmem>>, vector<1x8xi32>
    %339 = vector.broadcast %336 : vector<8x1xi32> to vector<8x8xi32>
    %340 = vector.broadcast %338 : vector<1x8xi32> to vector<8x8xi32>
    %341 = arith.cmpi eq, %339, %340 : vector<8x8xi32>
    %cst_157 = arith.constant 1.000000e+00 : f32
    %cst_158 = arith.constant 0.000000e+00 : f32
    %342 = vector.broadcast %cst_157 : f32 to vector<8x8xf32>
    %343 = vector.broadcast %cst_158 : f32 to vector<8x8xf32>
    %344 = arith.select %341, %342, %343 : vector<8x8xi1>, vector<8x8xf32>
    %cst_159 = arith.constant dense<0.000000e+00> : vector<8xf32>
    %345 = vector.multi_reduction <add>, %344, %cst_159 [1] : vector<8x8xf32> to vector<8xf32>
    %346 = vector.shape_cast %345 : vector<8xf32> to vector<8x1xf32>
    %cst_160 = arith.constant 1.000000e+00 : f32
    %347 = vector.broadcast %cst_160 : f32 to vector<8x1xf32>
    %348 = arith.subf %346, %347 : vector<8x1xf32>
    %c0_161 = arith.constant 0 : index
    %c0_162 = arith.constant 0 : index
    %349 = vector.load %arg6[%c0_161, %c0_162] : memref<8x8xf32, #tpu.memory_space<vmem>>, vector<8x8xf32>
    %cst_163 = arith.constant 0.000000e+00 : f32
    %350 = vector.broadcast %cst_163 : f32 to vector<8x8xf32>
    %351 = arith.select %341, %349, %350 : vector<8x8xi1>, vector<8x8xf32>
    %cst_164 = arith.constant dense<0.000000e+00> : vector<8xf32>
    %352 = vector.multi_reduction <add>, %351, %cst_164 [1] : vector<8x8xf32> to vector<8xf32>
    %353 = vector.shape_cast %352 : vector<8xf32> to vector<8x1xf32>
    %cst_165 = arith.constant 0.000000e+00 : f32
    %354 = vector.broadcast %cst_165 : f32 to vector<8x1xf32>
    %355 = arith.cmpf oeq, %348, %354 : vector<8x1xf32>
    %cst_166 = arith.constant 1.000000e+00 : f32
    %cst_167 = arith.constant 0.000000e+00 : f32
    %356 = vector.broadcast %cst_166 : f32 to vector<8x1xf32>
    %357 = vector.broadcast %cst_167 : f32 to vector<8x1xf32>
    %358 = arith.select %355, %356, %357 : vector<8x1xi1>, vector<8x1xf32>
    %359 = arith.addf %348, %358 : vector<8x1xf32>
    %360 = tpu.reciprocal %359 : vector<8x1xf32> -> vector<8x1xf32>
    %361 = arith.mulf %353, %360 : vector<8x1xf32>
    %cst_168 = arith.constant 0.000000e+00 : f32
    %362 = vector.broadcast %cst_168 : f32 to vector<8x1xf32>
    %363 = arith.subf %362, %361 : vector<8x1xf32>
    %cst_169 = arith.constant 1.000000e+00 : f32
    %364 = vector.broadcast %cst_169 : f32 to vector<8x1xf32>
    %365 = arith.subf %364, %358 : vector<8x1xf32>
    %366 = arith.mulf %363, %365 : vector<8x1xf32>
    %367 = vector.shape_cast %366 : vector<8x1xf32> to vector<1x8x1xf32>
    %cst_170 = arith.constant dense<0.000000e+00> : vector<1xf32>
    %368 = vector.multi_reduction <add>, %367, %cst_170 [1, 2] : vector<1x8x1xf32> to vector<1xf32>
    %369 = vector.shape_cast %368 : vector<1xf32> to vector<1x1x1xf32>
    %370 = vector.extract %369[0, 0, 0] : f32 from vector<1x1x1xf32>
    %371 = vector.broadcast %370 : f32 to vector<1x128xf32>
    %c0_171 = arith.constant 0 : index
    %c0_172 = arith.constant 0 : index
    %372 = arith.index_cast %c6_i32 : i32 to index
    %c0_173 = arith.constant 0 : index
    %373 = vector.load %arg5[%c0_171, %c0_172, %372, %c0_173] : memref<1x2x8x128xf32, #tpu.memory_space<vmem>>, vector<1x1x1x128xf32>
    %374 = vector.shape_cast %373 : vector<1x1x1x128xf32> to vector<1x128xf32>
    %375 = vector.shape_cast %371 : vector<1x128xf32> to vector<1x1x1x128xf32>
    tpu.vector_store %arg5[%c0_171, %c0_172, %372, %c0_173], %375 {strides = array<i32>} : memref<1x2x8x128xf32, #tpu.memory_space<vmem>>, vector<1x1x1x128xf32>,
    %376 = vector.shape_cast %358 : vector<8x1xf32> to vector<1x8x1xf32>
    %cst_174 = arith.constant dense<0.000000e+00> : vector<1xf32>
    %377 = vector.multi_reduction <add>, %376, %cst_174 [1, 2] : vector<1x8x1xf32> to vector<1xf32>
    %378 = vector.shape_cast %377 : vector<1xf32> to vector<1x1x1xf32>
    %379 = vector.extract %378[0, 0, 0] : f32 from vector<1x1x1xf32>
    %380 = vector.broadcast %379 : f32 to vector<1x128xf32>
    %c0_175 = arith.constant 0 : index
    %c1_176 = arith.constant 1 : index
    %381 = arith.index_cast %c6_i32 : i32 to index
    %c0_177 = arith.constant 0 : index
    %382 = vector.load %arg5[%c0_175, %c1_176, %381, %c0_177] : memref<1x2x8x128xf32, #tpu.memory_space<vmem>>, vector<1x1x1x128xf32>
    %383 = vector.shape_cast %382 : vector<1x1x1x128xf32> to vector<1x128xf32>
    %384 = vector.shape_cast %380 : vector<1x128xf32> to vector<1x1x1x128xf32>
    tpu.vector_store %arg5[%c0_175, %c1_176, %381, %c0_177], %384 {strides = array<i32>} : memref<1x2x8x128xf32, #tpu.memory_space<vmem>>, vector<1x1x1x128xf32>,
    %c7_i32 = arith.constant 7 : i32
    %385 = arith.index_cast %c7_i32 : i32 to index
    %c0_178 = arith.constant 0 : index
    %c0_179 = arith.constant 0 : index
    %386 = vector.load %arg3[%385, %c0_178, %c0_179] : memref<8x8x1xi32, #tpu.memory_space<vmem>>, vector<1x8x1xi32>
    %387 = vector.shape_cast %386 : vector<1x8x1xi32> to vector<8x1xi32>
    %388 = arith.index_cast %c7_i32 : i32 to index
    %c0_180 = arith.constant 0 : index
    %389 = vector.load %arg4[%388, %c0_180] : memref<8x8xi32, #tpu.memory_space<vmem>>, vector<1x8xi32>
    %390 = vector.broadcast %387 : vector<8x1xi32> to vector<8x8xi32>
    %391 = vector.broadcast %389 : vector<1x8xi32> to vector<8x8xi32>
    %392 = arith.cmpi eq, %390, %391 : vector<8x8xi32>
    %cst_181 = arith.constant 1.000000e+00 : f32
    %cst_182 = arith.constant 0.000000e+00 : f32
    %393 = vector.broadcast %cst_181 : f32 to vector<8x8xf32>
    %394 = vector.broadcast %cst_182 : f32 to vector<8x8xf32>
    %395 = arith.select %392, %393, %394 : vector<8x8xi1>, vector<8x8xf32>
    %cst_183 = arith.constant dense<0.000000e+00> : vector<8xf32>
    %396 = vector.multi_reduction <add>, %395, %cst_183 [1] : vector<8x8xf32> to vector<8xf32>
    %397 = vector.shape_cast %396 : vector<8xf32> to vector<8x1xf32>
    %cst_184 = arith.constant 1.000000e+00 : f32
    %398 = vector.broadcast %cst_184 : f32 to vector<8x1xf32>
    %399 = arith.subf %397, %398 : vector<8x1xf32>
    %c0_185 = arith.constant 0 : index
    %c0_186 = arith.constant 0 : index
    %400 = vector.load %arg6[%c0_185, %c0_186] : memref<8x8xf32, #tpu.memory_space<vmem>>, vector<8x8xf32>
    %cst_187 = arith.constant 0.000000e+00 : f32
    %401 = vector.broadcast %cst_187 : f32 to vector<8x8xf32>
    %402 = arith.select %392, %400, %401 : vector<8x8xi1>, vector<8x8xf32>
    %cst_188 = arith.constant dense<0.000000e+00> : vector<8xf32>
    %403 = vector.multi_reduction <add>, %402, %cst_188 [1] : vector<8x8xf32> to vector<8xf32>
    %404 = vector.shape_cast %403 : vector<8xf32> to vector<8x1xf32>
    %cst_189 = arith.constant 0.000000e+00 : f32
    %405 = vector.broadcast %cst_189 : f32 to vector<8x1xf32>
    %406 = arith.cmpf oeq, %399, %405 : vector<8x1xf32>
    %cst_190 = arith.constant 1.000000e+00 : f32
    %cst_191 = arith.constant 0.000000e+00 : f32
    %407 = vector.broadcast %cst_190 : f32 to vector<8x1xf32>
    %408 = vector.broadcast %cst_191 : f32 to vector<8x1xf32>
    %409 = arith.select %406, %407, %408 : vector<8x1xi1>, vector<8x1xf32>
    %410 = arith.addf %399, %409 : vector<8x1xf32>
    %411 = tpu.reciprocal %410 : vector<8x1xf32> -> vector<8x1xf32>
    %412 = arith.mulf %404, %411 : vector<8x1xf32>
    %cst_192 = arith.constant 0.000000e+00 : f32
    %413 = vector.broadcast %cst_192 : f32 to vector<8x1xf32>
    %414 = arith.subf %413, %412 : vector<8x1xf32>
    %cst_193 = arith.constant 1.000000e+00 : f32
    %415 = vector.broadcast %cst_193 : f32 to vector<8x1xf32>
    %416 = arith.subf %415, %409 : vector<8x1xf32>
    %417 = arith.mulf %414, %416 : vector<8x1xf32>
    %418 = vector.shape_cast %417 : vector<8x1xf32> to vector<1x8x1xf32>
    %cst_194 = arith.constant dense<0.000000e+00> : vector<1xf32>
    %419 = vector.multi_reduction <add>, %418, %cst_194 [1, 2] : vector<1x8x1xf32> to vector<1xf32>
    %420 = vector.shape_cast %419 : vector<1xf32> to vector<1x1x1xf32>
    %421 = vector.extract %420[0, 0, 0] : f32 from vector<1x1x1xf32>
    %422 = vector.broadcast %421 : f32 to vector<1x128xf32>
    %c0_195 = arith.constant 0 : index
    %c0_196 = arith.constant 0 : index
    %423 = arith.index_cast %c7_i32 : i32 to index
    %c0_197 = arith.constant 0 : index
    %424 = vector.load %arg5[%c0_195, %c0_196, %423, %c0_197] : memref<1x2x8x128xf32, #tpu.memory_space<vmem>>, vector<1x1x1x128xf32>
    %425 = vector.shape_cast %424 : vector<1x1x1x128xf32> to vector<1x128xf32>
    %426 = vector.shape_cast %422 : vector<1x128xf32> to vector<1x1x1x128xf32>
    tpu.vector_store %arg5[%c0_195, %c0_196, %423, %c0_197], %426 {strides = array<i32>} : memref<1x2x8x128xf32, #tpu.memory_space<vmem>>, vector<1x1x1x128xf32>,
    %427 = vector.shape_cast %409 : vector<8x1xf32> to vector<1x8x1xf32>
    %cst_198 = arith.constant dense<0.000000e+00> : vector<1xf32>
    %428 = vector.multi_reduction <add>, %427, %cst_198 [1, 2] : vector<1x8x1xf32> to vector<1xf32>
    %429 = vector.shape_cast %428 : vector<1xf32> to vector<1x1x1xf32>
    %430 = vector.extract %429[0, 0, 0] : f32 from vector<1x1x1xf32>
    %431 = vector.broadcast %430 : f32 to vector<1x128xf32>
    %c0_199 = arith.constant 0 : index
    %c1_200 = arith.constant 1 : index
    %432 = arith.index_cast %c7_i32 : i32 to index
    %c0_201 = arith.constant 0 : index
    %433 = vector.load %arg5[%c0_199, %c1_200, %432, %c0_201] : memref<1x2x8x128xf32, #tpu.memory_space<vmem>>, vector<1x1x1x128xf32>
    %434 = vector.shape_cast %433 : vector<1x1x1x128xf32> to vector<1x128xf32>
    %435 = vector.shape_cast %431 : vector<1x128xf32> to vector<1x1x1x128xf32>
    tpu.vector_store %arg5[%c0_199, %c1_200, %432, %c0_201], %435 {strides = array<i32>} : memref<1x2x8x128xf32, #tpu.memory_space<vmem>>, vector<1x1x1x128xf32>,
    %c8_i32_202 = arith.constant 8 : i32
    return
  }
  func.func @transform_0(%arg0: i32) -> (i32, i32) {
    %c0_i32 = arith.constant 0 : i32
    %c0_i32_0 = arith.constant 0 : i32
    return %arg0, %c0_i32 : i32, i32
  }
  func.func @transform_1(%arg0: i32) -> (i32, i32) {
    %c0_i32 = arith.constant 0 : i32
    %c0_i32_0 = arith.constant 0 : i32
    %c0_i32_1 = arith.constant 0 : i32
    return %c0_i32, %c0_i32_0 : i32, i32
  }
  func.func @transform_2(%arg0: i32) -> (i32, i32, i32) {
    %c0_i32 = arith.constant 0 : i32
    %c0_i32_0 = arith.constant 0 : i32
    %c0_i32_1 = arith.constant 0 : i32
    return %c0_i32, %arg0, %c0_i32_0 : i32, i32, i32
  }
  func.func @transform_3(%arg0: i32) -> (i32, i32) {
    %c0_i32 = arith.constant 0 : i32
    %c0_i32_0 = arith.constant 0 : i32
    %c0_i32_1 = arith.constant 0 : i32
    return %c0_i32, %c0_i32_0 : i32, i32
  }
  func.func @transform_4(%arg0: i32) -> (i32, i32, i32, i32) {
    %c0_i32 = arith.constant 0 : i32
    %c0_i32_0 = arith.constant 0 : i32
    %c0_i32_1 = arith.constant 0 : i32
    %c0_i32_2 = arith.constant 0 : i32
    return %arg0, %c0_i32, %c0_i32_0, %c0_i32_1 : i32, i32, i32, i32
  }
}

module attributes {stable_mosaic.version = 11 : i64} {
  func.func @_supcon_seq_kernel(%arg0: i32, %arg1: memref<8x32xbf16, #tpu.memory_space<vmem>>, %arg2: memref<8x32xbf16, #tpu.memory_space<vmem>>, %arg3: memref<8x8x1xi32, #tpu.memory_space<vmem>>, %arg4: memref<8x8xi32, #tpu.memory_space<vmem>>, %arg5: memref<1x2x8x128xf32, #tpu.memory_space<vmem>>, %arg6: memref<8x8xf32, #tpu.memory_space<vmem>>) attributes {dimension_semantics = [#tpu.dimension_semantics<parallel>], iteration_bounds = array<i64: 1>, scalar_prefetch = 0 : i64, scratch_operands = 1 : i64, tpu.core_type = #tpu.core_type<tc>, window_params = [{transform_indices = @transform_0, window_bounds = array<i64: 8, 32>}, {pipeline_mode = #tpu.pipeline_mode<synchronous>, transform_indices = @transform_1, window_bounds = array<i64: 8, 32>}, {transform_indices = @transform_2, window_bounds = array<i64: 8, 8, 1>}, {pipeline_mode = #tpu.pipeline_mode<synchronous>, transform_indices = @transform_3, window_bounds = array<i64: 8, 8>}, {transform_indices = @transform_4, window_bounds = array<i64: 1, 2, 8, 128>}]} {
    %c0 = arith.constant 0 : index
    %c0_0 = arith.constant 0 : index
    %0 = vector.load %arg1[%c0, %c0_0] : memref<8x32xbf16, #tpu.memory_space<vmem>>, vector<8x32xbf16>
    %c0_1 = arith.constant 0 : index
    %c0_2 = arith.constant 0 : index
    %1 = vector.load %arg2[%c0_1, %c0_2] : memref<8x32xbf16, #tpu.memory_space<vmem>>, vector<8x32xbf16>
    %cst = arith.constant dense<0.000000e+00> : vector<8x8xf32>
    %2 = tpu.matmul %0, %1, %cst {dimension_numbers = #tpu.dot_dimension_numbers<[1], [1], [0], [0], [0, 0, 1, 0], [], []>} : vector<8x32xbf16>, vector<8x32xbf16>, vector<8x8xf32> -> vector<8x8xf32>
    %cst_3 = arith.constant 14.2857141 : f32
    %3 = vector.broadcast %cst_3 : f32 to vector<8x8xf32>
    %4 = arith.mulf %2, %3 : vector<8x8xf32>
    %cst_4 = arith.constant dense<0xFF800000> : vector<8xf32>
    %5 = vector.multi_reduction <maximumf>, %4, %cst_4 [1] : vector<8x8xf32> to vector<8xf32>
    %6 = vector.shape_cast %5 : vector<8xf32> to vector<8x1xf32>
    %7 = vector.broadcast %6 : vector<8x1xf32> to vector<8x8xf32>
    %8 = arith.subf %4, %7 : vector<8x8xf32>
    %9 = tpu.iota {dimensions = array<i32: 0>} : vector<8x8xi32>
    %10 = tpu.iota {dimensions = array<i32: 1>} : vector<8x8xi32>
    %c8_i32 = arith.constant 8 : i32
    %11 = arith.muli %arg0, %c8_i32 : i32
    %12 = vector.broadcast %11 : i32 to vector<8x8xi32>
    %13 = arith.addi %9, %12 : vector<8x8xi32>
    %14 = arith.cmpi eq, %10, %13 : vector<8x8xi32>
    %15 = math.exp %8 : vector<8x8xf32>
    %cst_5 = arith.constant 0.000000e+00 : f32
    %16 = vector.broadcast %cst_5 : f32 to vector<8x8xf32>
    %17 = arith.select %14, %16, %15 : vector<8x8xi1>, vector<8x8xf32>
    %cst_6 = arith.constant dense<0.000000e+00> : vector<8xf32>
    %18 = vector.multi_reduction <add>, %17, %cst_6 [1] : vector<8x8xf32> to vector<8xf32>
    %19 = vector.shape_cast %18 : vector<8xf32> to vector<8x1xf32>
    %cst_7 = arith.constant 9.99999968E-21 : f32
    %20 = vector.broadcast %cst_7 : f32 to vector<8x1xf32>
    %21 = arith.addf %19, %20 : vector<8x1xf32>
    %22 = math.log %21 : vector<8x1xf32>
    %23 = vector.broadcast %22 : vector<8x1xf32> to vector<8x8xf32>
    %24 = arith.subf %8, %23 : vector<8x8xf32>
    %cst_8 = arith.constant 0.000000e+00 : f32
    %25 = vector.broadcast %cst_8 : f32 to vector<8x8xf32>
    %26 = arith.select %14, %25, %24 : vector<8x8xi1>, vector<8x8xf32>
    %c0_9 = arith.constant 0 : index
    %c0_10 = arith.constant 0 : index
    %27 = vector.load %arg6[%c0_9, %c0_10] : memref<8x8xf32, #tpu.memory_space<vmem>>, vector<8x8xf32>
    tpu.vector_store %arg6[%c0_9, %c0_10], %26 {strides = array<i32>} : memref<8x8xf32, #tpu.memory_space<vmem>>, vector<8x8xf32>,
    %c0_i32 = arith.constant 0 : i32
    %28 = arith.index_cast %c0_i32 : i32 to index
    %c0_11 = arith.constant 0 : index
    %c0_12 = arith.constant 0 : index
    %29 = vector.load %arg3[%28, %c0_11, %c0_12] : memref<8x8x1xi32, #tpu.memory_space<vmem>>, vector<1x8x1xi32>
    %30 = vector.shape_cast %29 : vector<1x8x1xi32> to vector<8x1xi32>
    %31 = arith.index_cast %c0_i32 : i32 to index
    %c0_13 = arith.constant 0 : index
    %32 = vector.load %arg4[%31, %c0_13] : memref<8x8xi32, #tpu.memory_space<vmem>>, vector<1x8xi32>
    %33 = vector.broadcast %30 : vector<8x1xi32> to vector<8x8xi32>
    %34 = vector.broadcast %32 : vector<1x8xi32> to vector<8x8xi32>
    %35 = arith.cmpi eq, %33, %34 : vector<8x8xi32>
    %cst_14 = arith.constant 1.000000e+00 : f32
    %cst_15 = arith.constant 0.000000e+00 : f32
    %36 = vector.broadcast %cst_14 : f32 to vector<8x8xf32>
    %37 = vector.broadcast %cst_15 : f32 to vector<8x8xf32>
    %38 = arith.select %35, %36, %37 : vector<8x8xi1>, vector<8x8xf32>
    %cst_16 = arith.constant dense<0.000000e+00> : vector<8xf32>
    %39 = vector.multi_reduction <add>, %38, %cst_16 [1] : vector<8x8xf32> to vector<8xf32>
    %40 = vector.shape_cast %39 : vector<8xf32> to vector<8x1xf32>
    %cst_17 = arith.constant 1.000000e+00 : f32
    %41 = vector.broadcast %cst_17 : f32 to vector<8x1xf32>
    %42 = arith.subf %40, %41 : vector<8x1xf32>
    %c0_18 = arith.constant 0 : index
    %c0_19 = arith.constant 0 : index
    %43 = vector.load %arg6[%c0_18, %c0_19] : memref<8x8xf32, #tpu.memory_space<vmem>>, vector<8x8xf32>
    %cst_20 = arith.constant 0.000000e+00 : f32
    %44 = vector.broadcast %cst_20 : f32 to vector<8x8xf32>
    %45 = arith.select %35, %43, %44 : vector<8x8xi1>, vector<8x8xf32>
    %cst_21 = arith.constant dense<0.000000e+00> : vector<8xf32>
    %46 = vector.multi_reduction <add>, %45, %cst_21 [1] : vector<8x8xf32> to vector<8xf32>
    %47 = vector.shape_cast %46 : vector<8xf32> to vector<8x1xf32>
    %cst_22 = arith.constant 0.000000e+00 : f32
    %48 = vector.broadcast %cst_22 : f32 to vector<8x1xf32>
    %49 = arith.cmpf oeq, %42, %48 : vector<8x1xf32>
    %cst_23 = arith.constant 1.000000e+00 : f32
    %cst_24 = arith.constant 0.000000e+00 : f32
    %50 = vector.broadcast %cst_23 : f32 to vector<8x1xf32>
    %51 = vector.broadcast %cst_24 : f32 to vector<8x1xf32>
    %52 = arith.select %49, %50, %51 : vector<8x1xi1>, vector<8x1xf32>
    %53 = arith.addf %42, %52 : vector<8x1xf32>
    %54 = tpu.reciprocal %53 : vector<8x1xf32> -> vector<8x1xf32>
    %55 = arith.mulf %47, %54 : vector<8x1xf32>
    %cst_25 = arith.constant 0.000000e+00 : f32
    %56 = vector.broadcast %cst_25 : f32 to vector<8x1xf32>
    %57 = arith.subf %56, %55 : vector<8x1xf32>
    %cst_26 = arith.constant 1.000000e+00 : f32
    %58 = vector.broadcast %cst_26 : f32 to vector<8x1xf32>
    %59 = arith.subf %58, %52 : vector<8x1xf32>
    %60 = arith.mulf %57, %59 : vector<8x1xf32>
    %61 = vector.shape_cast %60 : vector<8x1xf32> to vector<1x8x1xf32>
    %cst_27 = arith.constant dense<0.000000e+00> : vector<1xf32>
    %62 = vector.multi_reduction <add>, %61, %cst_27 [1, 2] : vector<1x8x1xf32> to vector<1xf32>
    %63 = vector.shape_cast %62 : vector<1xf32> to vector<1x1x1xf32>
    %64 = vector.extract %63[0, 0, 0] : f32 from vector<1x1x1xf32>
    %65 = vector.broadcast %64 : f32 to vector<1x128xf32>
    %c0_28 = arith.constant 0 : index
    %c0_29 = arith.constant 0 : index
    %66 = arith.index_cast %c0_i32 : i32 to index
    %c0_30 = arith.constant 0 : index
    %67 = vector.load %arg5[%c0_28, %c0_29, %66, %c0_30] : memref<1x2x8x128xf32, #tpu.memory_space<vmem>>, vector<1x1x1x128xf32>
    %68 = vector.shape_cast %67 : vector<1x1x1x128xf32> to vector<1x128xf32>
    %69 = vector.shape_cast %65 : vector<1x128xf32> to vector<1x1x1x128xf32>
    tpu.vector_store %arg5[%c0_28, %c0_29, %66, %c0_30], %69 {strides = array<i32>} : memref<1x2x8x128xf32, #tpu.memory_space<vmem>>, vector<1x1x1x128xf32>,
    %70 = vector.shape_cast %52 : vector<8x1xf32> to vector<1x8x1xf32>
    %cst_31 = arith.constant dense<0.000000e+00> : vector<1xf32>
    %71 = vector.multi_reduction <add>, %70, %cst_31 [1, 2] : vector<1x8x1xf32> to vector<1xf32>
    %72 = vector.shape_cast %71 : vector<1xf32> to vector<1x1x1xf32>
    %73 = vector.extract %72[0, 0, 0] : f32 from vector<1x1x1xf32>
    %74 = vector.broadcast %73 : f32 to vector<1x128xf32>
    %c0_32 = arith.constant 0 : index
    %c1 = arith.constant 1 : index
    %75 = arith.index_cast %c0_i32 : i32 to index
    %c0_33 = arith.constant 0 : index
    %76 = vector.load %arg5[%c0_32, %c1, %75, %c0_33] : memref<1x2x8x128xf32, #tpu.memory_space<vmem>>, vector<1x1x1x128xf32>
    %77 = vector.shape_cast %76 : vector<1x1x1x128xf32> to vector<1x128xf32>
    %78 = vector.shape_cast %74 : vector<1x128xf32> to vector<1x1x1x128xf32>
    tpu.vector_store %arg5[%c0_32, %c1, %75, %c0_33], %78 {strides = array<i32>} : memref<1x2x8x128xf32, #tpu.memory_space<vmem>>, vector<1x1x1x128xf32>,
    %c1_i32 = arith.constant 1 : i32
    %79 = arith.index_cast %c1_i32 : i32 to index
    %c0_34 = arith.constant 0 : index
    %c0_35 = arith.constant 0 : index
    %80 = vector.load %arg3[%79, %c0_34, %c0_35] : memref<8x8x1xi32, #tpu.memory_space<vmem>>, vector<1x8x1xi32>
    %81 = vector.shape_cast %80 : vector<1x8x1xi32> to vector<8x1xi32>
    %82 = arith.index_cast %c1_i32 : i32 to index
    %c0_36 = arith.constant 0 : index
    %83 = vector.load %arg4[%82, %c0_36] : memref<8x8xi32, #tpu.memory_space<vmem>>, vector<1x8xi32>
    %84 = vector.broadcast %81 : vector<8x1xi32> to vector<8x8xi32>
    %85 = vector.broadcast %83 : vector<1x8xi32> to vector<8x8xi32>
    %86 = arith.cmpi eq, %84, %85 : vector<8x8xi32>
    %cst_37 = arith.constant 1.000000e+00 : f32
    %cst_38 = arith.constant 0.000000e+00 : f32
    %87 = vector.broadcast %cst_37 : f32 to vector<8x8xf32>
    %88 = vector.broadcast %cst_38 : f32 to vector<8x8xf32>
    %89 = arith.select %86, %87, %88 : vector<8x8xi1>, vector<8x8xf32>
    %cst_39 = arith.constant dense<0.000000e+00> : vector<8xf32>
    %90 = vector.multi_reduction <add>, %89, %cst_39 [1] : vector<8x8xf32> to vector<8xf32>
    %91 = vector.shape_cast %90 : vector<8xf32> to vector<8x1xf32>
    %cst_40 = arith.constant 1.000000e+00 : f32
    %92 = vector.broadcast %cst_40 : f32 to vector<8x1xf32>
    %93 = arith.subf %91, %92 : vector<8x1xf32>
    %c0_41 = arith.constant 0 : index
    %c0_42 = arith.constant 0 : index
    %94 = vector.load %arg6[%c0_41, %c0_42] : memref<8x8xf32, #tpu.memory_space<vmem>>, vector<8x8xf32>
    %cst_43 = arith.constant 0.000000e+00 : f32
    %95 = vector.broadcast %cst_43 : f32 to vector<8x8xf32>
    %96 = arith.select %86, %94, %95 : vector<8x8xi1>, vector<8x8xf32>
    %cst_44 = arith.constant dense<0.000000e+00> : vector<8xf32>
    %97 = vector.multi_reduction <add>, %96, %cst_44 [1] : vector<8x8xf32> to vector<8xf32>
    %98 = vector.shape_cast %97 : vector<8xf32> to vector<8x1xf32>
    %cst_45 = arith.constant 0.000000e+00 : f32
    %99 = vector.broadcast %cst_45 : f32 to vector<8x1xf32>
    %100 = arith.cmpf oeq, %93, %99 : vector<8x1xf32>
    %cst_46 = arith.constant 1.000000e+00 : f32
    %cst_47 = arith.constant 0.000000e+00 : f32
    %101 = vector.broadcast %cst_46 : f32 to vector<8x1xf32>
    %102 = vector.broadcast %cst_47 : f32 to vector<8x1xf32>
    %103 = arith.select %100, %101, %102 : vector<8x1xi1>, vector<8x1xf32>
    %104 = arith.addf %93, %103 : vector<8x1xf32>
    %105 = tpu.reciprocal %104 : vector<8x1xf32> -> vector<8x1xf32>
    %106 = arith.mulf %98, %105 : vector<8x1xf32>
    %cst_48 = arith.constant 0.000000e+00 : f32
    %107 = vector.broadcast %cst_48 : f32 to vector<8x1xf32>
    %108 = arith.subf %107, %106 : vector<8x1xf32>
    %cst_49 = arith.constant 1.000000e+00 : f32
    %109 = vector.broadcast %cst_49 : f32 to vector<8x1xf32>
    %110 = arith.subf %109, %103 : vector<8x1xf32>
    %111 = arith.mulf %108, %110 : vector<8x1xf32>
    %112 = vector.shape_cast %111 : vector<8x1xf32> to vector<1x8x1xf32>
    %cst_50 = arith.constant dense<0.000000e+00> : vector<1xf32>
    %113 = vector.multi_reduction <add>, %112, %cst_50 [1, 2] : vector<1x8x1xf32> to vector<1xf32>
    %114 = vector.shape_cast %113 : vector<1xf32> to vector<1x1x1xf32>
    %115 = vector.extract %114[0, 0, 0] : f32 from vector<1x1x1xf32>
    %116 = vector.broadcast %115 : f32 to vector<1x128xf32>
    %c0_51 = arith.constant 0 : index
    %c0_52 = arith.constant 0 : index
    %117 = arith.index_cast %c1_i32 : i32 to index
    %c0_53 = arith.constant 0 : index
    %118 = vector.load %arg5[%c0_51, %c0_52, %117, %c0_53] : memref<1x2x8x128xf32, #tpu.memory_space<vmem>>, vector<1x1x1x128xf32>
    %119 = vector.shape_cast %118 : vector<1x1x1x128xf32> to vector<1x128xf32>
    %120 = vector.shape_cast %116 : vector<1x128xf32> to vector<1x1x1x128xf32>
    tpu.vector_store %arg5[%c0_51, %c0_52, %117, %c0_53], %120 {strides = array<i32>} : memref<1x2x8x128xf32, #tpu.memory_space<vmem>>, vector<1x1x1x128xf32>,
    %121 = vector.shape_cast %103 : vector<8x1xf32> to vector<1x8x1xf32>
    %cst_54 = arith.constant dense<0.000000e+00> : vector<1xf32>
    %122 = vector.multi_reduction <add>, %121, %cst_54 [1, 2] : vector<1x8x1xf32> to vector<1xf32>
    %123 = vector.shape_cast %122 : vector<1xf32> to vector<1x1x1xf32>
    %124 = vector.extract %123[0, 0, 0] : f32 from vector<1x1x1xf32>
    %125 = vector.broadcast %124 : f32 to vector<1x128xf32>
    %c0_55 = arith.constant 0 : index
    %c1_56 = arith.constant 1 : index
    %126 = arith.index_cast %c1_i32 : i32 to index
    %c0_57 = arith.constant 0 : index
    %127 = vector.load %arg5[%c0_55, %c1_56, %126, %c0_57] : memref<1x2x8x128xf32, #tpu.memory_space<vmem>>, vector<1x1x1x128xf32>
    %128 = vector.shape_cast %127 : vector<1x1x1x128xf32> to vector<1x128xf32>
    %129 = vector.shape_cast %125 : vector<1x128xf32> to vector<1x1x1x128xf32>
    tpu.vector_store %arg5[%c0_55, %c1_56, %126, %c0_57], %129 {strides = array<i32>} : memref<1x2x8x128xf32, #tpu.memory_space<vmem>>, vector<1x1x1x128xf32>,
    %c2_i32 = arith.constant 2 : i32
    %130 = arith.index_cast %c2_i32 : i32 to index
    %c0_58 = arith.constant 0 : index
    %c0_59 = arith.constant 0 : index
    %131 = vector.load %arg3[%130, %c0_58, %c0_59] : memref<8x8x1xi32, #tpu.memory_space<vmem>>, vector<1x8x1xi32>
    %132 = vector.shape_cast %131 : vector<1x8x1xi32> to vector<8x1xi32>
    %133 = arith.index_cast %c2_i32 : i32 to index
    %c0_60 = arith.constant 0 : index
    %134 = vector.load %arg4[%133, %c0_60] : memref<8x8xi32, #tpu.memory_space<vmem>>, vector<1x8xi32>
    %135 = vector.broadcast %132 : vector<8x1xi32> to vector<8x8xi32>
    %136 = vector.broadcast %134 : vector<1x8xi32> to vector<8x8xi32>
    %137 = arith.cmpi eq, %135, %136 : vector<8x8xi32>
    %cst_61 = arith.constant 1.000000e+00 : f32
    %cst_62 = arith.constant 0.000000e+00 : f32
    %138 = vector.broadcast %cst_61 : f32 to vector<8x8xf32>
    %139 = vector.broadcast %cst_62 : f32 to vector<8x8xf32>
    %140 = arith.select %137, %138, %139 : vector<8x8xi1>, vector<8x8xf32>
    %cst_63 = arith.constant dense<0.000000e+00> : vector<8xf32>
    %141 = vector.multi_reduction <add>, %140, %cst_63 [1] : vector<8x8xf32> to vector<8xf32>
    %142 = vector.shape_cast %141 : vector<8xf32> to vector<8x1xf32>
    %cst_64 = arith.constant 1.000000e+00 : f32
    %143 = vector.broadcast %cst_64 : f32 to vector<8x1xf32>
    %144 = arith.subf %142, %143 : vector<8x1xf32>
    %c0_65 = arith.constant 0 : index
    %c0_66 = arith.constant 0 : index
    %145 = vector.load %arg6[%c0_65, %c0_66] : memref<8x8xf32, #tpu.memory_space<vmem>>, vector<8x8xf32>
    %cst_67 = arith.constant 0.000000e+00 : f32
    %146 = vector.broadcast %cst_67 : f32 to vector<8x8xf32>
    %147 = arith.select %137, %145, %146 : vector<8x8xi1>, vector<8x8xf32>
    %cst_68 = arith.constant dense<0.000000e+00> : vector<8xf32>
    %148 = vector.multi_reduction <add>, %147, %cst_68 [1] : vector<8x8xf32> to vector<8xf32>
    %149 = vector.shape_cast %148 : vector<8xf32> to vector<8x1xf32>
    %cst_69 = arith.constant 0.000000e+00 : f32
    %150 = vector.broadcast %cst_69 : f32 to vector<8x1xf32>
    %151 = arith.cmpf oeq, %144, %150 : vector<8x1xf32>
    %cst_70 = arith.constant 1.000000e+00 : f32
    %cst_71 = arith.constant 0.000000e+00 : f32
    %152 = vector.broadcast %cst_70 : f32 to vector<8x1xf32>
    %153 = vector.broadcast %cst_71 : f32 to vector<8x1xf32>
    %154 = arith.select %151, %152, %153 : vector<8x1xi1>, vector<8x1xf32>
    %155 = arith.addf %144, %154 : vector<8x1xf32>
    %156 = tpu.reciprocal %155 : vector<8x1xf32> -> vector<8x1xf32>
    %157 = arith.mulf %149, %156 : vector<8x1xf32>
    %cst_72 = arith.constant 0.000000e+00 : f32
    %158 = vector.broadcast %cst_72 : f32 to vector<8x1xf32>
    %159 = arith.subf %158, %157 : vector<8x1xf32>
    %cst_73 = arith.constant 1.000000e+00 : f32
    %160 = vector.broadcast %cst_73 : f32 to vector<8x1xf32>
    %161 = arith.subf %160, %154 : vector<8x1xf32>
    %162 = arith.mulf %159, %161 : vector<8x1xf32>
    %163 = vector.shape_cast %162 : vector<8x1xf32> to vector<1x8x1xf32>
    %cst_74 = arith.constant dense<0.000000e+00> : vector<1xf32>
    %164 = vector.multi_reduction <add>, %163, %cst_74 [1, 2] : vector<1x8x1xf32> to vector<1xf32>
    %165 = vector.shape_cast %164 : vector<1xf32> to vector<1x1x1xf32>
    %166 = vector.extract %165[0, 0, 0] : f32 from vector<1x1x1xf32>
    %167 = vector.broadcast %166 : f32 to vector<1x128xf32>
    %c0_75 = arith.constant 0 : index
    %c0_76 = arith.constant 0 : index
    %168 = arith.index_cast %c2_i32 : i32 to index
    %c0_77 = arith.constant 0 : index
    %169 = vector.load %arg5[%c0_75, %c0_76, %168, %c0_77] : memref<1x2x8x128xf32, #tpu.memory_space<vmem>>, vector<1x1x1x128xf32>
    %170 = vector.shape_cast %169 : vector<1x1x1x128xf32> to vector<1x128xf32>
    %171 = vector.shape_cast %167 : vector<1x128xf32> to vector<1x1x1x128xf32>
    tpu.vector_store %arg5[%c0_75, %c0_76, %168, %c0_77], %171 {strides = array<i32>} : memref<1x2x8x128xf32, #tpu.memory_space<vmem>>, vector<1x1x1x128xf32>,
    %172 = vector.shape_cast %154 : vector<8x1xf32> to vector<1x8x1xf32>
    %cst_78 = arith.constant dense<0.000000e+00> : vector<1xf32>
    %173 = vector.multi_reduction <add>, %172, %cst_78 [1, 2] : vector<1x8x1xf32> to vector<1xf32>
    %174 = vector.shape_cast %173 : vector<1xf32> to vector<1x1x1xf32>
    %175 = vector.extract %174[0, 0, 0] : f32 from vector<1x1x1xf32>
    %176 = vector.broadcast %175 : f32 to vector<1x128xf32>
    %c0_79 = arith.constant 0 : index
    %c1_80 = arith.constant 1 : index
    %177 = arith.index_cast %c2_i32 : i32 to index
    %c0_81 = arith.constant 0 : index
    %178 = vector.load %arg5[%c0_79, %c1_80, %177, %c0_81] : memref<1x2x8x128xf32, #tpu.memory_space<vmem>>, vector<1x1x1x128xf32>
    %179 = vector.shape_cast %178 : vector<1x1x1x128xf32> to vector<1x128xf32>
    %180 = vector.shape_cast %176 : vector<1x128xf32> to vector<1x1x1x128xf32>
    tpu.vector_store %arg5[%c0_79, %c1_80, %177, %c0_81], %180 {strides = array<i32>} : memref<1x2x8x128xf32, #tpu.memory_space<vmem>>, vector<1x1x1x128xf32>,
    %c3_i32 = arith.constant 3 : i32
    %181 = arith.index_cast %c3_i32 : i32 to index
    %c0_82 = arith.constant 0 : index
    %c0_83 = arith.constant 0 : index
    %182 = vector.load %arg3[%181, %c0_82, %c0_83] : memref<8x8x1xi32, #tpu.memory_space<vmem>>, vector<1x8x1xi32>
    %183 = vector.shape_cast %182 : vector<1x8x1xi32> to vector<8x1xi32>
    %184 = arith.index_cast %c3_i32 : i32 to index
    %c0_84 = arith.constant 0 : index
    %185 = vector.load %arg4[%184, %c0_84] : memref<8x8xi32, #tpu.memory_space<vmem>>, vector<1x8xi32>
    %186 = vector.broadcast %183 : vector<8x1xi32> to vector<8x8xi32>
    %187 = vector.broadcast %185 : vector<1x8xi32> to vector<8x8xi32>
    %188 = arith.cmpi eq, %186, %187 : vector<8x8xi32>
    %cst_85 = arith.constant 1.000000e+00 : f32
    %cst_86 = arith.constant 0.000000e+00 : f32
    %189 = vector.broadcast %cst_85 : f32 to vector<8x8xf32>
    %190 = vector.broadcast %cst_86 : f32 to vector<8x8xf32>
    %191 = arith.select %188, %189, %190 : vector<8x8xi1>, vector<8x8xf32>
    %cst_87 = arith.constant dense<0.000000e+00> : vector<8xf32>
    %192 = vector.multi_reduction <add>, %191, %cst_87 [1] : vector<8x8xf32> to vector<8xf32>
    %193 = vector.shape_cast %192 : vector<8xf32> to vector<8x1xf32>
    %cst_88 = arith.constant 1.000000e+00 : f32
    %194 = vector.broadcast %cst_88 : f32 to vector<8x1xf32>
    %195 = arith.subf %193, %194 : vector<8x1xf32>
    %c0_89 = arith.constant 0 : index
    %c0_90 = arith.constant 0 : index
    %196 = vector.load %arg6[%c0_89, %c0_90] : memref<8x8xf32, #tpu.memory_space<vmem>>, vector<8x8xf32>
    %cst_91 = arith.constant 0.000000e+00 : f32
    %197 = vector.broadcast %cst_91 : f32 to vector<8x8xf32>
    %198 = arith.select %188, %196, %197 : vector<8x8xi1>, vector<8x8xf32>
    %cst_92 = arith.constant dense<0.000000e+00> : vector<8xf32>
    %199 = vector.multi_reduction <add>, %198, %cst_92 [1] : vector<8x8xf32> to vector<8xf32>
    %200 = vector.shape_cast %199 : vector<8xf32> to vector<8x1xf32>
    %cst_93 = arith.constant 0.000000e+00 : f32
    %201 = vector.broadcast %cst_93 : f32 to vector<8x1xf32>
    %202 = arith.cmpf oeq, %195, %201 : vector<8x1xf32>
    %cst_94 = arith.constant 1.000000e+00 : f32
    %cst_95 = arith.constant 0.000000e+00 : f32
    %203 = vector.broadcast %cst_94 : f32 to vector<8x1xf32>
    %204 = vector.broadcast %cst_95 : f32 to vector<8x1xf32>
    %205 = arith.select %202, %203, %204 : vector<8x1xi1>, vector<8x1xf32>
    %206 = arith.addf %195, %205 : vector<8x1xf32>
    %207 = tpu.reciprocal %206 : vector<8x1xf32> -> vector<8x1xf32>
    %208 = arith.mulf %200, %207 : vector<8x1xf32>
    %cst_96 = arith.constant 0.000000e+00 : f32
    %209 = vector.broadcast %cst_96 : f32 to vector<8x1xf32>
    %210 = arith.subf %209, %208 : vector<8x1xf32>
    %cst_97 = arith.constant 1.000000e+00 : f32
    %211 = vector.broadcast %cst_97 : f32 to vector<8x1xf32>
    %212 = arith.subf %211, %205 : vector<8x1xf32>
    %213 = arith.mulf %210, %212 : vector<8x1xf32>
    %214 = vector.shape_cast %213 : vector<8x1xf32> to vector<1x8x1xf32>
    %cst_98 = arith.constant dense<0.000000e+00> : vector<1xf32>
    %215 = vector.multi_reduction <add>, %214, %cst_98 [1, 2] : vector<1x8x1xf32> to vector<1xf32>
    %216 = vector.shape_cast %215 : vector<1xf32> to vector<1x1x1xf32>
    %217 = vector.extract %216[0, 0, 0] : f32 from vector<1x1x1xf32>
    %218 = vector.broadcast %217 : f32 to vector<1x128xf32>
    %c0_99 = arith.constant 0 : index
    %c0_100 = arith.constant 0 : index
    %219 = arith.index_cast %c3_i32 : i32 to index
    %c0_101 = arith.constant 0 : index
    %220 = vector.load %arg5[%c0_99, %c0_100, %219, %c0_101] : memref<1x2x8x128xf32, #tpu.memory_space<vmem>>, vector<1x1x1x128xf32>
    %221 = vector.shape_cast %220 : vector<1x1x1x128xf32> to vector<1x128xf32>
    %222 = vector.shape_cast %218 : vector<1x128xf32> to vector<1x1x1x128xf32>
    tpu.vector_store %arg5[%c0_99, %c0_100, %219, %c0_101], %222 {strides = array<i32>} : memref<1x2x8x128xf32, #tpu.memory_space<vmem>>, vector<1x1x1x128xf32>,
    %223 = vector.shape_cast %205 : vector<8x1xf32> to vector<1x8x1xf32>
    %cst_102 = arith.constant dense<0.000000e+00> : vector<1xf32>
    %224 = vector.multi_reduction <add>, %223, %cst_102 [1, 2] : vector<1x8x1xf32> to vector<1xf32>
    %225 = vector.shape_cast %224 : vector<1xf32> to vector<1x1x1xf32>
    %226 = vector.extract %225[0, 0, 0] : f32 from vector<1x1x1xf32>
    %227 = vector.broadcast %226 : f32 to vector<1x128xf32>
    %c0_103 = arith.constant 0 : index
    %c1_104 = arith.constant 1 : index
    %228 = arith.index_cast %c3_i32 : i32 to index
    %c0_105 = arith.constant 0 : index
    %229 = vector.load %arg5[%c0_103, %c1_104, %228, %c0_105] : memref<1x2x8x128xf32, #tpu.memory_space<vmem>>, vector<1x1x1x128xf32>
    %230 = vector.shape_cast %229 : vector<1x1x1x128xf32> to vector<1x128xf32>
    %231 = vector.shape_cast %227 : vector<1x128xf32> to vector<1x1x1x128xf32>
    tpu.vector_store %arg5[%c0_103, %c1_104, %228, %c0_105], %231 {strides = array<i32>} : memref<1x2x8x128xf32, #tpu.memory_space<vmem>>, vector<1x1x1x128xf32>,
    %c4_i32 = arith.constant 4 : i32
    %232 = arith.index_cast %c4_i32 : i32 to index
    %c0_106 = arith.constant 0 : index
    %c0_107 = arith.constant 0 : index
    %233 = vector.load %arg3[%232, %c0_106, %c0_107] : memref<8x8x1xi32, #tpu.memory_space<vmem>>, vector<1x8x1xi32>
    %234 = vector.shape_cast %233 : vector<1x8x1xi32> to vector<8x1xi32>
    %235 = arith.index_cast %c4_i32 : i32 to index
    %c0_108 = arith.constant 0 : index
    %236 = vector.load %arg4[%235, %c0_108] : memref<8x8xi32, #tpu.memory_space<vmem>>, vector<1x8xi32>
    %237 = vector.broadcast %234 : vector<8x1xi32> to vector<8x8xi32>
    %238 = vector.broadcast %236 : vector<1x8xi32> to vector<8x8xi32>
    %239 = arith.cmpi eq, %237, %238 : vector<8x8xi32>
    %cst_109 = arith.constant 1.000000e+00 : f32
    %cst_110 = arith.constant 0.000000e+00 : f32
    %240 = vector.broadcast %cst_109 : f32 to vector<8x8xf32>
    %241 = vector.broadcast %cst_110 : f32 to vector<8x8xf32>
    %242 = arith.select %239, %240, %241 : vector<8x8xi1>, vector<8x8xf32>
    %cst_111 = arith.constant dense<0.000000e+00> : vector<8xf32>
    %243 = vector.multi_reduction <add>, %242, %cst_111 [1] : vector<8x8xf32> to vector<8xf32>
    %244 = vector.shape_cast %243 : vector<8xf32> to vector<8x1xf32>
    %cst_112 = arith.constant 1.000000e+00 : f32
    %245 = vector.broadcast %cst_112 : f32 to vector<8x1xf32>
    %246 = arith.subf %244, %245 : vector<8x1xf32>
    %c0_113 = arith.constant 0 : index
    %c0_114 = arith.constant 0 : index
    %247 = vector.load %arg6[%c0_113, %c0_114] : memref<8x8xf32, #tpu.memory_space<vmem>>, vector<8x8xf32>
    %cst_115 = arith.constant 0.000000e+00 : f32
    %248 = vector.broadcast %cst_115 : f32 to vector<8x8xf32>
    %249 = arith.select %239, %247, %248 : vector<8x8xi1>, vector<8x8xf32>
    %cst_116 = arith.constant dense<0.000000e+00> : vector<8xf32>
    %250 = vector.multi_reduction <add>, %249, %cst_116 [1] : vector<8x8xf32> to vector<8xf32>
    %251 = vector.shape_cast %250 : vector<8xf32> to vector<8x1xf32>
    %cst_117 = arith.constant 0.000000e+00 : f32
    %252 = vector.broadcast %cst_117 : f32 to vector<8x1xf32>
    %253 = arith.cmpf oeq, %246, %252 : vector<8x1xf32>
    %cst_118 = arith.constant 1.000000e+00 : f32
    %cst_119 = arith.constant 0.000000e+00 : f32
    %254 = vector.broadcast %cst_118 : f32 to vector<8x1xf32>
    %255 = vector.broadcast %cst_119 : f32 to vector<8x1xf32>
    %256 = arith.select %253, %254, %255 : vector<8x1xi1>, vector<8x1xf32>
    %257 = arith.addf %246, %256 : vector<8x1xf32>
    %258 = tpu.reciprocal %257 : vector<8x1xf32> -> vector<8x1xf32>
    %259 = arith.mulf %251, %258 : vector<8x1xf32>
    %cst_120 = arith.constant 0.000000e+00 : f32
    %260 = vector.broadcast %cst_120 : f32 to vector<8x1xf32>
    %261 = arith.subf %260, %259 : vector<8x1xf32>
    %cst_121 = arith.constant 1.000000e+00 : f32
    %262 = vector.broadcast %cst_121 : f32 to vector<8x1xf32>
    %263 = arith.subf %262, %256 : vector<8x1xf32>
    %264 = arith.mulf %261, %263 : vector<8x1xf32>
    %265 = vector.shape_cast %264 : vector<8x1xf32> to vector<1x8x1xf32>
    %cst_122 = arith.constant dense<0.000000e+00> : vector<1xf32>
    %266 = vector.multi_reduction <add>, %265, %cst_122 [1, 2] : vector<1x8x1xf32> to vector<1xf32>
    %267 = vector.shape_cast %266 : vector<1xf32> to vector<1x1x1xf32>
    %268 = vector.extract %267[0, 0, 0] : f32 from vector<1x1x1xf32>
    %269 = vector.broadcast %268 : f32 to vector<1x128xf32>
    %c0_123 = arith.constant 0 : index
    %c0_124 = arith.constant 0 : index
    %270 = arith.index_cast %c4_i32 : i32 to index
    %c0_125 = arith.constant 0 : index
    %271 = vector.load %arg5[%c0_123, %c0_124, %270, %c0_125] : memref<1x2x8x128xf32, #tpu.memory_space<vmem>>, vector<1x1x1x128xf32>
    %272 = vector.shape_cast %271 : vector<1x1x1x128xf32> to vector<1x128xf32>
    %273 = vector.shape_cast %269 : vector<1x128xf32> to vector<1x1x1x128xf32>
    tpu.vector_store %arg5[%c0_123, %c0_124, %270, %c0_125], %273 {strides = array<i32>} : memref<1x2x8x128xf32, #tpu.memory_space<vmem>>, vector<1x1x1x128xf32>,
    %274 = vector.shape_cast %256 : vector<8x1xf32> to vector<1x8x1xf32>
    %cst_126 = arith.constant dense<0.000000e+00> : vector<1xf32>
    %275 = vector.multi_reduction <add>, %274, %cst_126 [1, 2] : vector<1x8x1xf32> to vector<1xf32>
    %276 = vector.shape_cast %275 : vector<1xf32> to vector<1x1x1xf32>
    %277 = vector.extract %276[0, 0, 0] : f32 from vector<1x1x1xf32>
    %278 = vector.broadcast %277 : f32 to vector<1x128xf32>
    %c0_127 = arith.constant 0 : index
    %c1_128 = arith.constant 1 : index
    %279 = arith.index_cast %c4_i32 : i32 to index
    %c0_129 = arith.constant 0 : index
    %280 = vector.load %arg5[%c0_127, %c1_128, %279, %c0_129] : memref<1x2x8x128xf32, #tpu.memory_space<vmem>>, vector<1x1x1x128xf32>
    %281 = vector.shape_cast %280 : vector<1x1x1x128xf32> to vector<1x128xf32>
    %282 = vector.shape_cast %278 : vector<1x128xf32> to vector<1x1x1x128xf32>
    tpu.vector_store %arg5[%c0_127, %c1_128, %279, %c0_129], %282 {strides = array<i32>} : memref<1x2x8x128xf32, #tpu.memory_space<vmem>>, vector<1x1x1x128xf32>,
    %c5_i32 = arith.constant 5 : i32
    %283 = arith.index_cast %c5_i32 : i32 to index
    %c0_130 = arith.constant 0 : index
    %c0_131 = arith.constant 0 : index
    %284 = vector.load %arg3[%283, %c0_130, %c0_131] : memref<8x8x1xi32, #tpu.memory_space<vmem>>, vector<1x8x1xi32>
    %285 = vector.shape_cast %284 : vector<1x8x1xi32> to vector<8x1xi32>
    %286 = arith.index_cast %c5_i32 : i32 to index
    %c0_132 = arith.constant 0 : index
    %287 = vector.load %arg4[%286, %c0_132] : memref<8x8xi32, #tpu.memory_space<vmem>>, vector<1x8xi32>
    %288 = vector.broadcast %285 : vector<8x1xi32> to vector<8x8xi32>
    %289 = vector.broadcast %287 : vector<1x8xi32> to vector<8x8xi32>
    %290 = arith.cmpi eq, %288, %289 : vector<8x8xi32>
    %cst_133 = arith.constant 1.000000e+00 : f32
    %cst_134 = arith.constant 0.000000e+00 : f32
    %291 = vector.broadcast %cst_133 : f32 to vector<8x8xf32>
    %292 = vector.broadcast %cst_134 : f32 to vector<8x8xf32>
    %293 = arith.select %290, %291, %292 : vector<8x8xi1>, vector<8x8xf32>
    %cst_135 = arith.constant dense<0.000000e+00> : vector<8xf32>
    %294 = vector.multi_reduction <add>, %293, %cst_135 [1] : vector<8x8xf32> to vector<8xf32>
    %295 = vector.shape_cast %294 : vector<8xf32> to vector<8x1xf32>
    %cst_136 = arith.constant 1.000000e+00 : f32
    %296 = vector.broadcast %cst_136 : f32 to vector<8x1xf32>
    %297 = arith.subf %295, %296 : vector<8x1xf32>
    %c0_137 = arith.constant 0 : index
    %c0_138 = arith.constant 0 : index
    %298 = vector.load %arg6[%c0_137, %c0_138] : memref<8x8xf32, #tpu.memory_space<vmem>>, vector<8x8xf32>
    %cst_139 = arith.constant 0.000000e+00 : f32
    %299 = vector.broadcast %cst_139 : f32 to vector<8x8xf32>
    %300 = arith.select %290, %298, %299 : vector<8x8xi1>, vector<8x8xf32>
    %cst_140 = arith.constant dense<0.000000e+00> : vector<8xf32>
    %301 = vector.multi_reduction <add>, %300, %cst_140 [1] : vector<8x8xf32> to vector<8xf32>
    %302 = vector.shape_cast %301 : vector<8xf32> to vector<8x1xf32>
    %cst_141 = arith.constant 0.000000e+00 : f32
    %303 = vector.broadcast %cst_141 : f32 to vector<8x1xf32>
    %304 = arith.cmpf oeq, %297, %303 : vector<8x1xf32>
    %cst_142 = arith.constant 1.000000e+00 : f32
    %cst_143 = arith.constant 0.000000e+00 : f32
    %305 = vector.broadcast %cst_142 : f32 to vector<8x1xf32>
    %306 = vector.broadcast %cst_143 : f32 to vector<8x1xf32>
    %307 = arith.select %304, %305, %306 : vector<8x1xi1>, vector<8x1xf32>
    %308 = arith.addf %297, %307 : vector<8x1xf32>
    %309 = tpu.reciprocal %308 : vector<8x1xf32> -> vector<8x1xf32>
    %310 = arith.mulf %302, %309 : vector<8x1xf32>
    %cst_144 = arith.constant 0.000000e+00 : f32
    %311 = vector.broadcast %cst_144 : f32 to vector<8x1xf32>
    %312 = arith.subf %311, %310 : vector<8x1xf32>
    %cst_145 = arith.constant 1.000000e+00 : f32
    %313 = vector.broadcast %cst_145 : f32 to vector<8x1xf32>
    %314 = arith.subf %313, %307 : vector<8x1xf32>
    %315 = arith.mulf %312, %314 : vector<8x1xf32>
    %316 = vector.shape_cast %315 : vector<8x1xf32> to vector<1x8x1xf32>
    %cst_146 = arith.constant dense<0.000000e+00> : vector<1xf32>
    %317 = vector.multi_reduction <add>, %316, %cst_146 [1, 2] : vector<1x8x1xf32> to vector<1xf32>
    %318 = vector.shape_cast %317 : vector<1xf32> to vector<1x1x1xf32>
    %319 = vector.extract %318[0, 0, 0] : f32 from vector<1x1x1xf32>
    %320 = vector.broadcast %319 : f32 to vector<1x128xf32>
    %c0_147 = arith.constant 0 : index
    %c0_148 = arith.constant 0 : index
    %321 = arith.index_cast %c5_i32 : i32 to index
    %c0_149 = arith.constant 0 : index
    %322 = vector.load %arg5[%c0_147, %c0_148, %321, %c0_149] : memref<1x2x8x128xf32, #tpu.memory_space<vmem>>, vector<1x1x1x128xf32>
    %323 = vector.shape_cast %322 : vector<1x1x1x128xf32> to vector<1x128xf32>
    %324 = vector.shape_cast %320 : vector<1x128xf32> to vector<1x1x1x128xf32>
    tpu.vector_store %arg5[%c0_147, %c0_148, %321, %c0_149], %324 {strides = array<i32>} : memref<1x2x8x128xf32, #tpu.memory_space<vmem>>, vector<1x1x1x128xf32>,
    %325 = vector.shape_cast %307 : vector<8x1xf32> to vector<1x8x1xf32>
    %cst_150 = arith.constant dense<0.000000e+00> : vector<1xf32>
    %326 = vector.multi_reduction <add>, %325, %cst_150 [1, 2] : vector<1x8x1xf32> to vector<1xf32>
    %327 = vector.shape_cast %326 : vector<1xf32> to vector<1x1x1xf32>
    %328 = vector.extract %327[0, 0, 0] : f32 from vector<1x1x1xf32>
    %329 = vector.broadcast %328 : f32 to vector<1x128xf32>
    %c0_151 = arith.constant 0 : index
    %c1_152 = arith.constant 1 : index
    %330 = arith.index_cast %c5_i32 : i32 to index
    %c0_153 = arith.constant 0 : index
    %331 = vector.load %arg5[%c0_151, %c1_152, %330, %c0_153] : memref<1x2x8x128xf32, #tpu.memory_space<vmem>>, vector<1x1x1x128xf32>
    %332 = vector.shape_cast %331 : vector<1x1x1x128xf32> to vector<1x128xf32>
    %333 = vector.shape_cast %329 : vector<1x128xf32> to vector<1x1x1x128xf32>
    tpu.vector_store %arg5[%c0_151, %c1_152, %330, %c0_153], %333 {strides = array<i32>} : memref<1x2x8x128xf32, #tpu.memory_space<vmem>>, vector<1x1x1x128xf32>,
    %c6_i32 = arith.constant 6 : i32
    %334 = arith.index_cast %c6_i32 : i32 to index
    %c0_154 = arith.constant 0 : index
    %c0_155 = arith.constant 0 : index
    %335 = vector.load %arg3[%334, %c0_154, %c0_155] : memref<8x8x1xi32, #tpu.memory_space<vmem>>, vector<1x8x1xi32>
    %336 = vector.shape_cast %335 : vector<1x8x1xi32> to vector<8x1xi32>
    %337 = arith.index_cast %c6_i32 : i32 to index
    %c0_156 = arith.constant 0 : index
    %338 = vector.load %arg4[%337, %c0_156] : memref<8x8xi32, #tpu.memory_space<vmem>>, vector<1x8xi32>
    %339 = vector.broadcast %336 : vector<8x1xi32> to vector<8x8xi32>
    %340 = vector.broadcast %338 : vector<1x8xi32> to vector<8x8xi32>
    %341 = arith.cmpi eq, %339, %340 : vector<8x8xi32>
    %cst_157 = arith.constant 1.000000e+00 : f32
    %cst_158 = arith.constant 0.000000e+00 : f32
    %342 = vector.broadcast %cst_157 : f32 to vector<8x8xf32>
    %343 = vector.broadcast %cst_158 : f32 to vector<8x8xf32>
    %344 = arith.select %341, %342, %343 : vector<8x8xi1>, vector<8x8xf32>
    %cst_159 = arith.constant dense<0.000000e+00> : vector<8xf32>
    %345 = vector.multi_reduction <add>, %344, %cst_159 [1] : vector<8x8xf32> to vector<8xf32>
    %346 = vector.shape_cast %345 : vector<8xf32> to vector<8x1xf32>
    %cst_160 = arith.constant 1.000000e+00 : f32
    %347 = vector.broadcast %cst_160 : f32 to vector<8x1xf32>
    %348 = arith.subf %346, %347 : vector<8x1xf32>
    %c0_161 = arith.constant 0 : index
    %c0_162 = arith.constant 0 : index
    %349 = vector.load %arg6[%c0_161, %c0_162] : memref<8x8xf32, #tpu.memory_space<vmem>>, vector<8x8xf32>
    %cst_163 = arith.constant 0.000000e+00 : f32
    %350 = vector.broadcast %cst_163 : f32 to vector<8x8xf32>
    %351 = arith.select %341, %349, %350 : vector<8x8xi1>, vector<8x8xf32>
    %cst_164 = arith.constant dense<0.000000e+00> : vector<8xf32>
    %352 = vector.multi_reduction <add>, %351, %cst_164 [1] : vector<8x8xf32> to vector<8xf32>
    %353 = vector.shape_cast %352 : vector<8xf32> to vector<8x1xf32>
    %cst_165 = arith.constant 0.000000e+00 : f32
    %354 = vector.broadcast %cst_165 : f32 to vector<8x1xf32>
    %355 = arith.cmpf oeq, %348, %354 : vector<8x1xf32>
    %cst_166 = arith.constant 1.000000e+00 : f32
    %cst_167 = arith.constant 0.000000e+00 : f32
    %356 = vector.broadcast %cst_166 : f32 to vector<8x1xf32>
    %357 = vector.broadcast %cst_167 : f32 to vector<8x1xf32>
    %358 = arith.select %355, %356, %357 : vector<8x1xi1>, vector<8x1xf32>
    %359 = arith.addf %348, %358 : vector<8x1xf32>
    %360 = tpu.reciprocal %359 : vector<8x1xf32> -> vector<8x1xf32>
    %361 = arith.mulf %353, %360 : vector<8x1xf32>
    %cst_168 = arith.constant 0.000000e+00 : f32
    %362 = vector.broadcast %cst_168 : f32 to vector<8x1xf32>
    %363 = arith.subf %362, %361 : vector<8x1xf32>
    %cst_169 = arith.constant 1.000000e+00 : f32
    %364 = vector.broadcast %cst_169 : f32 to vector<8x1xf32>
    %365 = arith.subf %364, %358 : vector<8x1xf32>
    %366 = arith.mulf %363, %365 : vector<8x1xf32>
    %367 = vector.shape_cast %366 : vector<8x1xf32> to vector<1x8x1xf32>
    %cst_170 = arith.constant dense<0.000000e+00> : vector<1xf32>
    %368 = vector.multi_reduction <add>, %367, %cst_170 [1, 2] : vector<1x8x1xf32> to vector<1xf32>
    %369 = vector.shape_cast %368 : vector<1xf32> to vector<1x1x1xf32>
    %370 = vector.extract %369[0, 0, 0] : f32 from vector<1x1x1xf32>
    %371 = vector.broadcast %370 : f32 to vector<1x128xf32>
    %c0_171 = arith.constant 0 : index
    %c0_172 = arith.constant 0 : index
    %372 = arith.index_cast %c6_i32 : i32 to index
    %c0_173 = arith.constant 0 : index
    %373 = vector.load %arg5[%c0_171, %c0_172, %372, %c0_173] : memref<1x2x8x128xf32, #tpu.memory_space<vmem>>, vector<1x1x1x128xf32>
    %374 = vector.shape_cast %373 : vector<1x1x1x128xf32> to vector<1x128xf32>
    %375 = vector.shape_cast %371 : vector<1x128xf32> to vector<1x1x1x128xf32>
    tpu.vector_store %arg5[%c0_171, %c0_172, %372, %c0_173], %375 {strides = array<i32>} : memref<1x2x8x128xf32, #tpu.memory_space<vmem>>, vector<1x1x1x128xf32>,
    %376 = vector.shape_cast %358 : vector<8x1xf32> to vector<1x8x1xf32>
    %cst_174 = arith.constant dense<0.000000e+00> : vector<1xf32>
    %377 = vector.multi_reduction <add>, %376, %cst_174 [1, 2] : vector<1x8x1xf32> to vector<1xf32>
    %378 = vector.shape_cast %377 : vector<1xf32> to vector<1x1x1xf32>
    %379 = vector.extract %378[0, 0, 0] : f32 from vector<1x1x1xf32>
    %380 = vector.broadcast %379 : f32 to vector<1x128xf32>
    %c0_175 = arith.constant 0 : index
    %c1_176 = arith.constant 1 : index
    %381 = arith.index_cast %c6_i32 : i32 to index
    %c0_177 = arith.constant 0 : index
    %382 = vector.load %arg5[%c0_175, %c1_176, %381, %c0_177] : memref<1x2x8x128xf32, #tpu.memory_space<vmem>>, vector<1x1x1x128xf32>
    %383 = vector.shape_cast %382 : vector<1x1x1x128xf32> to vector<1x128xf32>
    %384 = vector.shape_cast %380 : vector<1x128xf32> to vector<1x1x1x128xf32>
    tpu.vector_store %arg5[%c0_175, %c1_176, %381, %c0_177], %384 {strides = array<i32>} : memref<1x2x8x128xf32, #tpu.memory_space<vmem>>, vector<1x1x1x128xf32>,
    %c7_i32 = arith.constant 7 : i32
    %385 = arith.index_cast %c7_i32 : i32 to index
    %c0_178 = arith.constant 0 : index
    %c0_179 = arith.constant 0 : index
    %386 = vector.load %arg3[%385, %c0_178, %c0_179] : memref<8x8x1xi32, #tpu.memory_space<vmem>>, vector<1x8x1xi32>
    %387 = vector.shape_cast %386 : vector<1x8x1xi32> to vector<8x1xi32>
    %388 = arith.index_cast %c7_i32 : i32 to index
    %c0_180 = arith.constant 0 : index
    %389 = vector.load %arg4[%388, %c0_180] : memref<8x8xi32, #tpu.memory_space<vmem>>, vector<1x8xi32>
    %390 = vector.broadcast %387 : vector<8x1xi32> to vector<8x8xi32>
    %391 = vector.broadcast %389 : vector<1x8xi32> to vector<8x8xi32>
    %392 = arith.cmpi eq, %390, %391 : vector<8x8xi32>
    %cst_181 = arith.constant 1.000000e+00 : f32
    %cst_182 = arith.constant 0.000000e+00 : f32
    %393 = vector.broadcast %cst_181 : f32 to vector<8x8xf32>
    %394 = vector.broadcast %cst_182 : f32 to vector<8x8xf32>
    %395 = arith.select %392, %393, %394 : vector<8x8xi1>, vector<8x8xf32>
    %cst_183 = arith.constant dense<0.000000e+00> : vector<8xf32>
    %396 = vector.multi_reduction <add>, %395, %cst_183 [1] : vector<8x8xf32> to vector<8xf32>
    %397 = vector.shape_cast %396 : vector<8xf32> to vector<8x1xf32>
    %cst_184 = arith.constant 1.000000e+00 : f32
    %398 = vector.broadcast %cst_184 : f32 to vector<8x1xf32>
    %399 = arith.subf %397, %398 : vector<8x1xf32>
    %c0_185 = arith.constant 0 : index
    %c0_186 = arith.constant 0 : index
    %400 = vector.load %arg6[%c0_185, %c0_186] : memref<8x8xf32, #tpu.memory_space<vmem>>, vector<8x8xf32>
    %cst_187 = arith.constant 0.000000e+00 : f32
    %401 = vector.broadcast %cst_187 : f32 to vector<8x8xf32>
    %402 = arith.select %392, %400, %401 : vector<8x8xi1>, vector<8x8xf32>
    %cst_188 = arith.constant dense<0.000000e+00> : vector<8xf32>
    %403 = vector.multi_reduction <add>, %402, %cst_188 [1] : vector<8x8xf32> to vector<8xf32>
    %404 = vector.shape_cast %403 : vector<8xf32> to vector<8x1xf32>
    %cst_189 = arith.constant 0.000000e+00 : f32
    %405 = vector.broadcast %cst_189 : f32 to vector<8x1xf32>
    %406 = arith.cmpf oeq, %399, %405 : vector<8x1xf32>
    %cst_190 = arith.constant 1.000000e+00 : f32
    %cst_191 = arith.constant 0.000000e+00 : f32
    %407 = vector.broadcast %cst_190 : f32 to vector<8x1xf32>
    %408 = vector.broadcast %cst_191 : f32 to vector<8x1xf32>
    %409 = arith.select %406, %407, %408 : vector<8x1xi1>, vector<8x1xf32>
    %410 = arith.addf %399, %409 : vector<8x1xf32>
    %411 = tpu.reciprocal %410 : vector<8x1xf32> -> vector<8x1xf32>
    %412 = arith.mulf %404, %411 : vector<8x1xf32>
    %cst_192 = arith.constant 0.000000e+00 : f32
    %413 = vector.broadcast %cst_192 : f32 to vector<8x1xf32>
    %414 = arith.subf %413, %412 : vector<8x1xf32>
    %cst_193 = arith.constant 1.000000e+00 : f32
    %415 = vector.broadcast %cst_193 : f32 to vector<8x1xf32>
    %416 = arith.subf %415, %409 : vector<8x1xf32>
    %417 = arith.mulf %414, %416 : vector<8x1xf32>
    %418 = vector.shape_cast %417 : vector<8x1xf32> to vector<1x8x1xf32>
    %cst_194 = arith.constant dense<0.000000e+00> : vector<1xf32>
    %419 = vector.multi_reduction <add>, %418, %cst_194 [1, 2] : vector<1x8x1xf32> to vector<1xf32>
    %420 = vector.shape_cast %419 : vector<1xf32> to vector<1x1x1xf32>
    %421 = vector.extract %420[0, 0, 0] : f32 from vector<1x1x1xf32>
    %422 = vector.broadcast %421 : f32 to vector<1x128xf32>
    %c0_195 = arith.constant 0 : index
    %c0_196 = arith.constant 0 : index
    %423 = arith.index_cast %c7_i32 : i32 to index
    %c0_197 = arith.constant 0 : index
    %424 = vector.load %arg5[%c0_195, %c0_196, %423, %c0_197] : memref<1x2x8x128xf32, #tpu.memory_space<vmem>>, vector<1x1x1x128xf32>
    %425 = vector.shape_cast %424 : vector<1x1x1x128xf32> to vector<1x128xf32>
    %426 = vector.shape_cast %422 : vector<1x128xf32> to vector<1x1x1x128xf32>
    tpu.vector_store %arg5[%c0_195, %c0_196, %423, %c0_197], %426 {strides = array<i32>} : memref<1x2x8x128xf32, #tpu.memory_space<vmem>>, vector<1x1x1x128xf32>,
    %427 = vector.shape_cast %409 : vector<8x1xf32> to vector<1x8x1xf32>
    %cst_198 = arith.constant dense<0.000000e+00> : vector<1xf32>
    %428 = vector.multi_reduction <add>, %427, %cst_198 [1, 2] : vector<1x8x1xf32> to vector<1xf32>
    %429 = vector.shape_cast %428 : vector<1xf32> to vector<1x1x1xf32>
    %430 = vector.extract %429[0, 0, 0] : f32 from vector<1x1x1xf32>
    %431 = vector.broadcast %430 : f32 to vector<1x128xf32>
    %c0_199 = arith.constant 0 : index
    %c1_200 = arith.constant 1 : index
    %432 = arith.index_cast %c7_i32 : i32 to index
    %c0_201 = arith.constant 0 : index
    %433 = vector.load %arg5[%c0_199, %c1_200, %432, %c0_201] : memref<1x2x8x128xf32, #tpu.memory_space<vmem>>, vector<1x1x1x128xf32>
    %434 = vector.shape_cast %433 : vector<1x1x1x128xf32> to vector<1x128xf32>
    %435 = vector.shape_cast %431 : vector<1x128xf32> to vector<1x1x1x128xf32>
    tpu.vector_store %arg5[%c0_199, %c1_200, %432, %c0_201], %435 {strides = array<i32>} : memref<1x2x8x128xf32, #tpu.memory_space<vmem>>, vector<1x1x1x128xf32>,
    %c8_i32_202 = arith.constant 8 : i32
    return
  }
  func.func @transform_0(%arg0: i32) -> (i32, i32) {
    %c0_i32 = arith.constant 0 : i32
    %c0_i32_0 = arith.constant 0 : i32
    return %arg0, %c0_i32 : i32, i32
  }
  func.func @transform_1(%arg0: i32) -> (i32, i32) {
    %c0_i32 = arith.constant 0 : i32
    %c0_i32_0 = arith.constant 0 : i32
    %c0_i32_1 = arith.constant 0 : i32
    return %c0_i32, %c0_i32_0 : i32, i32
  }
  func.func @transform_2(%arg0: i32) -> (i32, i32, i32) {
    %c0_i32 = arith.constant 0 : i32
    %c0_i32_0 = arith.constant 0 : i32
    %c0_i32_1 = arith.constant 0 : i32
    return %c0_i32, %arg0, %c0_i32_0 : i32, i32, i32
  }
  func.func @transform_3(%arg0: i32) -> (i32, i32) {
    %c0_i32 = arith.constant 0 : i32
    %c0_i32_0 = arith.constant 0 : i32
    %c0_i32_1 = arith.constant 0 : i32
    return %c0_i32, %c0_i32_0 : i32, i32
  }
  func.func @transform_4(%arg0: i32) -> (i32, i32, i32, i32) {
    %c0_i32 = arith.constant 0 : i32
    %c0_i32_0 = arith.constant 0 : i32
    %c0_i32_1 = arith.constant 0 : i32
    %c0_i32_2 = arith.constant 0 : i32
    return %arg0, %c0_i32, %c0_i32_0, %c0_i32_1 : i32, i32, i32, i32
  }
}

</mosaic_0001>

<bundles_post_ra>
// kernel: tpu_custom_call.1
= control target key start
LH: loop header
LB: loop body
LE: loop exit
PB: predicated region body
PF: predicated region fallthrough
CT: control target
= control target key end

     0   :  { %vm21_vm0 = vcmask 261120   ;;  %v651_v2 = vmov 0   ;;  %v652_v3 = vmov 0.0   ;;  %s906_s0 = inlined_call_operand.vmem [shape: bf16[8,32], index: 0, kind: input, shape index: {}]   ;;  %s907_s1 = inlined_call_operand.vmem [shape: bf16[8,32], index: 1, kind: input, shape index: {}]   ;;  %s908_s2 = inlined_call_operand.vmem [shape: s32[8,8,1], index: 2, kind: input, shape index: {}]   ;;  %s909_s3 = inlined_call_operand.vmem [shape: s32[8,8], index: 3, kind: input, shape index: {}]   ;;  %s910_s4 = inlined_call_operand.hbm [shape: f32[1,2,8,128], index: 4, kind: output, shape index: {}]  }
   0x1   :  { %v94_v0 = vld [vmem:[%s908_s2] sm:$0xff]  ;;  %605 = vset.pattern.permute.xlu1 %v651_v2  ;;  %561 = vmatprep.subr.bf16.mxu0 %v652_v3 }
   0x2   :  { %v20_v1 = vld [vmem:[%s907_s1] sm:$0xf]  ;;  %97 = vperm.xlu1 %605, %v94_v0  }
   0x3   :  { %v26_v4 = vsel %vm21_vm0, %v20_v1, 0 }
   0x4   :  { %562 = vmatpush3.bf16.xpose.msra.mxu0 %v26_v4 }
   0x5   :  { %9 = vsyncpa [#allocation4], 0  ;;  %vm653_vm1 = vmmov 0   ;;  %606 = vset.pattern.permute.xlu0 %v651_v2  ;;  %v19_v5 = vld [vmem:[%s906_s0] sm:$0xf]  ;;  %vm69_vm2 = vcmask 64512   ;;  %v74_v30 = vlaneseq }
   0x6   :  { %563 = vmatprep.mubr.msk.bf16.mxu0 %vm653_vm1, %v652_v3  ;;  %v696_v6 = vld [vmem:[%s909_s3] ss:$0 sm:$0xff]  ;;  %v541_v10 = vld [vmem:[%s908_s2 + $0x10] sm:$0xff]  ;;  %v544_v11 = vld [vmem:[%s908_s2 + $0x18] sm:$0xff]  ;;  %vm122_vm4 = vcmask 7168   ;;  %s654_s7 = smov [#allocation3]  }
   0x7   :  { %v547_v12 = vld [vmem:[%s908_s2 + $0x20] sm:$0xff]  ;;  %v553_v13 = vld [vmem:[%s908_s2 + $0x30] sm:$0xff]  ;;  %v538_v20 = vld [vmem:[%s908_s2 + $0x8] sm:$0xff]  ;;  %v75_v33 = vshrl.u32 %v74_v30, 7  ;;  %v77_v34 = vand.u32 127, %v74_v30  ;;  %s524_s8 = sshll.u32 %s654_s7, 4  ;;  %s525_s8 = int_to_ptr.vmem [resolvable:$true] %s524_s8 }
   0x8   :  { %v550_v21 = vld [vmem:[%s908_s2 + $0x28] sm:$0xff]  ;;  %v737_v31 = vld [vmem:[%s909_s3 + $0x1] ss:$0 sm:$0xff]  ;;  %v556_v40 = vld [vmem:[%s908_s2 + $0x38] sm:$0xff]  ;;  %s627_s11 = scalar_lea.vmem %s525_s8, 256  ;;  %p632_p1 = scmp.lt.s32.totalorder %s525_s8, %s525_s8 }
   0x9   :  { %vm81_vm7 = vcmp.eq.s32.totalorder %v77_v34, %v75_v33  ;;  %v754_v42 = vld [vmem:[%s909_s3 + $0x2] ss:$0 sm:$0xff]  ;;  %v761_v43 = vld [vmem:[%s909_s3 + $0x3] ss:$0 sm:$0xff]  ;;  %v774_v46 = vld [vmem:[%s909_s3 + $0x5] ss:$0 sm:$0xff]  ;;  %p628_p0 = scmp.ne.s32.totalorder %s525_s8, %s627_s11  ;;  %p633_p2 = scmp.lt.s32.totalorder %s627_s11, %s627_s11 }
   0xa   :  { %v557_v63 = vld [vmem:[%s909_s3 + $0x7] ss:$0 sm:$0xff] }
   0xb   :  { %564 = vmatmul.mubr.msk.bf16.vlgmr.msra.gmra.mrb[0].mxu0 %vm21_vm0, %v19_v5  ;;  %p634_p3 = por %p633_p2, %p632_p1 }
   0xd   :  { %p635_p4 = pnand %p634_p3, %p628_p0 }
  0x81   :  { %v698_v7 = vpop.permute.xlu1 %97 }
  0x82   :  { %vm103_vm3 = vcmp.eq.s32.totalorder %v698_v7, %v696_v6 }
  0x83   :  { %v104_v8 = vsel %vm103_vm3, 1.0, %v652_v3 }
  0x84   :  { %v105_v9 = vsel %vm69_vm2, %v104_v8, 0.0 }
  0x85   :  { %106 = vadd.xlane.f32.xlu1 %v105_v9 }
  0x96   :  { %205 = vperm.xlu1 %605, %v541_v10  }
  0x9a   :  { %258 = vperm.xlu1 %605, %v544_v11  }
  0x9e   :  { %311 = vperm.xlu1 %605, %v547_v12  }
  0xa2   :  { %417 = vperm.xlu1 %605, %v553_v13   ;;  %v548_v13 = vld [vmem:[%s909_s3 + $0x4] ss:$0 sm:$0xff] }
  0xde   :  { %v62_v14 = vpop.f32.mrb[0].mxu0 }
  0xdf   :  { %v68_v15 = vmul.f32 14.285714, %v62_v14  ;;  %v565_v16 = vpop.f32.mrb[1].mxu0 }
  0xe0   :  { %v65_v17 = vpop.f32.mrb[2].mxu0  ;;  %v554_v16 = vld [vmem:[%s909_s3 + $0x6] ss:$0 sm:$0xff] }
  0xe1   :  { %v566_v18 = vpop.f32.mrb[3].mxu0  ;;  %v70_v19 = vsel %vm69_vm2, %v68_v15, -inf }
  0xe2   :  { %71 = vmax.xlane.f32.xlu0 %v70_v19 }
  0xf8   :  { %152 = vperm.xlu0 %606, %v538_v20  }
  0xfc   :  { %364 = vperm.xlu0 %606, %v550_v21  }
 0x112   :  { %v107_v22 = vpop.xlane.xlu1 %106 }
 0x113   :  { %v537_v23 = vadd.f32 -1.0, %v107_v22 }
 0x115   :  { %vm114_vm5 = vcmp.eq.f32.partialorder %v537_v23, 0.0 }
 0x116   :  { %v727_v24 = vsel %vm114_vm5, 1.0, %v652_v3  ;;  %v749_v41 = vpop.permute.xlu1 %205 }
 0x117   :  { %v730_v25 = vadd.f32 %v537_v23, %v727_v24  ;;  %v135_v26 = vsel %vm122_vm4, %v727_v24, 0.0  ;;  %vm211_vm8 = vcmp.eq.s32.totalorder %v749_v41, %v754_v42 }
 0x118   :  { %v212_v45 = vsel %vm211_vm8, 1.0, %v652_v3 }
 0x119   :  { %v213_v48 = vsel %vm69_vm2, %v212_v45, 0.0 }
 0x11a   :  { %v763_v44 = vpop.permute.xlu1 %258 }
 0x11b   :  { %136 = vadd.xlane.f32.xlu0 %v135_v26  ;;  %vm264_vm9 = vcmp.eq.s32.totalorder %v763_v44, %v761_v43 }
 0x11c   :  { %v265_v49 = vsel %vm264_vm9, 1.0, %v652_v3 }
 0x11d   :  { %v266_v50 = vsel %vm69_vm2, %v265_v49, 0.0 }
 0x11e   :  { %v312_v53 = vpop.permute.xlu1 %311 }
 0x11f   :  { %vm317_vm13 = vcmp.eq.s32.totalorder %v312_v53, %v548_v13 }
 0x122   :  { %v418_v54 = vpop.permute.xlu1 %417 }
 0x123   :  { %vm423_vm14 = vcmp.eq.s32.totalorder %v418_v54, %v554_v16 }
 0x16f   :  { %v72_v27 = vpop.xlane.xlu0 %71 }
 0x170   :  { %v73_v28 = vsub.f32 %v68_v15, %v72_v27 }
 0x172   :  { %v82_v29 = vmul.f32 1.442695, %v73_v28 }
 0x174   :  { %607 = vpow2.f32 %v82_v29 }
 0x177   :  { %v153_v32 = vpop.permute.xlu0 %152 }
 0x178   :  { %vm158_vm6 = vcmp.eq.s32.totalorder %v153_v32, %v737_v31  ;;  %v424_v32 = vsel %vm423_vm14, 1.0, %v652_v3 }
 0x179   :  { %v159_v35 = vsel %vm158_vm6, 1.0, %v652_v3  ;;  %v425_v33 = vsel %vm69_vm2, %v424_v32, 0.0 }
 0x17a   :  { %v160_v36 = vsel %vm69_vm2, %v159_v35, 0.0 }
 0x17b   :  { %161 = vadd.xlane.f32.xlu1 %v160_v36  ;;  %v776_v47 = vpop.permute.xlu0 %364 }
 0x17c   :  { %vm370_vm10 = vcmp.eq.s32.totalorder %v776_v47, %v774_v46  ;;  %v120_v46 = vsub.f32 1.0, %v727_v24 }
 0x17d   :  { %v371_v51 = vsel %vm370_vm10, 1.0, %v652_v3 }
 0x17e   :  { %v608_v37 = vpop.eup %607  ;;  %v372_v52 = vsel %vm69_vm2, %v371_v51, 0.0 }
 0x17f   :  { %v84_v38 = vsel %vm81_vm7, 0.0, %v608_v37 }
 0x180   :  { %v85_v39 = vsel %vm69_vm2, %v84_v38, 0.0 }
 0x181   :  { %86 = vadd.xlane.f32.xlu0 %v85_v39 }
 0x197   :  { %470 = vperm.xlu0 %606, %v556_v40  }
 0x1a8   :  { %v791_v57 = vpop.xlane.xlu0 %136 }
 0x1b6   :  { %214 = vadd.xlane.f32.xlu0 %v213_v48 }
 0x1ba   :  { %267 = vadd.xlane.f32.xlu0 %v266_v50 }
 0x1be   :  { %373 = vadd.xlane.f32.xlu0 %v372_v52 }
 0x208   :  { %v162_v55 = vpop.xlane.xlu1 %161 }
 0x209   :  { %v540_v56 = vadd.f32 -1.0, %v162_v55 }
 0x20b   :  { %vm169_vm11 = vcmp.eq.f32.partialorder %v540_v56, 0.0 }
 0x20c   :  { %v794_v58 = vsel %vm169_vm11, 1.0, %v652_v3 }
 0x20d   :  { %v797_v59 = vadd.f32 %v540_v56, %v794_v58  ;;  %v189_v60 = vsel %vm122_vm4, %v794_v58, 0.0  ;;  %v175_v56 = vsub.f32 1.0, %v794_v58 }
 0x20e   :  { %v87_v61 = vpop.xlane.xlu0 %86  ;;  %190 = vadd.xlane.f32.xlu1 %v189_v60 }
 0x20f   :  { %v88_v62 = vadd.f32 1e-20, %v87_v61 }
 0x211   :  { %609 = vlog2.f32 %v88_v62 }
 0x212   :  { %611 = vrcp.f32 %v730_v25 }
 0x213   :  { %613 = vrcp.f32 %v797_v59 }
 0x216   :  { %v471_v0 = vpop.permute.xlu0 %470 }
 0x217   :  { %vm476_vm12 = vcmp.eq.s32.totalorder %v471_v0, %v557_v63 }
 0x218   :  { %v477_v1 = vsel %vm476_vm12, 1.0, %v652_v3 }
 0x219   :  { %v478_v2 = vsel %vm69_vm2, %v477_v1, 0.0 }
 0x21a   :  { %479 = vadd.xlane.f32.xlu0 %v478_v2 }
 0x21b   :  { %v610_v4 = vpop.eup %609 }
 0x21c   :  { %v90_v5 = vmul.f32 0.6931472, %v610_v4  ;;  %v612_v44 = vpop.eup %611 }
 0x21d   :  { %v614_v47 = vpop.eup %613 }
 0x21e   :  { %v91_v8 = vsub.f32 %v73_v28, %v90_v5  ;;  %v318_v28 = vsel %vm317_vm13, 1.0, %v652_v3 }
 0x21f   :  { %v319_v31 = vsel %vm69_vm2, %v318_v28, 0.0 }
 0x220   :  { %v92_v9 = vsel %vm81_vm7, 0.0, %v91_v8 }
 0x221   :  { %93 = vst.msk [vmem:[#allocation2] sm:$0xff] %vm69_vm2, %v92_v9 }
 0x228   :  { %v109_v10 = vld [vmem:[#allocation2] sm:$0xff] }
 0x229   :  { %v110_v11 = vsel %vm103_vm3, %v109_v10, 0.0  ;;  %v165_v14 = vsel %vm158_vm6, %v109_v10, 0.0  ;;  %v324_v6 = vsel %vm317_vm13, %v109_v10, 0.0  ;;  %v430_v17 = vsel %vm423_vm14, %v109_v10, 0.0 }
 0x22a   :  { %v111_v12 = vsel %vm69_vm2, %v110_v11, 0.0  ;;  %v166_v15 = vsel %vm69_vm2, %v165_v14, 0.0  ;;  %v325_v7 = vsel %vm69_vm2, %v324_v6, 0.0  ;;  %v431_v18 = vsel %vm69_vm2, %v430_v17, 0.0 }
 0x22b   :  { %112 = vadd.xlane.f32.xlu0 %v111_v12  ;;  %v218_v35 = vsel %vm211_vm8, %v109_v10, 0.0  ;;  %v271_v37 = vsel %vm264_vm9, %v109_v10, 0.0  ;;  %v377_v39 = vsel %vm370_vm10, %v109_v10, 0.0  ;;  %v483_v41 = vsel %vm476_vm12, %v109_v10, 0.0 }
 0x22c   :  { %v219_v36 = vsel %vm69_vm2, %v218_v35, 0.0  ;;  %v272_v38 = vsel %vm69_vm2, %v271_v37, 0.0  ;;  %v378_v40 = vsel %vm69_vm2, %v377_v39, 0.0  ;;  %v484_v42 = vsel %vm69_vm2, %v483_v41, 0.0 }
 0x22f   :  { %167 = vadd.xlane.f32.xlu0 %v166_v15 }
 0x233   :  { %326 = vadd.xlane.f32.xlu0 %v325_v7 }
 0x237   :  { %432 = vadd.xlane.f32.xlu0 %v431_v18 }
 0x243   :  { %v215_v19 = vpop.xlane.xlu0 %214 }
 0x244   :  { %v543_v20 = vadd.f32 -1.0, %v215_v19 }
 0x246   :  { %vm222_vm15 = vcmp.eq.f32.partialorder %v543_v20, 0.0 }
 0x247   :  { %v827_v21 = vsel %vm222_vm15, 1.0, %v652_v3  ;;  %v268_v22 = vpop.xlane.xlu0 %267 }
 0x248   :  { %v224_v23 = vadd.f32 %v543_v20, %v827_v21  ;;  %v546_v26 = vadd.f32 -1.0, %v268_v22  ;;  %v242_v27 = vsel %vm122_vm4, %v827_v21, 0.0  ;;  %v228_v19 = vsub.f32 1.0, %v827_v21 }
 0x249   :  { %243 = vadd.xlane.f32.xlu1 %v242_v27 }
 0x24a   :  { %vm275_vm0 = vcmp.eq.f32.partialorder %v546_v26, 0.0  ;;  %615 = vrcp.f32 %v224_v23 }
 0x24b   :  { %v835_v29 = vsel %vm275_vm0, 1.0, %v652_v3  ;;  %v374_v45 = vpop.xlane.xlu0 %373 }
 0x24c   :  { %v277_v30 = vadd.f32 %v546_v26, %v835_v29  ;;  %v295_v34 = vsel %vm122_vm4, %v835_v29, 0.0  ;;  %v552_v61 = vadd.f32 -1.0, %v374_v45 }
 0x24d   :  { %320 = vadd.xlane.f32.xlu1 %v319_v31 }
 0x24e   :  { %vm381_vm1 = vcmp.eq.f32.partialorder %v552_v61, 0.0  ;;  %617 = vrcp.f32 %v277_v30 }
 0x24f   :  { %v382_v1 = vsel %vm381_vm1, 1.0, %v652_v3 }
 0x250   :  { %v383_v9 = vadd.f32 %v552_v61, %v382_v1  ;;  %v401_v14 = vsel %vm122_vm4, %v382_v1, 0.0  ;;  %v138_v61 = vrot.slane %v791_v57, 4 }
 0x251   :  { %426 = vadd.xlane.f32.xlu1 %v425_v33  ;;  %v281_v33 = vsub.f32 1.0, %v835_v29 }
 0x254   :  { %v616_v15 = vpop.eup %615 }
 0x255   :  { %296 = vadd.xlane.f32.xlu1 %v295_v34 }
 0x258   :  { %v618_v20 = vpop.eup %617 }
 0x259   :  { %220 = vadd.xlane.f32.xlu1 %v219_v36 }
 0x25d   :  { %273 = vadd.xlane.f32.xlu1 %v272_v38 }
 0x261   :  { %379 = vadd.xlane.f32.xlu1 %v378_v40 }
 0x265   :  { %485 = vadd.xlane.f32.xlu1 %v484_v42 }
 0x29b   :  { %v864_v60 = vpop.xlane.xlu1 %190 }
 0x2a7   :  { %v480_v43 = vpop.xlane.xlu0 %479 }
 0x2a8   :  { %v558_v0 = vadd.f32 -1.0, %v480_v43 }
 0x2aa   :  { %vm487_vm3 = vcmp.eq.f32.partialorder %v558_v0, 0.0 }
 0x2ab   :  { %v488_v12 = vsel %vm487_vm3, 1.0, %v652_v3 }
 0x2ac   :  { %v489_v16 = vadd.f32 %v558_v0, %v488_v12  ;;  %v507_v27 = vsel %vm122_vm4, %v488_v12, 0.0 }
 0x2b8   :  { %v113_v48 = vpop.xlane.xlu0 %112 }
 0x2b9   :  { %v118_v49 = vmul.f32 %v612_v44, %v113_v48  ;;  %v387_v48 = vsub.f32 1.0, %v382_v1 }
 0x2bb   :  { %v119_v50 = vsub.f32 0.0, %v118_v49 }
 0x2bc   :  { %v168_v51 = vpop.xlane.xlu0 %167 }
 0x2bd   :  { %v173_v52 = vmul.f32 %v614_v47, %v168_v51  ;;  %v121_v53 = vmul.f32 %v120_v46, %v119_v50 }
 0x2bf   :  { %v174_v54 = vsub.f32 0.0, %v173_v52  ;;  %v123_v55 = vsel %vm122_vm4, %v121_v53, 0.0 }
 0x2c0   :  { %124 = vadd.xlane.f32.xlu0 %v123_v55  ;;  %v327_v22 = vpop.xlane.xlu0 %326  ;;  %v493_v55 = vsub.f32 1.0, %v488_v12 }
 0x2c1   :  { %v176_v25 = vmul.f32 %v175_v56, %v174_v54 }
 0x2c3   :  { %v177_v59 = vsel %vm122_vm4, %v176_v25, 0.0 }
 0x2c4   :  { %178 = vadd.xlane.f32.xlu0 %v177_v59  ;;  %v433_v40 = vpop.xlane.xlu0 %432 }
 0x2d6   :  { %v866_v62 = vpop.xlane.xlu1 %243 }
 0x2da   :  { %v321_v24 = vpop.xlane.xlu1 %320 }
 0x2db   :  { %v549_v63 = vadd.f32 -1.0, %v321_v24  ;;  %v139_v24 = vadd.f32 %v138_v61, %v791_v57 }
 0x2dd   :  { %vm328_vm2 = vcmp.eq.f32.partialorder %v549_v63, 0.0  ;;  %v140_v0 = vrot.slane %v139_v24, 2 }
 0x2de   :  { %v329_v58 = vsel %vm328_vm2, 1.0, %v652_v3  ;;  %v427_v2 = vpop.xlane.xlu1 %426 }
 0x2df   :  { %v330_v4 = vadd.f32 %v549_v63, %v329_v58  ;;  %v555_v5 = vadd.f32 -1.0, %v427_v2  ;;  %v348_v8 = vsel %vm122_vm4, %v329_v58, 0.0  ;;  %v334_v39 = vsub.f32 1.0, %v329_v58 }
 0x2e0   :  { %349 = vadd.xlane.f32.xlu1 %v348_v8  ;;  %v192_v63 = vrot.slane %v864_v60, 4 }
 0x2e1   :  { %619 = vrcp.f32 %v330_v4  ;;  %vm434_vm5 = vcmp.eq.f32.partialorder %v555_v5, 0.0 }
 0x2e2   :  { %v435_v10 = vsel %vm434_vm5, 1.0, %v652_v3  ;;  %v872_v11 = vpop.xlane.xlu1 %296  ;;  %621 = vrcp.f32 %v383_v9  ;;  %v193_v1 = vadd.f32 %v192_v63, %v864_v60  ;;  %v141_v9 = vadd.f32 %v140_v0, %v139_v24 }
 0x2e3   :  { %v436_v13 = vadd.f32 %v555_v5, %v435_v10  ;;  %v454_v17 = vsel %vm122_vm4, %v435_v10, 0.0  ;;  %v440_v51 = vsub.f32 1.0, %v435_v10 }
 0x2e4   :  { %402 = vadd.xlane.f32.xlu1 %v401_v14  ;;  %v194_v5 = vrot.slane %v193_v1, 2 }
 0x2e5   :  { %623 = vrcp.f32 %v436_v13 }
 0x2e6   :  { %v221_v6 = vpop.xlane.xlu1 %220  ;;  %625 = vrcp.f32 %v489_v16  ;;  %v195_v16 = vadd.f32 %v194_v5, %v193_v1 }
 0x2e7   :  { %v226_v7 = vmul.f32 %v616_v15, %v221_v6  ;;  %v142_v15 = vrot.slane %v141_v9, 1 }
 0x2e8   :  { %455 = vadd.xlane.f32.xlu1 %v454_v17 }
 0x2e9   :  { %v227_v18 = vsub.f32 0.0, %v226_v7 }
 0x2ea   :  { %v274_v3 = vpop.xlane.xlu1 %273 }
 0x2eb   :  { %v620_v23 = vpop.eup %619  ;;  %v279_v26 = vmul.f32 %v618_v20, %v274_v3  ;;  %v229_v28 = vmul.f32 %v228_v19, %v227_v18  ;;  %v143_v18 = vadd.f32 %v142_v15, %v141_v9  ;;  %v196_v19 = vrot.slane %v195_v16, 1 }
 0x2ec   :  { %508 = vadd.xlane.f32.xlu1 %v507_v27  ;;  %v332_v30 = vmul.f32 %v620_v23, %v327_v22  ;;  %v622_v34 = vpop.eup %621  ;;  %v245_v3 = vrot.slane %v866_v62, 4  ;;  %v298_v27 = vrot.slane %v872_v11, 4 }
 0x2ed   :  { %v280_v31 = vsub.f32 0.0, %v279_v26  ;;  %v230_v32 = vsel %vm122_vm4, %v229_v28, 0.0  ;;  %v197_v22 = vadd.f32 %v196_v19, %v195_v16 }
 0x2ee   :  { %v380_v35 = vpop.xlane.xlu1 %379  ;;  %231 = vadd.xlane.f32.xlu0 %v230_v32  ;;  %v333_v21 = vsub.f32 0.0, %v332_v30  ;;  %v246_v26 = vadd.f32 %v245_v3, %v866_v62 }
 0x2ef   :  { %v624_v36 = vpop.eup %623  ;;  %v385_v37 = vmul.f32 %v622_v34, %v380_v35  ;;  %v282_v38 = vmul.f32 %v281_v33, %v280_v31  ;;  %v299_v31 = vadd.f32 %v298_v27, %v872_v11 }
 0x2f0   :  { %v335_v45 = vmul.f32 %v334_v39, %v333_v21  ;;  %v438_v43 = vmul.f32 %v624_v36, %v433_v40  ;;  %v626_v49 = vpop.eup %625  ;;  %v247_v30 = vrot.slane %v246_v26, 2 }
 0x2f1   :  { %v386_v41 = vsub.f32 0.0, %v385_v37  ;;  %v283_v42 = vsel %vm122_vm4, %v282_v38, 0.0  ;;  %v300_v21 = vrot.slane %v299_v31, 2 }
 0x2f2   :  { %v486_v44 = vpop.xlane.xlu1 %485  ;;  %284 = vadd.xlane.f32.xlu0 %v283_v42  ;;  %v336_v29 = vsel %vm122_vm4, %v335_v45, 0.0  ;;  %v439_v47 = vsub.f32 0.0, %v438_v43  ;;  %v248_v35 = vadd.f32 %v247_v30, %v246_v26 }
 0x2f3   :  { %v491_v50 = vmul.f32 %v626_v49, %v486_v44  ;;  %v388_v46 = vmul.f32 %v387_v48, %v386_v41  ;;  %v301_v44 = vadd.f32 %v300_v21, %v299_v31 }
 0x2f4   :  { %v441_v54 = vmul.f32 %v440_v51, %v439_v47  ;;  %v249_v45 = vrot.slane %v248_v35, 1 }
 0x2f5   :  { %v492_v52 = vsub.f32 0.0, %v491_v50  ;;  %v389_v53 = vsel %vm122_vm4, %v388_v46, 0.0 }
 0x2f6   :  { %337 = vadd.xlane.f32.xlu0 %v336_v29  ;;  %v442_v56 = vsel %vm122_vm4, %v441_v54, 0.0 }
 0x2f7   :  { %v494_v25 = vmul.f32 %v493_v55, %v492_v52  ;;  %v250_v52 = vadd.f32 %v249_v45, %v248_v35 }
 0x2f9   :  { %v495_v59 = vsel %vm122_vm4, %v494_v25, 0.0 }
 0x2fa   :  { %390 = vadd.xlane.f32.xlu0 %v389_v53 }
 0x2fe   :  { %443 = vadd.xlane.f32.xlu0 %v442_v56  ;;  %v302_v56 = vrot.slane %v301_v44, 1 }
 0x300   :  { %v303_v5 = vadd.f32 %v302_v56, %v301_v44 }
 0x302   :  { %496 = vadd.xlane.f32.xlu0 %v495_v59 }
 0x34d   :  { %v125_v58 = vpop.xlane.xlu0 %124 }
 0x34e   :  { %v126_v2 = vrot.slane %v125_v58, 4 }
 0x350   :  { %v127_v4 = vadd.f32 %v126_v2, %v125_v58 }
 0x351   :  { %v179_v8 = vpop.xlane.xlu0 %178 }
 0x352   :  { %v128_v10 = vrot.slane %v127_v4, 2  ;;  %v180_v12 = vrot.slane %v179_v8, 4 }
 0x354   :  { %v181_v13 = vadd.f32 %v180_v12, %v179_v8  ;;  %v129_v14 = vadd.f32 %v128_v10, %v127_v4 }
 0x356   :  { %v182_v6 = vrot.slane %v181_v13, 2  ;;  %v130_v7 = vrot.slane %v129_v14, 1 }
 0x358   :  { %v131_v57 = vadd.f32 %v130_v7, %v129_v14  ;;  %v183_v17 = vadd.f32 %v182_v6, %v181_v13 }
 0x35a   :  { %567 = vpush %v131_v57  ;;  %v184_v60 = vrot.slane %v183_v17, 1 }
 0x35b   :  { %569 = vpush %v143_v18 }
 0x35c   :  { %v185_v20 = vadd.f32 %v184_v60, %v183_v17 }
 0x35e   :  { %571 = vpush %v185_v20 }
 0x35f   :  { %573 = vpush %v197_v22 }
 0x36d   :  { %v350_v23 = vpop.xlane.xlu1 %349 }
 0x36e   :  { %v351_v32 = vrot.slane %v350_v23, 4 }
 0x370   :  { %v352_v38 = vadd.f32 %v351_v32, %v350_v23 }
 0x371   :  { %v403_v28 = vpop.xlane.xlu1 %402 }
 0x372   :  { %v404_v39 = vrot.slane %v403_v28, 4  ;;  %v353_v48 = vrot.slane %v352_v38, 2 }
 0x374   :  { %v405_v49 = vadd.f32 %v404_v39, %v403_v28  ;;  %v354_v63 = vadd.f32 %v353_v48, %v352_v38 }
 0x375   :  { %v456_v36 = vpop.xlane.xlu1 %455 }
 0x376   :  { %v457_v50 = vrot.slane %v456_v36, 4  ;;  %v406_v25 = vrot.slane %v405_v49, 2  ;;  %v355_v13 = vrot.slane %v354_v63, 1 }
 0x378   :  { %v458_v59 = vadd.f32 %v457_v50, %v456_v36  ;;  %v407_v14 = vadd.f32 %v406_v25, %v405_v49  ;;  %v356_v22 = vadd.f32 %v355_v13, %v354_v63 }
 0x379   :  { %v509_v29 = vpop.xlane.xlu1 %508 }
 0x37a   :  { %v510_v61 = vrot.slane %v509_v29, 4  ;;  %v459_v9 = vrot.slane %v458_v59, 2  ;;  %v408_v3 = vrot.slane %v407_v14, 1 }
 0x37b   :  { %v232_v33 = vpop.xlane.xlu0 %231 }
 0x37c   :  { %v233_v34 = vrot.slane %v232_v33, 4  ;;  %v511_v10 = vadd.f32 %v510_v61, %v509_v29  ;;  %v460_v23 = vadd.f32 %v459_v9, %v458_v59  ;;  %v409_v21 = vadd.f32 %v408_v3, %v407_v14 }
 0x37e   :  { %v234_v37 = vadd.f32 %v233_v34, %v232_v33  ;;  %v512_v60 = vrot.slane %v511_v10, 2  ;;  %v461_v36 = vrot.slane %v460_v23, 1 }
 0x37f   :  { %v285_v40 = vpop.xlane.xlu0 %284 }
 0x380   :  { %v235_v41 = vrot.slane %v234_v37, 2  ;;  %v286_v42 = vrot.slane %v285_v40, 4  ;;  %v513_v35 = vadd.f32 %v512_v60, %v511_v10 }
 0x382   :  { %v287_v62 = vadd.f32 %v286_v42, %v285_v40  ;;  %v236_v43 = vadd.f32 %v235_v41, %v234_v37  ;;  %v462_v41 = vadd.f32 %v461_v36, %v460_v23  ;;  %v514_v42 = vrot.slane %v513_v35, 1 }
 0x383   :  { %v338_v11 = vpop.xlane.xlu0 %337 }
 0x384   :  { %v288_v46 = vrot.slane %v287_v62, 2  ;;  %v339_v47 = vrot.slane %v338_v11, 4  ;;  %v237_v51 = vrot.slane %v236_v43, 1 }
 0x386   :  { %v340_v53 = vadd.f32 %v339_v47, %v338_v11  ;;  %v238_v54 = vadd.f32 %v237_v51, %v236_v43  ;;  %v289_v55 = vadd.f32 %v288_v46, %v287_v62  ;;  %v515_v43 = vadd.f32 %v514_v42, %v513_v35 }
 0x387   :  { %v391_v24 = vpop.xlane.xlu0 %390 }
 0x388   :  { %v341_v0 = vrot.slane %v340_v53, 2  ;;  %v392_v1 = vrot.slane %v391_v24, 4  ;;  %575 = vpush %v238_v54  ;;  %v290_v58 = vrot.slane %v289_v55, 1 }
 0x389   :  { %577 = vpush %v250_v52 }
 0x38a   :  { %v393_v2 = vadd.f32 %v392_v1, %v391_v24  ;;  %v291_v4 = vadd.f32 %v290_v58, %v289_v55  ;;  %v342_v8 = vadd.f32 %v341_v0, %v340_v53 }
 0x38b   :  { %s568_s3 = spop %567  ;;  %v444_v12 = vpop.xlane.xlu0 %443 }
 0x38c   :  { %v394_v15 = vrot.slane %v393_v2, 2  ;;  %v133_v16 = vstv %s568_s3  ;;  %s570_s21 = spop %569  ;;  %v445_v6 = vrot.slane %v444_v12, 4  ;;  %579 = vpush %v291_v4  ;;  %v343_v7 = vrot.slane %v342_v8, 1 }
 0x38d   :  { %134 = vst [vmem:[#allocation3] sm:$0x1] %v133_v16  ;;  %v145_v57 = vstv %s570_s21  ;;  %581 = vpush %v303_v5 }
 0x38e   :  { %147 = vst [vmem:[#allocation3 + $0x8] sm:$0x1] %v145_v57  ;;  %v446_v17 = vadd.f32 %v445_v6, %v444_v12  ;;  %v344_v18 = vadd.f32 %v343_v7, %v342_v8  ;;  %v395_v19 = vadd.f32 %v394_v15, %v393_v2 }
 0x38f   :  { %s572_s0 = spop %571  ;;  %v497_v20 = vpop.xlane.xlu0 %496 }
 0x390   :  { %v447_v26 = vrot.slane %v446_v17, 2  ;;  %v187_v27 = vstv %s572_s0  ;;  %s574_s22 = spop %573  ;;  %v498_v28 = vrot.slane %v497_v20, 4  ;;  %583 = vpush %v344_v18  ;;  %v396_v30 = vrot.slane %v395_v19, 1 }
 0x391   :  { %188 = vst [vmem:[#allocation3 + $0x1] sm:$0x1] %v187_v27  ;;  %v199_v31 = vstv %s574_s22  ;;  %585 = vpush %v356_v22 }
 0x392   :  { %200 = vst [vmem:[#allocation3 + $0x9] sm:$0x1] %v199_v31  ;;  %v499_v32 = vadd.f32 %v498_v28, %v497_v20  ;;  %v397_v33 = vadd.f32 %v396_v30, %v395_v19  ;;  %v448_v34 = vadd.f32 %v447_v26, %v446_v17 }
 0x394   :  { %v500_v37 = vrot.slane %v499_v32, 2  ;;  %587 = vpush %v397_v33  ;;  %v449_v38 = vrot.slane %v448_v34, 1 }
 0x395   :  { %589 = vpush %v409_v21 }
 0x396   :  { %v501_v39 = vadd.f32 %v500_v37, %v499_v32  ;;  %v450_v40 = vadd.f32 %v449_v38, %v448_v34 }
 0x398   :  { %591 = vpush %v450_v40  ;;  %v502_v45 = vrot.slane %v501_v39, 1 }
 0x399   :  { %593 = vpush %v462_v41 }
 0x39a   :  { %v503_v62 = vadd.f32 %v502_v45, %v501_v39 }
 0x39c   :  { %595 = vpush %v503_v62 }
 0x39d   :  { %597 = vpush %v515_v43 }
 0x3b9   :  { %s576_s23 = spop %575 }
 0x3ba   :  { %v240_v44 = vstv %s576_s23  ;;  %s578_s24 = spop %577 }
 0x3bb   :  { %241 = vst [vmem:[#allocation3 + $0x2] sm:$0x1] %v240_v44  ;;  %v252_v48 = vstv %s578_s24 }
 0x3bc   :  { %253 = vst [vmem:[#allocation3 + $0xa] sm:$0x1] %v252_v48 }
 0x3bd   :  { %s580_s25 = spop %579 }
 0x3be   :  { %v293_v49 = vstv %s580_s25  ;;  %s582_s26 = spop %581 }
 0x3bf   :  { %294 = vst [vmem:[#allocation3 + $0x3] sm:$0x1] %v293_v49  ;;  %v305_v50 = vstv %s582_s26 }
 0x3c0   :  { %306 = vst [vmem:[#allocation3 + $0xb] sm:$0x1] %v305_v50 }
 0x3c1   :  { %s584_s27 = spop %583 }
 0x3c2   :  { %v346_v11 = vstv %s584_s27  ;;  %s586_s28 = spop %585 }
 0x3c3   :  { %347 = vst [vmem:[#allocation3 + $0x4] sm:$0x1] %v346_v11  ;;  %v358_v29 = vstv %s586_s28 }
 0x3c4   :  { %359 = vst [vmem:[#allocation3 + $0xc] sm:$0x1] %v358_v29 }
 0x3c5   :  { %s588_s29 = spop %587 }
 0x3c6   :  { %v399_v46 = vstv %s588_s29  ;;  %s590_s30 = spop %589 }
 0x3c7   :  { %400 = vst [vmem:[#allocation3 + $0x5] sm:$0x1] %v399_v46  ;;  %v411_v47 = vstv %s590_s30 }
 0x3c8   :  { %412 = vst [vmem:[#allocation3 + $0xd] sm:$0x1] %v411_v47 }
 0x3c9   :  { %s592_s5 = spop %591 }
 0x3ca   :  { %v452_v51 = vstv %s592_s5  ;;  %s594_s6 = spop %593 }
 0x3cb   :  { %453 = vst [vmem:[#allocation3 + $0x6] sm:$0x1] %v452_v51  ;;  %v464_v52 = vstv %s594_s6 }
 0x3cc   :  { %465 = vst [vmem:[#allocation3 + $0xe] sm:$0x1] %v464_v52 }
 0x3cd   :  { %s596_s9 = spop %595 }
 0x3ce   :  { %v505_v53 = vstv %s596_s9  ;;  %s598_s10 = spop %597 }
 0x3cf   :  { %506 = vst [vmem:[#allocation3 + $0x7] sm:$0x1] %v505_v53  ;;  %v517_v54 = vstv %s598_s10 }
 0x3d0   :  { %518 = vst [vmem:[#allocation3 + $0xf] sm:$0x1] %v517_v54 }
 0x3d1   :  { %638 = shalt.err (!%p635_p4)
}
 0x3d2   :  { %s639_s14 = scalar_lea.hbm %s910_s4, 256 }
 0x3d3   :  { %p640_p5 = scmp.ne.s32.totalorder %s910_s4, %s639_s14  ;;  %p643_p6 = scmp.lt.u32.totalorder %s639_s14, %s910_s4 }
 0x3d5   :  { %p645_p7 = pnand %p643_p6, %p640_p5 }
 0x3d7   :  { %648 = shalt.err (!%p645_p7)
}
 0x3d8   :  { %s655_s18 = smov 128   ;;  %s656_s19 = smov 8  }
 0x3d9   :  { %530 = dma.vmem_to_hbm [thread:$0]  %s525_s8, 256, %s910_s4, [#allocation4], %s655_s18, %s655_s18, %s656_s19  }
 0x3da   :  { %649 = dma.done.wait [#allocation4], 256  }
 0x3db   :  { %650 = vsyncadd [#allocation4], 4294967040 }
 0x3dc   :  { %534 = vsyncpa [#allocation4], 1 }

// kernel: tpu_custom_call.1
= control target key start
LH: loop header
LB: loop body
LE: loop exit
PB: predicated region body
PF: predicated region fallthrough
CT: control target
= control target key end

     0   :  { %vm21_vm0 = vcmask 261120   ;;  %v651_v2 = vmov 0   ;;  %v652_v3 = vmov 0.0   ;;  %s906_s0 = inlined_call_operand.vmem [shape: bf16[8,32], index: 0, kind: input, shape index: {}]   ;;  %s907_s1 = inlined_call_operand.vmem [shape: bf16[8,32], index: 1, kind: input, shape index: {}]   ;;  %s908_s2 = inlined_call_operand.vmem [shape: s32[8,8,1], index: 2, kind: input, shape index: {}]   ;;  %s909_s3 = inlined_call_operand.vmem [shape: s32[8,8], index: 3, kind: input, shape index: {}]   ;;  %s910_s4 = inlined_call_operand.hbm [shape: f32[1,2,8,128], index: 4, kind: output, shape index: {}]  }
   0x1   :  { %v94_v0 = vld [vmem:[%s908_s2] sm:$0xff]  ;;  %605 = vset.pattern.permute.xlu1 %v651_v2  ;;  %561 = vmatprep.subr.bf16.mxu0 %v652_v3 }
   0x2   :  { %v20_v1 = vld [vmem:[%s907_s1] sm:$0xf]  ;;  %97 = vperm.xlu1 %605, %v94_v0  }
   0x3   :  { %v26_v4 = vsel %vm21_vm0, %v20_v1, 0 }
   0x4   :  { %562 = vmatpush3.bf16.xpose.msra.mxu0 %v26_v4 }
   0x5   :  { %9 = vsyncpa [#allocation4], 0  ;;  %vm653_vm1 = vmmov 0   ;;  %606 = vset.pattern.permute.xlu0 %v651_v2  ;;  %v19_v5 = vld [vmem:[%s906_s0] sm:$0xf]  ;;  %vm69_vm2 = vcmask 64512   ;;  %v74_v30 = vlaneseq }
   0x6   :  { %563 = vmatprep.mubr.msk.bf16.mxu0 %vm653_vm1, %v652_v3  ;;  %v696_v6 = vld [vmem:[%s909_s3] ss:$0 sm:$0xff]  ;;  %v541_v10 = vld [vmem:[%s908_s2 + $0x10] sm:$0xff]  ;;  %v544_v11 = vld [vmem:[%s908_s2 + $0x18] sm:$0xff]  ;;  %vm122_vm4 = vcmask 7168   ;;  %s654_s7 = smov [#allocation3]  }
   0x7   :  { %v547_v12 = vld [vmem:[%s908_s2 + $0x20] sm:$0xff]  ;;  %v553_v13 = vld [vmem:[%s908_s2 + $0x30] sm:$0xff]  ;;  %v538_v20 = vld [vmem:[%s908_s2 + $0x8] sm:$0xff]  ;;  %v75_v33 = vshrl.u32 %v74_v30, 7  ;;  %v77_v34 = vand.u32 127, %v74_v30  ;;  %s524_s8 = sshll.u32 %s654_s7, 4  ;;  %s525_s8 = int_to_ptr.vmem [resolvable:$true] %s524_s8 }
   0x8   :  { %v550_v21 = vld [vmem:[%s908_s2 + $0x28] sm:$0xff]  ;;  %v737_v31 = vld [vmem:[%s909_s3 + $0x1] ss:$0 sm:$0xff]  ;;  %v556_v40 = vld [vmem:[%s908_s2 + $0x38] sm:$0xff]  ;;  %s627_s11 = scalar_lea.vmem %s525_s8, 256  ;;  %p632_p1 = scmp.lt.s32.totalorder %s525_s8, %s525_s8 }
   0x9   :  { %vm81_vm7 = vcmp.eq.s32.totalorder %v77_v34, %v75_v33  ;;  %v754_v42 = vld [vmem:[%s909_s3 + $0x2] ss:$0 sm:$0xff]  ;;  %v761_v43 = vld [vmem:[%s909_s3 + $0x3] ss:$0 sm:$0xff]  ;;  %v774_v46 = vld [vmem:[%s909_s3 + $0x5] ss:$0 sm:$0xff]  ;;  %p628_p0 = scmp.ne.s32.totalorder %s525_s8, %s627_s11  ;;  %p633_p2 = scmp.lt.s32.totalorder %s627_s11, %s627_s11 }
   0xa   :  { %v557_v63 = vld [vmem:[%s909_s3 + $0x7] ss:$0 sm:$0xff] }
   0xb   :  { %564 = vmatmul.mubr.msk.bf16.vlgmr.msra.gmra.mrb[0].mxu0 %vm21_vm0, %v19_v5  ;;  %p634_p3 = por %p633_p2, %p632_p1 }
   0xd   :  { %p635_p4 = pnand %p634_p3, %p628_p0 }
  0x81   :  { %v698_v7 = vpop.permute.xlu1 %97 }
  0x82   :  { %vm103_vm3 = vcmp.eq.s32.totalorder %v698_v7, %v696_v6 }
  0x83   :  { %v104_v8 = vsel %vm103_vm3, 1.0, %v652_v3 }
  0x84   :  { %v105_v9 = vsel %vm69_vm2, %v104_v8, 0.0 }
  0x85   :  { %106 = vadd.xlane.f32.xlu1 %v105_v9 }
  0x96   :  { %205 = vperm.xlu1 %605, %v541_v10  }
  0x9a   :  { %258 = vperm.xlu1 %605, %v544_v11  }
  0x9e   :  { %311 = vperm.xlu1 %605, %v547_v12  }
  0xa2   :  { %417 = vperm.xlu1 %605, %v553_v13   ;;  %v548_v13 = vld [vmem:[%s909_s3 + $0x4] ss:$0 sm:$0xff] }
  0xde   :  { %v62_v14 = vpop.f32.mrb[0].mxu0 }
  0xdf   :  { %v68_v15 = vmul.f32 14.285714, %v62_v14  ;;  %v565_v16 = vpop.f32.mrb[1].mxu0 }
  0xe0   :  { %v65_v17 = vpop.f32.mrb[2].mxu0  ;;  %v554_v16 = vld [vmem:[%s909_s3 + $0x6] ss:$0 sm:$0xff] }
  0xe1   :  { %v566_v18 = vpop.f32.mrb[3].mxu0  ;;  %v70_v19 = vsel %vm69_vm2, %v68_v15, -inf }
  0xe2   :  { %71 = vmax.xlane.f32.xlu0 %v70_v19 }
  0xf8   :  { %152 = vperm.xlu0 %606, %v538_v20  }
  0xfc   :  { %364 = vperm.xlu0 %606, %v550_v21  }
 0x112   :  { %v107_v22 = vpop.xlane.xlu1 %106 }
 0x113   :  { %v537_v23 = vadd.f32 -1.0, %v107_v22 }
 0x115   :  { %vm114_vm5 = vcmp.eq.f32.partialorder %v537_v23, 0.0 }
 0x116   :  { %v727_v24 = vsel %vm114_vm5, 1.0, %v652_v3  ;;  %v749_v41 = vpop.permute.xlu1 %205 }
 0x117   :  { %v730_v25 = vadd.f32 %v537_v23, %v727_v24  ;;  %v135_v26 = vsel %vm122_vm4, %v727_v24, 0.0  ;;  %vm211_vm8 = vcmp.eq.s32.totalorder %v749_v41, %v754_v42 }
 0x118   :  { %v212_v45 = vsel %vm211_vm8, 1.0, %v652_v3 }
 0x119   :  { %v213_v48 = vsel %vm69_vm2, %v212_v45, 0.0 }
 0x11a   :  { %v763_v44 = vpop.permute.xlu1 %258 }
 0x11b   :  { %136 = vadd.xlane.f32.xlu0 %v135_v26  ;;  %vm264_vm9 = vcmp.eq.s32.totalorder %v763_v44, %v761_v43 }
 0x11c   :  { %v265_v49 = vsel %vm264_vm9, 1.0, %v652_v3 }
 0x11d   :  { %v266_v50 = vsel %vm69_vm2, %v265_v49, 0.0 }
 0x11e   :  { %v312_v53 = vpop.permute.xlu1 %311 }
 0x11f   :  { %vm317_vm13 = vcmp.eq.s32.totalorder %v312_v53, %v548_v13 }
 0x122   :  { %v418_v54 = vpop.permute.xlu1 %417 }
 0x123   :  { %vm423_vm14 = vcmp.eq.s32.totalorder %v418_v54, %v554_v16 }
 0x16f   :  { %v72_v27 = vpop.xlane.xlu0 %71 }
 0x170   :  { %v73_v28 = vsub.f32 %v68_v15, %v72_v27 }
 0x172   :  { %v82_v29 = vmul.f32 1.442695, %v73_v28 }
 0x174   :  { %607 = vpow2.f32 %v82_v29 }
 0x177   :  { %v153_v32 = vpop.permute.xlu0 %152 }
 0x178   :  { %vm158_vm6 = vcmp.eq.s32.totalorder %v153_v32, %v737_v31  ;;  %v424_v32 = vsel %vm423_vm14, 1.0, %v652_v3 }
 0x179   :  { %v159_v35 = vsel %vm158_vm6, 1.0, %v652_v3  ;;  %v425_v33 = vsel %vm69_vm2, %v424_v32, 0.0 }
 0x17a   :  { %v160_v36 = vsel %vm69_vm2, %v159_v35, 0.0 }
 0x17b   :  { %161 = vadd.xlane.f32.xlu1 %v160_v36  ;;  %v776_v47 = vpop.permute.xlu0 %364 }
 0x17c   :  { %vm370_vm10 = vcmp.eq.s32.totalorder %v776_v47, %v774_v46  ;;  %v120_v46 = vsub.f32 1.0, %v727_v24 }
 0x17d   :  { %v371_v51 = vsel %vm370_vm10, 1.0, %v652_v3 }
 0x17e   :  { %v608_v37 = vpop.eup %607  ;;  %v372_v52 = vsel %vm69_vm2, %v371_v51, 0.0 }
 0x17f   :  { %v84_v38 = vsel %vm81_vm7, 0.0, %v608_v37 }
 0x180   :  { %v85_v39 = vsel %vm69_vm2, %v84_v38, 0.0 }
 0x181   :  { %86 = vadd.xlane.f32.xlu0 %v85_v39 }
 0x197   :  { %470 = vperm.xlu0 %606, %v556_v40  }
 0x1a8   :  { %v791_v57 = vpop.xlane.xlu0 %136 }
 0x1b6   :  { %214 = vadd.xlane.f32.xlu0 %v213_v48 }
 0x1ba   :  { %267 = vadd.xlane.f32.xlu0 %v266_v50 }
 0x1be   :  { %373 = vadd.xlane.f32.xlu0 %v372_v52 }
 0x208   :  { %v162_v55 = vpop.xlane.xlu1 %161 }
 0x209   :  { %v540_v56 = vadd.f32 -1.0, %v162_v55 }
 0x20b   :  { %vm169_vm11 = vcmp.eq.f32.partialorder %v540_v56, 0.0 }
 0x20c   :  { %v794_v58 = vsel %vm169_vm11, 1.0, %v652_v3 }
 0x20d   :  { %v797_v59 = vadd.f32 %v540_v56, %v794_v58  ;;  %v189_v60 = vsel %vm122_vm4, %v794_v58, 0.0  ;;  %v175_v56 = vsub.f32 1.0, %v794_v58 }
 0x20e   :  { %v87_v61 = vpop.xlane.xlu0 %86  ;;  %190 = vadd.xlane.f32.xlu1 %v189_v60 }
 0x20f   :  { %v88_v62 = vadd.f32 1e-20, %v87_v61 }
 0x211   :  { %609 = vlog2.f32 %v88_v62 }
 0x212   :  { %611 = vrcp.f32 %v730_v25 }
 0x213   :  { %613 = vrcp.f32 %v797_v59 }
 0x216   :  { %v471_v0 = vpop.permute.xlu0 %470 }
 0x217   :  { %vm476_vm12 = vcmp.eq.s32.totalorder %v471_v0, %v557_v63 }
 0x218   :  { %v477_v1 = vsel %vm476_vm12, 1.0, %v652_v3 }
 0x219   :  { %v478_v2 = vsel %vm69_vm2, %v477_v1, 0.0 }
 0x21a   :  { %479 = vadd.xlane.f32.xlu0 %v478_v2 }
 0x21b   :  { %v610_v4 = vpop.eup %609 }
 0x21c   :  { %v90_v5 = vmul.f32 0.6931472, %v610_v4  ;;  %v612_v44 = vpop.eup %611 }
 0x21d   :  { %v614_v47 = vpop.eup %613 }
 0x21e   :  { %v91_v8 = vsub.f32 %v73_v28, %v90_v5  ;;  %v318_v28 = vsel %vm317_vm13, 1.0, %v652_v3 }
 0x21f   :  { %v319_v31 = vsel %vm69_vm2, %v318_v28, 0.0 }
 0x220   :  { %v92_v9 = vsel %vm81_vm7, 0.0, %v91_v8 }
 0x221   :  { %93 = vst.msk [vmem:[#allocation2] sm:$0xff] %vm69_vm2, %v92_v9 }
 0x228   :  { %v109_v10 = vld [vmem:[#allocation2] sm:$0xff] }
 0x229   :  { %v110_v11 = vsel %vm103_vm3, %v109_v10, 0.0  ;;  %v165_v14 = vsel %vm158_vm6, %v109_v10, 0.0  ;;  %v324_v6 = vsel %vm317_vm13, %v109_v10, 0.0  ;;  %v430_v17 = vsel %vm423_vm14, %v109_v10, 0.0 }
 0x22a   :  { %v111_v12 = vsel %vm69_vm2, %v110_v11, 0.0  ;;  %v166_v15 = vsel %vm69_vm2, %v165_v14, 0.0  ;;  %v325_v7 = vsel %vm69_vm2, %v324_v6, 0.0  ;;  %v431_v18 = vsel %vm69_vm2, %v430_v17, 0.0 }
 0x22b   :  { %112 = vadd.xlane.f32.xlu0 %v111_v12  ;;  %v218_v35 = vsel %vm211_vm8, %v109_v10, 0.0  ;;  %v271_v37 = vsel %vm264_vm9, %v109_v10, 0.0  ;;  %v377_v39 = vsel %vm370_vm10, %v109_v10, 0.0  ;;  %v483_v41 = vsel %vm476_vm12, %v109_v10, 0.0 }
 0x22c   :  { %v219_v36 = vsel %vm69_vm2, %v218_v35, 0.0  ;;  %v272_v38 = vsel %vm69_vm2, %v271_v37, 0.0  ;;  %v378_v40 = vsel %vm69_vm2, %v377_v39, 0.0  ;;  %v484_v42 = vsel %vm69_vm2, %v483_v41, 0.0 }
 0x22f   :  { %167 = vadd.xlane.f32.xlu0 %v166_v15 }
 0x233   :  { %326 = vadd.xlane.f32.xlu0 %v325_v7 }
 0x237   :  { %432 = vadd.xlane.f32.xlu0 %v431_v18 }
 0x243   :  { %v215_v19 = vpop.xlane.xlu0 %214 }
 0x244   :  { %v543_v20 = vadd.f32 -1.0, %v215_v19 }
 0x246   :  { %vm222_vm15 = vcmp.eq.f32.partialorder %v543_v20, 0.0 }
 0x247   :  { %v827_v21 = vsel %vm222_vm15, 1.0, %v652_v3  ;;  %v268_v22 = vpop.xlane.xlu0 %267 }
 0x248   :  { %v224_v23 = vadd.f32 %v543_v20, %v827_v21  ;;  %v546_v26 = vadd.f32 -1.0, %v268_v22  ;;  %v242_v27 = vsel %vm122_vm4, %v827_v21, 0.0  ;;  %v228_v19 = vsub.f32 1.0, %v827_v21 }
 0x249   :  { %243 = vadd.xlane.f32.xlu1 %v242_v27 }
 0x24a   :  { %vm275_vm0 = vcmp.eq.f32.partialorder %v546_v26, 0.0  ;;  %615 = vrcp.f32 %v224_v23 }
 0x24b   :  { %v835_v29 = vsel %vm275_vm0, 1.0, %v652_v3  ;;  %v374_v45 = vpop.xlane.xlu0 %373 }
 0x24c   :  { %v277_v30 = vadd.f32 %v546_v26, %v835_v29  ;;  %v295_v34 = vsel %vm122_vm4, %v835_v29, 0.0  ;;  %v552_v61 = vadd.f32 -1.0, %v374_v45 }
 0x24d   :  { %320 = vadd.xlane.f32.xlu1 %v319_v31 }
 0x24e   :  { %vm381_vm1 = vcmp.eq.f32.partialorder %v552_v61, 0.0  ;;  %617 = vrcp.f32 %v277_v30 }
 0x24f   :  { %v382_v1 = vsel %vm381_vm1, 1.0, %v652_v3 }
 0x250   :  { %v383_v9 = vadd.f32 %v552_v61, %v382_v1  ;;  %v401_v14 = vsel %vm122_vm4, %v382_v1, 0.0  ;;  %v138_v61 = vrot.slane %v791_v57, 4 }
 0x251   :  { %426 = vadd.xlane.f32.xlu1 %v425_v33  ;;  %v281_v33 = vsub.f32 1.0, %v835_v29 }
 0x254   :  { %v616_v15 = vpop.eup %615 }
 0x255   :  { %296 = vadd.xlane.f32.xlu1 %v295_v34 }
 0x258   :  { %v618_v20 = vpop.eup %617 }
 0x259   :  { %220 = vadd.xlane.f32.xlu1 %v219_v36 }
 0x25d   :  { %273 = vadd.xlane.f32.xlu1 %v272_v38 }
 0x261   :  { %379 = vadd.xlane.f32.xlu1 %v378_v40 }
 0x265   :  { %485 = vadd.xlane.f32.xlu1 %v484_v42 }
 0x29b   :  { %v864_v60 = vpop.xlane.xlu1 %190 }
 0x2a7   :  { %v480_v43 = vpop.xlane.xlu0 %479 }
 0x2a8   :  { %v558_v0 = vadd.f32 -1.0, %v480_v43 }
 0x2aa   :  { %vm487_vm3 = vcmp.eq.f32.partialorder %v558_v0, 0.0 }
 0x2ab   :  { %v488_v12 = vsel %vm487_vm3, 1.0, %v652_v3 }
 0x2ac   :  { %v489_v16 = vadd.f32 %v558_v0, %v488_v12  ;;  %v507_v27 = vsel %vm122_vm4, %v488_v12, 0.0 }
 0x2b8   :  { %v113_v48 = vpop.xlane.xlu0 %112 }
 0x2b9   :  { %v118_v49 = vmul.f32 %v612_v44, %v113_v48  ;;  %v387_v48 = vsub.f32 1.0, %v382_v1 }
 0x2bb   :  { %v119_v50 = vsub.f32 0.0, %v118_v49 }
 0x2bc   :  { %v168_v51 = vpop.xlane.xlu0 %167 }
 0x2bd   :  { %v173_v52 = vmul.f32 %v614_v47, %v168_v51  ;;  %v121_v53 = vmul.f32 %v120_v46, %v119_v50 }
 0x2bf   :  { %v174_v54 = vsub.f32 0.0, %v173_v52  ;;  %v123_v55 = vsel %vm122_vm4, %v121_v53, 0.0 }
 0x2c0   :  { %124 = vadd.xlane.f32.xlu0 %v123_v55  ;;  %v327_v22 = vpop.xlane.xlu0 %326  ;;  %v493_v55 = vsub.f32 1.0, %v488_v12 }
 0x2c1   :  { %v176_v25 = vmul.f32 %v175_v56, %v174_v54 }
 0x2c3   :  { %v177_v59 = vsel %vm122_vm4, %v176_v25, 0.0 }
 0x2c4   :  { %178 = vadd.xlane.f32.xlu0 %v177_v59  ;;  %v433_v40 = vpop.xlane.xlu0 %432 }
 0x2d6   :  { %v866_v62 = vpop.xlane.xlu1 %243 }
 0x2da   :  { %v321_v24 = vpop.xlane.xlu1 %320 }
 0x2db   :  { %v549_v63 = vadd.f32 -1.0, %v321_v24  ;;  %v139_v24 = vadd.f32 %v138_v61, %v791_v57 }
 0x2dd   :  { %vm328_vm2 = vcmp.eq.f32.partialorder %v549_v63, 0.0  ;;  %v140_v0 = vrot.slane %v139_v24, 2 }
 0x2de   :  { %v329_v58 = vsel %vm328_vm2, 1.0, %v652_v3  ;;  %v427_v2 = vpop.xlane.xlu1 %426 }
 0x2df   :  { %v330_v4 = vadd.f32 %v549_v63, %v329_v58  ;;  %v555_v5 = vadd.f32 -1.0, %v427_v2  ;;  %v348_v8 = vsel %vm122_vm4, %v329_v58, 0.0  ;;  %v334_v39 = vsub.f32 1.0, %v329_v58 }
 0x2e0   :  { %349 = vadd.xlane.f32.xlu1 %v348_v8  ;;  %v192_v63 = vrot.slane %v864_v60, 4 }
 0x2e1   :  { %619 = vrcp.f32 %v330_v4  ;;  %vm434_vm5 = vcmp.eq.f32.partialorder %v555_v5, 0.0 }
 0x2e2   :  { %v435_v10 = vsel %vm434_vm5, 1.0, %v652_v3  ;;  %v872_v11 = vpop.xlane.xlu1 %296  ;;  %621 = vrcp.f32 %v383_v9  ;;  %v193_v1 = vadd.f32 %v192_v63, %v864_v60  ;;  %v141_v9 = vadd.f32 %v140_v0, %v139_v24 }
 0x2e3   :  { %v436_v13 = vadd.f32 %v555_v5, %v435_v10  ;;  %v454_v17 = vsel %vm122_vm4, %v435_v10, 0.0  ;;  %v440_v51 = vsub.f32 1.0, %v435_v10 }
 0x2e4   :  { %402 = vadd.xlane.f32.xlu1 %v401_v14  ;;  %v194_v5 = vrot.slane %v193_v1, 2 }
 0x2e5   :  { %623 = vrcp.f32 %v436_v13 }
 0x2e6   :  { %v221_v6 = vpop.xlane.xlu1 %220  ;;  %625 = vrcp.f32 %v489_v16  ;;  %v195_v16 = vadd.f32 %v194_v5, %v193_v1 }
 0x2e7   :  { %v226_v7 = vmul.f32 %v616_v15, %v221_v6  ;;  %v142_v15 = vrot.slane %v141_v9, 1 }
 0x2e8   :  { %455 = vadd.xlane.f32.xlu1 %v454_v17 }
 0x2e9   :  { %v227_v18 = vsub.f32 0.0, %v226_v7 }
 0x2ea   :  { %v274_v3 = vpop.xlane.xlu1 %273 }
 0x2eb   :  { %v620_v23 = vpop.eup %619  ;;  %v279_v26 = vmul.f32 %v618_v20, %v274_v3  ;;  %v229_v28 = vmul.f32 %v228_v19, %v227_v18  ;;  %v143_v18 = vadd.f32 %v142_v15, %v141_v9  ;;  %v196_v19 = vrot.slane %v195_v16, 1 }
 0x2ec   :  { %508 = vadd.xlane.f32.xlu1 %v507_v27  ;;  %v332_v30 = vmul.f32 %v620_v23, %v327_v22  ;;  %v622_v34 = vpop.eup %621  ;;  %v245_v3 = vrot.slane %v866_v62, 4  ;;  %v298_v27 = vrot.slane %v872_v11, 4 }
 0x2ed   :  { %v280_v31 = vsub.f32 0.0, %v279_v26  ;;  %v230_v32 = vsel %vm122_vm4, %v229_v28, 0.0  ;;  %v197_v22 = vadd.f32 %v196_v19, %v195_v16 }
 0x2ee   :  { %v380_v35 = vpop.xlane.xlu1 %379  ;;  %231 = vadd.xlane.f32.xlu0 %v230_v32  ;;  %v333_v21 = vsub.f32 0.0, %v332_v30  ;;  %v246_v26 = vadd.f32 %v245_v3, %v866_v62 }
 0x2ef   :  { %v624_v36 = vpop.eup %623  ;;  %v385_v37 = vmul.f32 %v622_v34, %v380_v35  ;;  %v282_v38 = vmul.f32 %v281_v33, %v280_v31  ;;  %v299_v31 = vadd.f32 %v298_v27, %v872_v11 }
 0x2f0   :  { %v335_v45 = vmul.f32 %v334_v39, %v333_v21  ;;  %v438_v43 = vmul.f32 %v624_v36, %v433_v40  ;;  %v626_v49 = vpop.eup %625  ;;  %v247_v30 = vrot.slane %v246_v26, 2 }
 0x2f1   :  { %v386_v41 = vsub.f32 0.0, %v385_v37  ;;  %v283_v42 = vsel %vm122_vm4, %v282_v38, 0.0  ;;  %v300_v21 = vrot.slane %v299_v31, 2 }
 0x2f2   :  { %v486_v44 = vpop.xlane.xlu1 %485  ;;  %284 = vadd.xlane.f32.xlu0 %v283_v42  ;;  %v336_v29 = vsel %vm122_vm4, %v335_v45, 0.0  ;;  %v439_v47 = vsub.f32 0.0, %v438_v43  ;;  %v248_v35 = vadd.f32 %v247_v30, %v246_v26 }
 0x2f3   :  { %v491_v50 = vmul.f32 %v626_v49, %v486_v44  ;;  %v388_v46 = vmul.f32 %v387_v48, %v386_v41  ;;  %v301_v44 = vadd.f32 %v300_v21, %v299_v31 }
 0x2f4   :  { %v441_v54 = vmul.f32 %v440_v51, %v439_v47  ;;  %v249_v45 = vrot.slane %v248_v35, 1 }
 0x2f5   :  { %v492_v52 = vsub.f32 0.0, %v491_v50  ;;  %v389_v53 = vsel %vm122_vm4, %v388_v46, 0.0 }
 0x2f6   :  { %337 = vadd.xlane.f32.xlu0 %v336_v29  ;;  %v442_v56 = vsel %vm122_vm4, %v441_v54, 0.0 }
 0x2f7   :  { %v494_v25 = vmul.f32 %v493_v55, %v492_v52  ;;  %v250_v52 = vadd.f32 %v249_v45, %v248_v35 }
 0x2f9   :  { %v495_v59 = vsel %vm122_vm4, %v494_v25, 0.0 }
 0x2fa   :  { %390 = vadd.xlane.f32.xlu0 %v389_v53 }
 0x2fe   :  { %443 = vadd.xlane.f32.xlu0 %v442_v56  ;;  %v302_v56 = vrot.slane %v301_v44, 1 }
 0x300   :  { %v303_v5 = vadd.f32 %v302_v56, %v301_v44 }
 0x302   :  { %496 = vadd.xlane.f32.xlu0 %v495_v59 }
 0x34d   :  { %v125_v58 = vpop.xlane.xlu0 %124 }
 0x34e   :  { %v126_v2 = vrot.slane %v125_v58, 4 }
 0x350   :  { %v127_v4 = vadd.f32 %v126_v2, %v125_v58 }
 0x351   :  { %v179_v8 = vpop.xlane.xlu0 %178 }
 0x352   :  { %v128_v10 = vrot.slane %v127_v4, 2  ;;  %v180_v12 = vrot.slane %v179_v8, 4 }
 0x354   :  { %v181_v13 = vadd.f32 %v180_v12, %v179_v8  ;;  %v129_v14 = vadd.f32 %v128_v10, %v127_v4 }
 0x356   :  { %v182_v6 = vrot.slane %v181_v13, 2  ;;  %v130_v7 = vrot.slane %v129_v14, 1 }
 0x358   :  { %v131_v57 = vadd.f32 %v130_v7, %v129_v14  ;;  %v183_v17 = vadd.f32 %v182_v6, %v181_v13 }
 0x35a   :  { %567 = vpush %v131_v57  ;;  %v184_v60 = vrot.slane %v183_v17, 1 }
 0x35b   :  { %569 = vpush %v143_v18 }
 0x35c   :  { %v185_v20 = vadd.f32 %v184_v60, %v183_v17 }
 0x35e   :  { %571 = vpush %v185_v20 }
 0x35f   :  { %573 = vpush %v197_v22 }
 0x36d   :  { %v350_v23 = vpop.xlane.xlu1 %349 }
 0x36e   :  { %v351_v32 = vrot.slane %v350_v23, 4 }
 0x370   :  { %v352_v38 = vadd.f32 %v351_v32, %v350_v23 }
 0x371   :  { %v403_v28 = vpop.xlane.xlu1 %402 }
 0x372   :  { %v404_v39 = vrot.slane %v403_v28, 4  ;;  %v353_v48 = vrot.slane %v352_v38, 2 }
 0x374   :  { %v405_v49 = vadd.f32 %v404_v39, %v403_v28  ;;  %v354_v63 = vadd.f32 %v353_v48, %v352_v38 }
 0x375   :  { %v456_v36 = vpop.xlane.xlu1 %455 }
 0x376   :  { %v457_v50 = vrot.slane %v456_v36, 4  ;;  %v406_v25 = vrot.slane %v405_v49, 2  ;;  %v355_v13 = vrot.slane %v354_v63, 1 }
 0x378   :  { %v458_v59 = vadd.f32 %v457_v50, %v456_v36  ;;  %v407_v14 = vadd.f32 %v406_v25, %v405_v49  ;;  %v356_v22 = vadd.f32 %v355_v13, %v354_v63 }
 0x379   :  { %v509_v29 = vpop.xlane.xlu1 %508 }
 0x37a   :  { %v510_v61 = vrot.slane %v509_v29, 4  ;;  %v459_v9 = vrot.slane %v458_v59, 2  ;;  %v408_v3 = vrot.slane %v407_v14, 1 }
 0x37b   :  { %v232_v33 = vpop.xlane.xlu0 %231 }
 0x37c   :  { %v233_v34 = vrot.slane %v232_v33, 4  ;;  %v511_v10 = vadd.f32 %v510_v61, %v509_v29  ;;  %v460_v23 = vadd.f32 %v459_v9, %v458_v59  ;;  %v409_v21 = vadd.f32 %v408_v3, %v407_v14 }
 0x37e   :  { %v234_v37 = vadd.f32 %v233_v34, %v232_v33  ;;  %v512_v60 = vrot.slane %v511_v10, 2  ;;  %v461_v36 = vrot.slane %v460_v23, 1 }
 0x37f   :  { %v285_v40 = vpop.xlane.xlu0 %284 }
 0x380   :  { %v235_v41 = vrot.slane %v234_v37, 2  ;;  %v286_v42 = vrot.slane %v285_v40, 4  ;;  %v513_v35 = vadd.f32 %v512_v60, %v511_v10 }
 0x382   :  { %v287_v62 = vadd.f32 %v286_v42, %v285_v40  ;;  %v236_v43 = vadd.f32 %v235_v41, %v234_v37  ;;  %v462_v41 = vadd.f32 %v461_v36, %v460_v23  ;;  %v514_v42 = vrot.slane %v513_v35, 1 }
 0x383   :  { %v338_v11 = vpop.xlane.xlu0 %337 }
 0x384   :  { %v288_v46 = vrot.slane %v287_v62, 2  ;;  %v339_v47 = vrot.slane %v338_v11, 4  ;;  %v237_v51 = vrot.slane %v236_v43, 1 }
 0x386   :  { %v340_v53 = vadd.f32 %v339_v47, %v338_v11  ;;  %v238_v54 = vadd.f32 %v237_v51, %v236_v43  ;;  %v289_v55 = vadd.f32 %v288_v46, %v287_v62  ;;  %v515_v43 = vadd.f32 %v514_v42, %v513_v35 }
 0x387   :  { %v391_v24 = vpop.xlane.xlu0 %390 }
 0x388   :  { %v341_v0 = vrot.slane %v340_v53, 2  ;;  %v392_v1 = vrot.slane %v391_v24, 4  ;;  %575 = vpush %v238_v54  ;;  %v290_v58 = vrot.slane %v289_v55, 1 }
 0x389   :  { %577 = vpush %v250_v52 }
 0x38a   :  { %v393_v2 = vadd.f32 %v392_v1, %v391_v24  ;;  %v291_v4 = vadd.f32 %v290_v58, %v289_v55  ;;  %v342_v8 = vadd.f32 %v341_v0, %v340_v53 }
 0x38b   :  { %s568_s3 = spop %567  ;;  %v444_v12 = vpop.xlane.xlu0 %443 }
 0x38c   :  { %v394_v15 = vrot.slane %v393_v2, 2  ;;  %v133_v16 = vstv %s568_s3  ;;  %s570_s21 = spop %569  ;;  %v445_v6 = vrot.slane %v444_v12, 4  ;;  %579 = vpush %v291_v4  ;;  %v343_v7 = vrot.slane %v342_v8, 1 }
 0x38d   :  { %134 = vst [vmem:[#allocation3] sm:$0x1] %v133_v16  ;;  %v145_v57 = vstv %s570_s21  ;;  %581 = vpush %v303_v5 }
 0x38e   :  { %147 = vst [vmem:[#allocation3 + $0x8] sm:$0x1] %v145_v57  ;;  %v446_v17 = vadd.f32 %v445_v6, %v444_v12  ;;  %v344_v18 = vadd.f32 %v343_v7, %v342_v8  ;;  %v395_v19 = vadd.f32 %v394_v15, %v393_v2 }
 0x38f   :  { %s572_s0 = spop %571  ;;  %v497_v20 = vpop.xlane.xlu0 %496 }
 0x390   :  { %v447_v26 = vrot.slane %v446_v17, 2  ;;  %v187_v27 = vstv %s572_s0  ;;  %s574_s22 = spop %573  ;;  %v498_v28 = vrot.slane %v497_v20, 4  ;;  %583 = vpush %v344_v18  ;;  %v396_v30 = vrot.slane %v395_v19, 1 }
 0x391   :  { %188 = vst [vmem:[#allocation3 + $0x1] sm:$0x1] %v187_v27  ;;  %v199_v31 = vstv %s574_s22  ;;  %585 = vpush %v356_v22 }
 0x392   :  { %200 = vst [vmem:[#allocation3 + $0x9] sm:$0x1] %v199_v31  ;;  %v499_v32 = vadd.f32 %v498_v28, %v497_v20  ;;  %v397_v33 = vadd.f32 %v396_v30, %v395_v19  ;;  %v448_v34 = vadd.f32 %v447_v26, %v446_v17 }
 0x394   :  { %v500_v37 = vrot.slane %v499_v32, 2  ;;  %587 = vpush %v397_v33  ;;  %v449_v38 = vrot.slane %v448_v34, 1 }
 0x395   :  { %589 = vpush %v409_v21 }
 0x396   :  { %v501_v39 = vadd.f32 %v500_v37, %v499_v32  ;;  %v450_v40 = vadd.f32 %v449_v38, %v448_v34 }
 0x398   :  { %591 = vpush %v450_v40  ;;  %v502_v45 = vrot.slane %v501_v39, 1 }
 0x399   :  { %593 = vpush %v462_v41 }
 0x39a   :  { %v503_v62 = vadd.f32 %v502_v45, %v501_v39 }
 0x39c   :  { %595 = vpush %v503_v62 }
 0x39d   :  { %597 = vpush %v515_v43 }
 0x3b9   :  { %s576_s23 = spop %575 }
 0x3ba   :  { %v240_v44 = vstv %s576_s23  ;;  %s578_s24 = spop %577 }
 0x3bb   :  { %241 = vst [vmem:[#allocation3 + $0x2] sm:$0x1] %v240_v44  ;;  %v252_v48 = vstv %s578_s24 }
 0x3bc   :  { %253 = vst [vmem:[#allocation3 + $0xa] sm:$0x1] %v252_v48 }
 0x3bd   :  { %s580_s25 = spop %579 }
 0x3be   :  { %v293_v49 = vstv %s580_s25  ;;  %s582_s26 = spop %581 }
 0x3bf   :  { %294 = vst [vmem:[#allocation3 + $0x3] sm:$0x1] %v293_v49  ;;  %v305_v50 = vstv %s582_s26 }
 0x3c0   :  { %306 = vst [vmem:[#allocation3 + $0xb] sm:$0x1] %v305_v50 }
 0x3c1   :  { %s584_s27 = spop %583 }
 0x3c2   :  { %v346_v11 = vstv %s584_s27  ;;  %s586_s28 = spop %585 }
 0x3c3   :  { %347 = vst [vmem:[#allocation3 + $0x4] sm:$0x1] %v346_v11  ;;  %v358_v29 = vstv %s586_s28 }
 0x3c4   :  { %359 = vst [vmem:[#allocation3 + $0xc] sm:$0x1] %v358_v29 }
 0x3c5   :  { %s588_s29 = spop %587 }
 0x3c6   :  { %v399_v46 = vstv %s588_s29  ;;  %s590_s30 = spop %589 }
 0x3c7   :  { %400 = vst [vmem:[#allocation3 + $0x5] sm:$0x1] %v399_v46  ;;  %v411_v47 = vstv %s590_s30 }
 0x3c8   :  { %412 = vst [vmem:[#allocation3 + $0xd] sm:$0x1] %v411_v47 }
 0x3c9   :  { %s592_s5 = spop %591 }
 0x3ca   :  { %v452_v51 = vstv %s592_s5  ;;  %s594_s6 = spop %593 }
 0x3cb   :  { %453 = vst [vmem:[#allocation3 + $0x6] sm:$0x1] %v452_v51  ;;  %v464_v52 = vstv %s594_s6 }
 0x3cc   :  { %465 = vst [vmem:[#allocation3 + $0xe] sm:$0x1] %v464_v52 }
 0x3cd   :  { %s596_s9 = spop %595 }
 0x3ce   :  { %v505_v53 = vstv %s596_s9  ;;  %s598_s10 = spop %597 }
 0x3cf   :  { %506 = vst [vmem:[#allocation3 + $0x7] sm:$0x1] %v505_v53  ;;  %v517_v54 = vstv %s598_s10 }
 0x3d0   :  { %518 = vst [vmem:[#allocation3 + $0xf] sm:$0x1] %v517_v54 }
 0x3d1   :  { %638 = shalt.err (!%p635_p4)
}
 0x3d2   :  { %s639_s14 = scalar_lea.hbm %s910_s4, 256 }
 0x3d3   :  { %p640_p5 = scmp.ne.s32.totalorder %s910_s4, %s639_s14  ;;  %p643_p6 = scmp.lt.u32.totalorder %s639_s14, %s910_s4 }
 0x3d5   :  { %p645_p7 = pnand %p643_p6, %p640_p5 }
 0x3d7   :  { %648 = shalt.err (!%p645_p7)
}
 0x3d8   :  { %s655_s18 = smov 128   ;;  %s656_s19 = smov 8  }
 0x3d9   :  { %530 = dma.vmem_to_hbm [thread:$0]  %s525_s8, 256, %s910_s4, [#allocation4], %s655_s18, %s655_s18, %s656_s19  }
 0x3da   :  { %649 = dma.done.wait [#allocation4], 256  }
 0x3db   :  { %650 = vsyncadd [#allocation4], 4294967040 }
 0x3dc   :  { %534 = vsyncpa [#allocation4], 1 }

</bundles_post_ra>
